<compile_context>
chip_gen: v7x
topology: tpu7x:2x2x1
jax: 0.10.0
libtpu: 0.0.40
codegen_flags: <defaults>
</compile_context>

<pallas_src>
import jax
import jax.numpy as jnp
from jax import lax
from jax.experimental import pallas as pl
from jax.experimental.pallas import tpu as pltpu

EPS = 1e-5


def _im2col_3x3(pad_ref, H, W, Cin):
    """(H+2, W+2, Cin) padded ref -> (H*W, 9*Cin) im2col matrix (HWIO tap order)."""
    taps = [pad_ref[ky:ky + H, kx:kx + W, :].reshape(H * W, Cin)
            for ky in range(3) for kx in range(3)]
    return jnp.concatenate(taps, axis=1)


def _conv1_kernel(x_ref, w_ref, y_ref, st_ref, pad_ref):
    # x_ref : (1, H, W, Cin) f32   one image
    # w_ref : (9*Cin, C)     bf16  conv1 weights, im2col layout
    # y_ref : (1, H, W, C)   f32   raw conv1 output
    # st_ref: (1, 2, C)      f32   per-tile [sum; sum-of-squares]
    # pad_ref: (H+2, W+2, Cin) f32 zero-padded image scratch
    _, H, W, Cin = x_ref.shape
    C = y_ref.shape[3]

    pad_ref[...] = jnp.zeros(pad_ref.shape, pad_ref.dtype)
    pad_ref[1:H + 1, 1:W + 1, :] = x_ref[0]

    cols = _im2col_3x3(pad_ref, H, W, Cin).astype(jnp.bfloat16)
    y = jnp.dot(cols, w_ref[...], preferred_element_type=jnp.float32)  # (H*W, C)

    y_ref[...] = y.reshape(1, H, W, C)
    s = jnp.sum(y, axis=0, keepdims=True)
    ss = jnp.sum(y * y, axis=0, keepdims=True)
    st_ref[...] = jnp.concatenate([s, ss], axis=0).reshape(1, 2, C)


def _conv2_kernel(y1_ref, sc_ref, bs_ref, w_ref, y_ref, st_ref, pad_ref):
    # y1_ref: (1, H, W, C) f32    raw conv1 output
    # sc_ref/bs_ref: (1, C) f32   folded bn1 scale / bias
    # w_ref : (9*C, C) bf16
    # y_ref : (1, H, W, C) f32    raw conv2 output
    # st_ref: (1, 2, C) f32
    # pad_ref: (H+2, W+2, C) f32
    _, H, W, C = y1_ref.shape

    h1 = jnp.maximum(y1_ref[0] * sc_ref[0] + bs_ref[0], 0.0)   # bn1 + relu (fused scale/bias)

    pad_ref[...] = jnp.zeros(pad_ref.shape, pad_ref.dtype)
    pad_ref[1:H + 1, 1:W + 1, :] = h1

    cols = _im2col_3x3(pad_ref, H, W, C).astype(jnp.bfloat16)
    y = jnp.dot(cols, w_ref[...], preferred_element_type=jnp.float32)

    y_ref[...] = y.reshape(1, H, W, C)
    s = jnp.sum(y, axis=0, keepdims=True)
    ss = jnp.sum(y * y, axis=0, keepdims=True)
    st_ref[...] = jnp.concatenate([s, ss], axis=0).reshape(1, 2, C)


def _finalize_kernel(y2_ref, x_ref, sc_ref, bs_ref, o_ref):
    # out = relu(bn2(conv2) + shortcut); pure elementwise, any block layout.
    o_ref[...] = jnp.maximum(
        y2_ref[...] * sc_ref[...] + bs_ref[...] + x_ref[...], 0.0)


def _fold_bn(stats, gamma, beta, count):
    """(N_tiles, 2, C) partial [sum; sumsq] -> per-channel (scale, bias)."""
    s = jnp.sum(stats[:, 0, :], axis=0)
    ss = jnp.sum(stats[:, 1, :], axis=0)
    mean = s / count
    var = ss / count - mean * mean            # biased variance (PyTorch training mode)
    scale = gamma * lax.rsqrt(var + EPS)
    bias = beta - mean * scale
    return scale, bias


@jax.jit
def resblock_forward(x_nchw, w1, g1, b1, w2, g2, b2):
    """x_nchw: (N, Cin, H, W) f32 (PyTorch layout); w1/w2 HWIO. Returns NCHW."""
    x = jnp.transpose(x_nchw, (0, 2, 3, 1))              # NCHW -> NHWC
    N, H, W, Cin = x.shape
    C = w1.shape[-1]
    assert Cin == C, "identity-shortcut path requires in_channels == channels"
    count = N * H * W

    w1f = w1.reshape(9 * Cin, C).astype(jnp.bfloat16)    # im2col weight layout
    w2f = w2.reshape(9 * C, C).astype(jnp.bfloat16)

    parallel = pltpu.CompilerParams(dimension_semantics=("parallel",))

    # ---- pass A: conv1 + partial BN1 statistics ---------------------------
    y1, st1 = pl.pallas_call(
        _conv1_kernel,
        out_shape=(jax.ShapeDtypeStruct((N, H, W, C), jnp.float32),
                   jax.ShapeDtypeStruct((N, 2, C), jnp.float32)),
        grid_spec=pltpu.PrefetchScalarGridSpec(
            num_scalar_prefetch=0, grid=(N,),
            in_specs=[pl.BlockSpec((1, H, W, Cin), lambda i: (i, 0, 0, 0)),
                      pl.BlockSpec((9 * Cin, C), lambda i: (0, 0))],
            out_specs=(pl.BlockSpec((1, H, W, C), lambda i: (i, 0, 0, 0)),
                       pl.BlockSpec((1, 2, C), lambda i: (i, 0, 0))),
            scratch_shapes=[pltpu.VMEM((H + 2, W + 2, Cin), jnp.float32)]),
        compiler_params=parallel,
    )(x, w1f)
    scale1, bias1 = _fold_bn(st1, g1, b1, count)

    # ---- pass B: bn1 + relu + conv2 + partial BN2 statistics --------------
    y2, st2 = pl.pallas_call(
        _conv2_kernel,
        out_shape=(jax.ShapeDtypeStruct((N, H, W, C), jnp.float32),
                   jax.ShapeDtypeStruct((N, 2, C), jnp.float32)),
        grid_spec=pltpu.PrefetchScalarGridSpec(
            num_scalar_prefetch=0, grid=(N,),
            in_specs=[pl.BlockSpec((1, H, W, C), lambda i: (i, 0, 0, 0)),
                      pl.BlockSpec((1, C), lambda i: (0, 0)),
                      pl.BlockSpec((1, C), lambda i: (0, 0)),
                      pl.BlockSpec((9 * C, C), lambda i: (0, 0))],
            out_specs=(pl.BlockSpec((1, H, W, C), lambda i: (i, 0, 0, 0)),
                       pl.BlockSpec((1, 2, C), lambda i: (i, 0, 0))),
            scratch_shapes=[pltpu.VMEM((H + 2, W + 2, C), jnp.float32)]),
        compiler_params=parallel,
    )(y1, scale1.reshape(1, C), bias1.reshape(1, C), w2f)
    scale2, bias2 = _fold_bn(st2, g2, b2, count)

    # ---- pass C: bn2 + identity shortcut + relu ---------------------------
    hwc = H * W * C
    if hwc % 128 == 0:
        # lane-dense flat layout -> unmasked 128-wide stores even when C < 128
        rows = hwc // 128
        shp = (N, rows, 128)
        per_n = pl.BlockSpec((1, rows, 128), lambda i: (i, 0, 0))
        bcast = pl.BlockSpec((1, rows, 128), lambda i: (0, 0, 0))
        out = pl.pallas_call(
            _finalize_kernel,
            out_shape=jax.ShapeDtypeStruct(shp, jnp.float32),
            grid_spec=pltpu.PrefetchScalarGridSpec(
                num_scalar_prefetch=0, grid=(N,),
                in_specs=[per_n, per_n, bcast, bcast],
                out_specs=per_n),
            compiler_params=parallel,
        )(y2.reshape(shp), x.reshape(shp),
          jnp.tile(scale2, H * W).reshape(1, rows, 128),
          jnp.tile(bias2, H * W).reshape(1, rows, 128))
        out_nhwc = out.reshape(N, H, W, C)
    else:
        # fallback: NHWC blocks (masked stores if C is not lane-aligned)
        per_n = pl.BlockSpec((1, H, W, C), lambda i: (i, 0, 0, 0))
        bcast = pl.BlockSpec((1, 1, 1, C), lambda i: (0, 0, 0, 0))
        out_nhwc = pl.pallas_call(
            _finalize_kernel,
            out_shape=jax.ShapeDtypeStruct((N, H, W, C), jnp.float32),
            grid_spec=pltpu.PrefetchScalarGridSpec(
                num_scalar_prefetch=0, grid=(N,),
                in_specs=[per_n, per_n, bcast, bcast],
                out_specs=per_n),
            compiler_params=parallel,
        )(y2, x, scale2.reshape(1, 1, 1, C), bias2.reshape(1, 1, 1, C))

    return jnp.transpose(out_nhwc, (0, 3, 1, 2))          # NHWC -> NCHW


def ref_forward(x_nchw, w1, g1, b1, w2, g2, b2):
    """Pure-JAX f32 reference, training-mode BatchNorm."""
    x = jnp.transpose(x_nchw, (0, 2, 3, 1))

    def bn(y, g, b):
        mean = jnp.mean(y, axis=(0, 1, 2), keepdims=True)
        var = jnp.mean((y - mean) ** 2, axis=(0, 1, 2), keepdims=True)
        return (y - mean) * lax.rsqrt(var + EPS) * g + b

    dn = lax.conv_dimension_numbers(x.shape, w1.shape, ("NHWC", "HWIO", "NHWC"))
    y = lax.conv_general_dilated(x, w1, (1, 1), "SAME", dimension_numbers=dn)
    y = jax.nn.relu(bn(y, g1, b1))
    z = lax.conv_general_dilated(y, w2, (1, 1), "SAME", dimension_numbers=dn)
    z = bn(z, g2, b2)
    return jnp.transpose(jax.nn.relu(z + x), (0, 3, 1, 2))


if __name__ == "__main__":
    # Small shapes consistent with the module: batch=2, channels=4, spatial=16,
    # stride=1, in_channels == channels -> identity shortcut.
    N, C, H, W = 2, 4, 16, 16

    key = jax.random.PRNGKey(0)
    kx, k1, k2, kg1, kb1, kg2, kb2 = jax.random.split(key, 7)

    x = jax.random.normal(kx, (N, C, H, W), jnp.float32)
    # Conv weights created directly in HWIO layout (3, 3, Cin, Cout).
    w1 = 0.1 * jax.random.normal(k1, (3, 3, C, C), jnp.float32)
    w2 = 0.1 * jax.random.normal(k2, (3, 3, C, C), jnp.float32)
    # BN affine params (deterministic, nontrivial).
    g1 = 1.0 + 0.1 * jax.random.normal(kg1, (C,), jnp.float32)
    b1 = 0.1 * jax.random.normal(kb1, (C,), jnp.float32)
    g2 = 1.0 + 0.1 * jax.random.normal(kg2, (C,), jnp.float32)
    b2 = 0.1 * jax.random.normal(kb2, (C,), jnp.float32)

    out = jax.block_until_ready(resblock_forward(x, w1, g1, b1, w2, g2, b2))
    ref = jax.block_until_ready(ref_forward(x, w1, g1, b1, w2, g2, b2))

    assert out.shape == (N, C, H, W)
    # Tolerance sized for bf16 MXU inputs (f32 accumulation) vs. the all-f32
    # reference: two convs + two batchnorms compound to ~1e-2 absolute error.
    max_err = jnp.max(jnp.abs(out - ref))
    assert jnp.allclose(out, ref, atol=7e-2, rtol=7e-2), f"max abs err = {max_err}"

    print("KERNEL_OK")
</pallas_src>

<mosaic_0001>
module attributes {stable_mosaic.version = 11 : i64} {
  func.func @_conv1_kernel(%arg0: i32, %arg1: memref<1x16x16x4xf32, #tpu.memory_space<vmem>>, %arg2: memref<36x4xbf16, #tpu.memory_space<vmem>>, %arg3: memref<1x16x16x4xf32, #tpu.memory_space<vmem>>, %arg4: memref<1x2x4xf32, #tpu.memory_space<vmem>>, %arg5: memref<18x18x4xf32, #tpu.memory_space<vmem>>) attributes {dimension_semantics = [#tpu.dimension_semantics<parallel>], iteration_bounds = array<i64: 2>, scalar_prefetch = 0 : i64, scratch_operands = 1 : i64, tpu.core_type = #tpu.core_type<tc>, window_params = [{transform_indices = @transform_0, window_bounds = array<i64: 1, 16, 16, 4>}, {pipeline_mode = #tpu.pipeline_mode<synchronous>, transform_indices = @transform_1, window_bounds = array<i64: 36, 4>}, {transform_indices = @transform_2, window_bounds = array<i64: 1, 16, 16, 4>}, {transform_indices = @transform_3, window_bounds = array<i64: 1, 2, 4>}]} {
    %cst = arith.constant 0.000000e+00 : f32
    %0 = vector.broadcast %cst : f32 to vector<18x18x4xf32>
    %c0 = arith.constant 0 : index
    %c0_0 = arith.constant 0 : index
    %c0_1 = arith.constant 0 : index
    %1 = vector.load %arg5[%c0, %c0_0, %c0_1] : memref<18x18x4xf32, #tpu.memory_space<vmem>>, vector<18x18x4xf32>
    tpu.vector_store %arg5[%c0, %c0_0, %c0_1], %0 {strides = array<i32>} : memref<18x18x4xf32, #tpu.memory_space<vmem>>, vector<18x18x4xf32>,
    %c0_2 = arith.constant 0 : index
    %c0_3 = arith.constant 0 : index
    %c0_4 = arith.constant 0 : index
    %c0_5 = arith.constant 0 : index
    %2 = vector.load %arg1[%c0_2, %c0_3, %c0_4, %c0_5] : memref<1x16x16x4xf32, #tpu.memory_space<vmem>>, vector<1x16x16x4xf32>
    %3 = vector.shape_cast %2 : vector<1x16x16x4xf32> to vector<16x16x4xf32>
    %c1 = arith.constant 1 : index
    %c1_6 = arith.constant 1 : index
    %c0_7 = arith.constant 0 : index
    %4 = vector.load %arg5[%c1, %c1_6, %c0_7] : memref<18x18x4xf32, #tpu.memory_space<vmem>>, vector<16x16x4xf32>
    tpu.vector_store %arg5[%c1, %c1_6, %c0_7], %3 {strides = array<i32>} : memref<18x18x4xf32, #tpu.memory_space<vmem>>, vector<16x16x4xf32>,
    %c0_8 = arith.constant 0 : index
    %c0_9 = arith.constant 0 : index
    %c0_10 = arith.constant 0 : index
    %5 = vector.load %arg5[%c0_8, %c0_9, %c0_10] : memref<18x18x4xf32, #tpu.memory_space<vmem>>, vector<16x16x4xf32>
    %6 = vector.shape_cast %5 : vector<16x16x4xf32> to vector<256x4xf32>
    %c0_11 = arith.constant 0 : index
    %c1_12 = arith.constant 1 : index
    %c0_13 = arith.constant 0 : index
    %7 = vector.load %arg5[%c0_11, %c1_12, %c0_13] : memref<18x18x4xf32, #tpu.memory_space<vmem>>, vector<16x16x4xf32>
    %8 = vector.shape_cast %7 : vector<16x16x4xf32> to vector<256x4xf32>
    %c0_14 = arith.constant 0 : index
    %c2 = arith.constant 2 : index
    %c0_15 = arith.constant 0 : index
    %9 = vector.load %arg5[%c0_14, %c2, %c0_15] : memref<18x18x4xf32, #tpu.memory_space<vmem>>, vector<16x16x4xf32>
    %10 = vector.shape_cast %9 : vector<16x16x4xf32> to vector<256x4xf32>
    %c1_16 = arith.constant 1 : index
    %c0_17 = arith.constant 0 : index
    %c0_18 = arith.constant 0 : index
    %11 = vector.load %arg5[%c1_16, %c0_17, %c0_18] : memref<18x18x4xf32, #tpu.memory_space<vmem>>, vector<16x16x4xf32>
    %12 = vector.shape_cast %11 : vector<16x16x4xf32> to vector<256x4xf32>
    %c1_19 = arith.constant 1 : index
    %c1_20 = arith.constant 1 : index
    %c0_21 = arith.constant 0 : index
    %13 = vector.load %arg5[%c1_19, %c1_20, %c0_21] : memref<18x18x4xf32, #tpu.memory_space<vmem>>, vector<16x16x4xf32>
    %14 = vector.shape_cast %13 : vector<16x16x4xf32> to vector<256x4xf32>
    %c1_22 = arith.constant 1 : index
    %c2_23 = arith.constant 2 : index
    %c0_24 = arith.constant 0 : index
    %15 = vector.load %arg5[%c1_22, %c2_23, %c0_24] : memref<18x18x4xf32, #tpu.memory_space<vmem>>, vector<16x16x4xf32>
    %16 = vector.shape_cast %15 : vector<16x16x4xf32> to vector<256x4xf32>
    %c2_25 = arith.constant 2 : index
    %c0_26 = arith.constant 0 : index
    %c0_27 = arith.constant 0 : index
    %17 = vector.load %arg5[%c2_25, %c0_26, %c0_27] : memref<18x18x4xf32, #tpu.memory_space<vmem>>, vector<16x16x4xf32>
    %18 = vector.shape_cast %17 : vector<16x16x4xf32> to vector<256x4xf32>
    %c2_28 = arith.constant 2 : index
    %c1_29 = arith.constant 1 : index
    %c0_30 = arith.constant 0 : index
    %19 = vector.load %arg5[%c2_28, %c1_29, %c0_30] : memref<18x18x4xf32, #tpu.memory_space<vmem>>, vector<16x16x4xf32>
    %20 = vector.shape_cast %19 : vector<16x16x4xf32> to vector<256x4xf32>
    %c2_31 = arith.constant 2 : index
    %c2_32 = arith.constant 2 : index
    %c0_33 = arith.constant 0 : index
    %21 = vector.load %arg5[%c2_31, %c2_32, %c0_33] : memref<18x18x4xf32, #tpu.memory_space<vmem>>, vector<16x16x4xf32>
    %22 = vector.shape_cast %21 : vector<16x16x4xf32> to vector<256x4xf32>
    %23 = tpu.concatenate %6, %8, %10, %12, %14, %16, %18, %20, %22 in 1 : vector<256x4xf32>, vector<256x4xf32>, vector<256x4xf32>, vector<256x4xf32>, vector<256x4xf32>, vector<256x4xf32>, vector<256x4xf32>, vector<256x4xf32>, vector<256x4xf32> -> vector<256x36xf32>
    %24 = arith.truncf %23 : vector<256x36xf32> to vector<256x36xbf16>
    %c0_34 = arith.constant 0 : index
    %c0_35 = arith.constant 0 : index
    %25 = vector.load %arg2[%c0_34, %c0_35] : memref<36x4xbf16, #tpu.memory_space<vmem>>, vector<36x4xbf16>
    %cst_36 = arith.constant dense<0.000000e+00> : vector<256x4xf32>
    %26 = tpu.matmul %24, %25, %cst_36 {dimension_numbers = #tpu.dot_dimension_numbers<[1], [0], [0], [1], [0, 0, 1, 1], [], []>} : vector<256x36xbf16>, vector<36x4xbf16>, vector<256x4xf32> -> vector<256x4xf32>
    %27 = vector.shape_cast %26 : vector<256x4xf32> to vector<1x16x16x4xf32>
    %c0_37 = arith.constant 0 : index
    %c0_38 = arith.constant 0 : index
    %c0_39 = arith.constant 0 : index
    %c0_40 = arith.constant 0 : index
    %28 = vector.load %arg3[%c0_37, %c0_38, %c0_39, %c0_40] : memref<1x16x16x4xf32, #tpu.memory_space<vmem>>, vector<1x16x16x4xf32>
    tpu.vector_store %arg3[%c0_37, %c0_38, %c0_39, %c0_40], %27 {strides = array<i32>} : memref<1x16x16x4xf32, #tpu.memory_space<vmem>>, vector<1x16x16x4xf32>,
    %cst_41 = arith.constant dense<0.000000e+00> : vector<4xf32>
    %29 = vector.multi_reduction <add>, %26, %cst_41 [0] : vector<256x4xf32> to vector<4xf32>
    %30 = vector.shape_cast %29 : vector<4xf32> to vector<1x4xf32>
    %31 = arith.mulf %26, %26 : vector<256x4xf32>
    %cst_42 = arith.constant dense<0.000000e+00> : vector<4xf32>
    %32 = vector.multi_reduction <add>, %31, %cst_42 [0] : vector<256x4xf32> to vector<4xf32>
    %33 = vector.shape_cast %32 : vector<4xf32> to vector<1x4xf32>
    %34 = tpu.concatenate %30, %33 in 0 : vector<1x4xf32>, vector<1x4xf32> -> vector<2x4xf32>
    %35 = vector.shape_cast %34 : vector<2x4xf32> to vector<1x2x4xf32>
    %c0_43 = arith.constant 0 : index
    %c0_44 = arith.constant 0 : index
    %c0_45 = arith.constant 0 : index
    %36 = vector.load %arg4[%c0_43, %c0_44, %c0_45] : memref<1x2x4xf32, #tpu.memory_space<vmem>>, vector<1x2x4xf32>
    tpu.vector_store %arg4[%c0_43, %c0_44, %c0_45], %35 {strides = array<i32>} : memref<1x2x4xf32, #tpu.memory_space<vmem>>, vector<1x2x4xf32>,
    return
  }
  func.func @transform_0(%arg0: i32) -> (i32, i32, i32, i32) {
    %c0_i32 = arith.constant 0 : i32
    %c0_i32_0 = arith.constant 0 : i32
    %c0_i32_1 = arith.constant 0 : i32
    %c0_i32_2 = arith.constant 0 : i32
    return %arg0, %c0_i32, %c0_i32_0, %c0_i32_1 : i32, i32, i32, i32
  }
  func.func @transform_1(%arg0: i32) -> (i32, i32) {
    %c0_i32 = arith.constant 0 : i32
    %c0_i32_0 = arith.constant 0 : i32
    %c0_i32_1 = arith.constant 0 : i32
    return %c0_i32, %c0_i32_0 : i32, i32
  }
  func.func @transform_2(%arg0: i32) -> (i32, i32, i32, i32) {
    %c0_i32 = arith.constant 0 : i32
    %c0_i32_0 = arith.constant 0 : i32
    %c0_i32_1 = arith.constant 0 : i32
    %c0_i32_2 = arith.constant 0 : i32
    return %arg0, %c0_i32, %c0_i32_0, %c0_i32_1 : i32, i32, i32, i32
  }
  func.func @transform_3(%arg0: i32) -> (i32, i32, i32) {
    %c0_i32 = arith.constant 0 : i32
    %c0_i32_0 = arith.constant 0 : i32
    %c0_i32_1 = arith.constant 0 : i32
    return %arg0, %c0_i32, %c0_i32_0 : i32, i32, i32
  }
}

module attributes {stable_mosaic.version = 11 : i64} {
  func.func @_conv2_kernel(%arg0: i32, %arg1: memref<1x16x16x4xf32, #tpu.memory_space<vmem>>, %arg2: memref<1x4xf32, #tpu.memory_space<vmem>>, %arg3: memref<1x4xf32, #tpu.memory_space<vmem>>, %arg4: memref<36x4xbf16, #tpu.memory_space<vmem>>, %arg5: memref<1x16x16x4xf32, #tpu.memory_space<vmem>>, %arg6: memref<1x2x4xf32, #tpu.memory_space<vmem>>, %arg7: memref<18x18x4xf32, #tpu.memory_space<vmem>>) attributes {dimension_semantics = [#tpu.dimension_semantics<parallel>], iteration_bounds = array<i64: 2>, scalar_prefetch = 0 : i64, scratch_operands = 1 : i64, tpu.core_type = #tpu.core_type<tc>, window_params = [{transform_indices = @transform_0, window_bounds = array<i64: 1, 16, 16, 4>}, {pipeline_mode = #tpu.pipeline_mode<synchronous>, transform_indices = @transform_1, window_bounds = array<i64: 1, 4>}, {pipeline_mode = #tpu.pipeline_mode<synchronous>, transform_indices = @transform_2, window_bounds = array<i64: 1, 4>}, {pipeline_mode = #tpu.pipeline_mode<synchronous>, transform_indices = @transform_3, window_bounds = array<i64: 36, 4>}, {transform_indices = @transform_4, window_bounds = array<i64: 1, 16, 16, 4>}, {transform_indices = @transform_5, window_bounds = array<i64: 1, 2, 4>}]} {
    %c0 = arith.constant 0 : index
    %c0_0 = arith.constant 0 : index
    %c0_1 = arith.constant 0 : index
    %c0_2 = arith.constant 0 : index
    %0 = vector.load %arg1[%c0, %c0_0, %c0_1, %c0_2] : memref<1x16x16x4xf32, #tpu.memory_space<vmem>>, vector<1x16x16x4xf32>
    %1 = vector.shape_cast %0 : vector<1x16x16x4xf32> to vector<16x16x4xf32>
    %c0_3 = arith.constant 0 : index
    %c0_4 = arith.constant 0 : index
    %2 = vector.load %arg2[%c0_3, %c0_4] : memref<1x4xf32, #tpu.memory_space<vmem>>, vector<1x4xf32>
    %3 = vector.shape_cast %2 : vector<1x4xf32> to vector<4xf32>
    %4 = vector.shape_cast %3 : vector<4xf32> to vector<1x1x4xf32>
    %5 = vector.broadcast %4 : vector<1x1x4xf32> to vector<16x16x4xf32>
    %6 = arith.mulf %1, %5 : vector<16x16x4xf32>
    %c0_5 = arith.constant 0 : index
    %c0_6 = arith.constant 0 : index
    %7 = vector.load %arg3[%c0_5, %c0_6] : memref<1x4xf32, #tpu.memory_space<vmem>>, vector<1x4xf32>
    %8 = vector.shape_cast %7 : vector<1x4xf32> to vector<4xf32>
    %9 = vector.shape_cast %8 : vector<4xf32> to vector<1x1x4xf32>
    %10 = vector.broadcast %9 : vector<1x1x4xf32> to vector<16x16x4xf32>
    %11 = arith.addf %6, %10 : vector<16x16x4xf32>
    %cst = arith.constant 0.000000e+00 : f32
    %12 = vector.broadcast %cst : f32 to vector<16x16x4xf32>
    %13 = arith.maximumf %11, %12 : vector<16x16x4xf32>
    %cst_7 = arith.constant 0.000000e+00 : f32
    %14 = vector.broadcast %cst_7 : f32 to vector<18x18x4xf32>
    %c0_8 = arith.constant 0 : index
    %c0_9 = arith.constant 0 : index
    %c0_10 = arith.constant 0 : index
    %15 = vector.load %arg7[%c0_8, %c0_9, %c0_10] : memref<18x18x4xf32, #tpu.memory_space<vmem>>, vector<18x18x4xf32>
    tpu.vector_store %arg7[%c0_8, %c0_9, %c0_10], %14 {strides = array<i32>} : memref<18x18x4xf32, #tpu.memory_space<vmem>>, vector<18x18x4xf32>,
    %c1 = arith.constant 1 : index
    %c1_11 = arith.constant 1 : index
    %c0_12 = arith.constant 0 : index
    %16 = vector.load %arg7[%c1, %c1_11, %c0_12] : memref<18x18x4xf32, #tpu.memory_space<vmem>>, vector<16x16x4xf32>
    tpu.vector_store %arg7[%c1, %c1_11, %c0_12], %13 {strides = array<i32>} : memref<18x18x4xf32, #tpu.memory_space<vmem>>, vector<16x16x4xf32>,
    %c0_13 = arith.constant 0 : index
    %c0_14 = arith.constant 0 : index
    %c0_15 = arith.constant 0 : index
    %17 = vector.load %arg7[%c0_13, %c0_14, %c0_15] : memref<18x18x4xf32, #tpu.memory_space<vmem>>, vector<16x16x4xf32>
    %18 = vector.shape_cast %17 : vector<16x16x4xf32> to vector<256x4xf32>
    %c0_16 = arith.constant 0 : index
    %c1_17 = arith.constant 1 : index
    %c0_18 = arith.constant 0 : index
    %19 = vector.load %arg7[%c0_16, %c1_17, %c0_18] : memref<18x18x4xf32, #tpu.memory_space<vmem>>, vector<16x16x4xf32>
    %20 = vector.shape_cast %19 : vector<16x16x4xf32> to vector<256x4xf32>
    %c0_19 = arith.constant 0 : index
    %c2 = arith.constant 2 : index
    %c0_20 = arith.constant 0 : index
    %21 = vector.load %arg7[%c0_19, %c2, %c0_20] : memref<18x18x4xf32, #tpu.memory_space<vmem>>, vector<16x16x4xf32>
    %22 = vector.shape_cast %21 : vector<16x16x4xf32> to vector<256x4xf32>
    %c1_21 = arith.constant 1 : index
    %c0_22 = arith.constant 0 : index
    %c0_23 = arith.constant 0 : index
    %23 = vector.load %arg7[%c1_21, %c0_22, %c0_23] : memref<18x18x4xf32, #tpu.memory_space<vmem>>, vector<16x16x4xf32>
    %24 = vector.shape_cast %23 : vector<16x16x4xf32> to vector<256x4xf32>
    %c1_24 = arith.constant 1 : index
    %c1_25 = arith.constant 1 : index
    %c0_26 = arith.constant 0 : index
    %25 = vector.load %arg7[%c1_24, %c1_25, %c0_26] : memref<18x18x4xf32, #tpu.memory_space<vmem>>, vector<16x16x4xf32>
    %26 = vector.shape_cast %25 : vector<16x16x4xf32> to vector<256x4xf32>
    %c1_27 = arith.constant 1 : index
    %c2_28 = arith.constant 2 : index
    %c0_29 = arith.constant 0 : index
    %27 = vector.load %arg7[%c1_27, %c2_28, %c0_29] : memref<18x18x4xf32, #tpu.memory_space<vmem>>, vector<16x16x4xf32>
    %28 = vector.shape_cast %27 : vector<16x16x4xf32> to vector<256x4xf32>
    %c2_30 = arith.constant 2 : index
    %c0_31 = arith.constant 0 : index
    %c0_32 = arith.constant 0 : index
    %29 = vector.load %arg7[%c2_30, %c0_31, %c0_32] : memref<18x18x4xf32, #tpu.memory_space<vmem>>, vector<16x16x4xf32>
    %30 = vector.shape_cast %29 : vector<16x16x4xf32> to vector<256x4xf32>
    %c2_33 = arith.constant 2 : index
    %c1_34 = arith.constant 1 : index
    %c0_35 = arith.constant 0 : index
    %31 = vector.load %arg7[%c2_33, %c1_34, %c0_35] : memref<18x18x4xf32, #tpu.memory_space<vmem>>, vector<16x16x4xf32>
    %32 = vector.shape_cast %31 : vector<16x16x4xf32> to vector<256x4xf32>
    %c2_36 = arith.constant 2 : index
    %c2_37 = arith.constant 2 : index
    %c0_38 = arith.constant 0 : index
    %33 = vector.load %arg7[%c2_36, %c2_37, %c0_38] : memref<18x18x4xf32, #tpu.memory_space<vmem>>, vector<16x16x4xf32>
    %34 = vector.shape_cast %33 : vector<16x16x4xf32> to vector<256x4xf32>
    %35 = tpu.concatenate %18, %20, %22, %24, %26, %28, %30, %32, %34 in 1 : vector<256x4xf32>, vector<256x4xf32>, vector<256x4xf32>, vector<256x4xf32>, vector<256x4xf32>, vector<256x4xf32>, vector<256x4xf32>, vector<256x4xf32>, vector<256x4xf32> -> vector<256x36xf32>
    %36 = arith.truncf %35 : vector<256x36xf32> to vector<256x36xbf16>
    %c0_39 = arith.constant 0 : index
    %c0_40 = arith.constant 0 : index
    %37 = vector.load %arg4[%c0_39, %c0_40] : memref<36x4xbf16, #tpu.memory_space<vmem>>, vector<36x4xbf16>
    %cst_41 = arith.constant dense<0.000000e+00> : vector<256x4xf32>
    %38 = tpu.matmul %36, %37, %cst_41 {dimension_numbers = #tpu.dot_dimension_numbers<[1], [0], [0], [1], [0, 0, 1, 1], [], []>} : vector<256x36xbf16>, vector<36x4xbf16>, vector<256x4xf32> -> vector<256x4xf32>
    %39 = vector.shape_cast %38 : vector<256x4xf32> to vector<1x16x16x4xf32>
    %c0_42 = arith.constant 0 : index
    %c0_43 = arith.constant 0 : index
    %c0_44 = arith.constant 0 : index
    %c0_45 = arith.constant 0 : index
    %40 = vector.load %arg5[%c0_42, %c0_43, %c0_44, %c0_45] : memref<1x16x16x4xf32, #tpu.memory_space<vmem>>, vector<1x16x16x4xf32>
    tpu.vector_store %arg5[%c0_42, %c0_43, %c0_44, %c0_45], %39 {strides = array<i32>} : memref<1x16x16x4xf32, #tpu.memory_space<vmem>>, vector<1x16x16x4xf32>,
    %cst_46 = arith.constant dense<0.000000e+00> : vector<4xf32>
    %41 = vector.multi_reduction <add>, %38, %cst_46 [0] : vector<256x4xf32> to vector<4xf32>
    %42 = vector.shape_cast %41 : vector<4xf32> to vector<1x4xf32>
    %43 = arith.mulf %38, %38 : vector<256x4xf32>
    %cst_47 = arith.constant dense<0.000000e+00> : vector<4xf32>
    %44 = vector.multi_reduction <add>, %43, %cst_47 [0] : vector<256x4xf32> to vector<4xf32>
    %45 = vector.shape_cast %44 : vector<4xf32> to vector<1x4xf32>
    %46 = tpu.concatenate %42, %45 in 0 : vector<1x4xf32>, vector<1x4xf32> -> vector<2x4xf32>
    %47 = vector.shape_cast %46 : vector<2x4xf32> to vector<1x2x4xf32>
    %c0_48 = arith.constant 0 : index
    %c0_49 = arith.constant 0 : index
    %c0_50 = arith.constant 0 : index
    %48 = vector.load %arg6[%c0_48, %c0_49, %c0_50] : memref<1x2x4xf32, #tpu.memory_space<vmem>>, vector<1x2x4xf32>
    tpu.vector_store %arg6[%c0_48, %c0_49, %c0_50], %47 {strides = array<i32>} : memref<1x2x4xf32, #tpu.memory_space<vmem>>, vector<1x2x4xf32>,
    return
  }
  func.func @transform_0(%arg0: i32) -> (i32, i32, i32, i32) {
    %c0_i32 = arith.constant 0 : i32
    %c0_i32_0 = arith.constant 0 : i32
    %c0_i32_1 = arith.constant 0 : i32
    %c0_i32_2 = arith.constant 0 : i32
    return %arg0, %c0_i32, %c0_i32_0, %c0_i32_1 : i32, i32, i32, i32
  }
  func.func @transform_1(%arg0: i32) -> (i32, i32) {
    %c0_i32 = arith.constant 0 : i32
    %c0_i32_0 = arith.constant 0 : i32
    %c0_i32_1 = arith.constant 0 : i32
    return %c0_i32, %c0_i32_0 : i32, i32
  }
  func.func @transform_2(%arg0: i32) -> (i32, i32) {
    %c0_i32 = arith.constant 0 : i32
    %c0_i32_0 = arith.constant 0 : i32
    %c0_i32_1 = arith.constant 0 : i32
    return %c0_i32, %c0_i32_0 : i32, i32
  }
  func.func @transform_3(%arg0: i32) -> (i32, i32) {
    %c0_i32 = arith.constant 0 : i32
    %c0_i32_0 = arith.constant 0 : i32
    %c0_i32_1 = arith.constant 0 : i32
    return %c0_i32, %c0_i32_0 : i32, i32
  }
  func.func @transform_4(%arg0: i32) -> (i32, i32, i32, i32) {
    %c0_i32 = arith.constant 0 : i32
    %c0_i32_0 = arith.constant 0 : i32
    %c0_i32_1 = arith.constant 0 : i32
    %c0_i32_2 = arith.constant 0 : i32
    return %arg0, %c0_i32, %c0_i32_0, %c0_i32_1 : i32, i32, i32, i32
  }
  func.func @transform_5(%arg0: i32) -> (i32, i32, i32) {
    %c0_i32 = arith.constant 0 : i32
    %c0_i32_0 = arith.constant 0 : i32
    %c0_i32_1 = arith.constant 0 : i32
    return %arg0, %c0_i32, %c0_i32_0 : i32, i32, i32
  }
}

module attributes {stable_mosaic.version = 11 : i64} {
  func.func @_finalize_kernel(%arg0: i32, %arg1: memref<1x8x128xf32, #tpu.memory_space<vmem>>, %arg2: memref<1x8x128xf32, #tpu.memory_space<vmem>>, %arg3: memref<1x8x128xf32, #tpu.memory_space<vmem>>, %arg4: memref<1x8x128xf32, #tpu.memory_space<vmem>>, %arg5: memref<1x8x128xf32, #tpu.memory_space<vmem>>) attributes {dimension_semantics = [#tpu.dimension_semantics<parallel>], iteration_bounds = array<i64: 2>, scalar_prefetch = 0 : i64, scratch_operands = 0 : i64, tpu.core_type = #tpu.core_type<tc>, window_params = [{transform_indices = @transform_0, window_bounds = array<i64: 1, 8, 128>}, {transform_indices = @transform_1, window_bounds = array<i64: 1, 8, 128>}, {pipeline_mode = #tpu.pipeline_mode<synchronous>, transform_indices = @transform_2, window_bounds = array<i64: 1, 8, 128>}, {pipeline_mode = #tpu.pipeline_mode<synchronous>, transform_indices = @transform_3, window_bounds = array<i64: 1, 8, 128>}, {transform_indices = @transform_4, window_bounds = array<i64: 1, 8, 128>}]} {
    %c0 = arith.constant 0 : index
    %c0_0 = arith.constant 0 : index
    %c0_1 = arith.constant 0 : index
    %0 = vector.load %arg1[%c0, %c0_0, %c0_1] : memref<1x8x128xf32, #tpu.memory_space<vmem>>, vector<1x8x128xf32>
    %c0_2 = arith.constant 0 : index
    %c0_3 = arith.constant 0 : index
    %c0_4 = arith.constant 0 : index
    %1 = vector.load %arg3[%c0_2, %c0_3, %c0_4] : memref<1x8x128xf32, #tpu.memory_space<vmem>>, vector<1x8x128xf32>
    %2 = arith.mulf %0, %1 : vector<1x8x128xf32>
    %c0_5 = arith.constant 0 : index
    %c0_6 = arith.constant 0 : index
    %c0_7 = arith.constant 0 : index
    %3 = vector.load %arg4[%c0_5, %c0_6, %c0_7] : memref<1x8x128xf32, #tpu.memory_space<vmem>>, vector<1x8x128xf32>
    %4 = arith.addf %2, %3 : vector<1x8x128xf32>
    %c0_8 = arith.constant 0 : index
    %c0_9 = arith.constant 0 : index
    %c0_10 = arith.constant 0 : index
    %5 = vector.load %arg2[%c0_8, %c0_9, %c0_10] : memref<1x8x128xf32, #tpu.memory_space<vmem>>, vector<1x8x128xf32>
    %6 = arith.addf %4, %5 : vector<1x8x128xf32>
    %cst = arith.constant 0.000000e+00 : f32
    %7 = vector.broadcast %cst : f32 to vector<1x8x128xf32>
    %8 = arith.maximumf %6, %7 : vector<1x8x128xf32>
    %c0_11 = arith.constant 0 : index
    %c0_12 = arith.constant 0 : index
    %c0_13 = arith.constant 0 : index
    %9 = vector.load %arg5[%c0_11, %c0_12, %c0_13] : memref<1x8x128xf32, #tpu.memory_space<vmem>>, vector<1x8x128xf32>
    tpu.vector_store %arg5[%c0_11, %c0_12, %c0_13], %8 {strides = array<i32>} : memref<1x8x128xf32, #tpu.memory_space<vmem>>, vector<1x8x128xf32>,
    return
  }
  func.func @transform_0(%arg0: i32) -> (i32, i32, i32) {
    %c0_i32 = arith.constant 0 : i32
    %c0_i32_0 = arith.constant 0 : i32
    %c0_i32_1 = arith.constant 0 : i32
    return %arg0, %c0_i32, %c0_i32_0 : i32, i32, i32
  }
  func.func @transform_1(%arg0: i32) -> (i32, i32, i32) {
    %c0_i32 = arith.constant 0 : i32
    %c0_i32_0 = arith.constant 0 : i32
    %c0_i32_1 = arith.constant 0 : i32
    return %arg0, %c0_i32, %c0_i32_0 : i32, i32, i32
  }
  func.func @transform_2(%arg0: i32) -> (i32, i32, i32) {
    %c0_i32 = arith.constant 0 : i32
    %c0_i32_0 = arith.constant 0 : i32
    %c0_i32_1 = arith.constant 0 : i32
    %c0_i32_2 = arith.constant 0 : i32
    return %c0_i32, %c0_i32_0, %c0_i32_1 : i32, i32, i32
  }
  func.func @transform_3(%arg0: i32) -> (i32, i32, i32) {
    %c0_i32 = arith.constant 0 : i32
    %c0_i32_0 = arith.constant 0 : i32
    %c0_i32_1 = arith.constant 0 : i32
    %c0_i32_2 = arith.constant 0 : i32
    return %c0_i32, %c0_i32_0, %c0_i32_1 : i32, i32, i32
  }
  func.func @transform_4(%arg0: i32) -> (i32, i32, i32) {
    %c0_i32 = arith.constant 0 : i32
    %c0_i32_0 = arith.constant 0 : i32
    %c0_i32_1 = arith.constant 0 : i32
    return %arg0, %c0_i32, %c0_i32_0 : i32, i32, i32
  }
}

</mosaic_0001>

<bundles_post_ra>
// kernel: resblock_forward.5
= control target key start
LH: loop header
LB: loop body
LE: loop exit
PB: predicated region body
PF: predicated region fallthrough
CT: control target
= control target key end

     0   :  { %s306_s15 = smov 0   ;;  %s350_s0 = inlined_call_operand.vmem [shape: f32[2,8,128], index: 0, kind: input, shape index: {}]   ;;  %s351_s1 = inlined_call_operand.vmem [shape: f32[2,8,128], index: 1, kind: input, shape index: {}]   ;;  %s352_s2 = inlined_call_operand.vmem [shape: f32[1,8,128], index: 2, kind: input, shape index: {}]   ;;  %s353_s3 = inlined_call_operand.vmem [shape: f32[1,8,128], index: 3, kind: input, shape index: {}]   ;;  %s354_s4 = inlined_call_operand.vmem [shape: f32[2,8,128], index: 4, kind: output, shape index: {}]  }
   0x1 LB: > { %s284_s16 = sadd.s32 4294967295, %s308_s15   ;;  %p288_p0 = scmp.ge.s32.totalorder %s308_s15, 1  ;;  %s308_s15 = sphi %s306_s15, %s14_s15  }
   0x2   : > { %p170_p1 = scmp.lt.s32.totalorder %s308_s15, 3 }
   0x4   : > { %p171_p2 = pnand %p288_p0, %p170_p1 }
   0x5   : > { %p198_p3 = scmp.lt.s32.totalorder (!%p171_p2), %s284_s16, 1  ;;  %v211_v0 = vld [vmem:[%s352_s2] sm:$0xff] (!%p171_p2) }
   0x6   : > { %174 = sbr.rel (%p171_p2) target bundleno = 26 (0x1a), region = 36  ;;  %v213_v2 = vld [vmem:[%s353_s3] sm:$0xff] (!%p171_p2) }
   0xd   : > { %s356_s16 = smov (!%p198_p3, %s284_s16), 1 }
   0xe   : > { %s289_s17 = sshll.u32 %s356_s16, 3 }
   0xf   : > { %s201_s22 = scalar_lea.vmem %s350_s0, %s289_s17  ;;  %s205_s25 = scalar_lea.vmem %s351_s1, %s289_s17 }
  0x10   : > { %v210_v1 = vld [vmem:[%s201_s22] sm:$0xff]  ;;  %s209_s30 = scalar_lea.vmem %s354_s4, %s289_s17 }
  0x11   : > { %v212_v3 = vmul.f32 %v211_v0, %v210_v1  ;;  %v215_v4 = vld [vmem:[%s205_s25] sm:$0xff] }
  0x13   : > { %v214_v5 = vadd.f32 %v213_v2, %v212_v3 }
  0x15   : > { %v216_v6 = vadd.f32 %v215_v4, %v214_v5 }
  0x17   : > { %v217_v7 = vmax.f32 %v216_v6, 0.0 }
  0x19   : > { %218 = vst [vmem:[%s209_s30] sm:$0xff] %v217_v7 }
  0x1a PF: > { %s14_s15 = sadd.s32 1, %s308_s15  }
  0x1b   : > { %p11_p4 = scmp.ge.s32.totalorder %s14_s15, 4  }
  0x1d   :  { %13 = sbr.rel (!%p11_p4) target bundleno = 1 (0x1), region = 69 }

// kernel: resblock_forward.4
= control target key start
LH: loop header
LB: loop body
LE: loop exit
PB: predicated region body
PF: predicated region fallthrough
CT: control target
= control target key end

     0   :  { %s3407_s18 = smov 0   ;;  %s4610_s0 = inlined_call_operand.vmem [shape: f32[2,16,16,4], index: 0, kind: input, shape index: {}]   ;;  %s4611_s1 = inlined_call_operand.vmem [shape: f32[1,4], index: 1, kind: input, shape index: {}]   ;;  %s4612_s2 = inlined_call_operand.vmem [shape: f32[1,4], index: 2, kind: input, shape index: {}]   ;;  %s4613_s3 = inlined_call_operand.vmem [shape: bf16[36,4], index: 3, kind: input, shape index: {}]   ;;  %s4614_s4 = inlined_call_operand.vmem [shape: f32[2,16,16,4], index: 4, kind: output, shape index: {0}]   ;;  %s4615_s5 = inlined_call_operand.vmem [shape: f32[2,2,4], index: 5, kind: output, shape index: {1}]  }
   0x1 LB: > { %s2585_s19 = sadd.s32 4294967295, %s3366_s18   ;;  %p2589_p0 = scmp.ge.s32.totalorder %s3366_s18, 1  ;;  %s3366_s18 = sphi %s3407_s18, %s16_s18  }
   0x2   : > { %p190_p1 = scmp.lt.s32.totalorder %s3366_s18, 3 }
   0x4   : > { %p191_p2 = pnand %p2589_p0, %p190_p1 }
   0x6   : > { %194 = sbr.rel (%p191_p2) target bundleno = 661 (0x295), region = 36 }
   0xd   : > { %vm379_vm0 = vcmask 31744   ;;  %vm382_vm1 = vcmask 25600   ;;  %p3417_p3 = scmp.lt.s32.totalorder %s2585_s19, 1  ;;  %v3368_v0 = vmov 0.0   ;;  %v3485_v1 = vld [vmem:[%s4611_s1] ss:$0 sm:$0xff] }
   0xe   : > { %380 = vst.msk [vmem:[#allocation2] sm:$0xff] %vm379_vm0, %v3368_v0  ;;  %381 = vst.msk [vmem:[#allocation2 + $0x8] sm:$0xff] %vm379_vm0, %v3368_v0  ;;  %v3497_v2 = vld [vmem:[%s4612_s2] ss:$0 sm:$0xff]  ;;  %s3369_s29 = smov 4   ;;  %s3370_s30 = smov 8  }
   0xf   : > { %383 = vst.msk [vmem:[#allocation2 + $0x10] sm:$0x3] %vm382_vm1, %v3368_v0  ;;  %386 = vst.msk [vmem:[#allocation2 + $0x28] sm:$0x3] %vm382_vm1, %v3368_v0  ;;  %s4662_s19 = smov (!%p3417_p3, %s2585_s19), 1  ;;  %s3371_s6 = smov 12  }
  0x10   : > { %384 = vst.msk [vmem:[#allocation2 + $0x18] sm:$0xff] %vm379_vm0, %v3368_v0  ;;  %385 = vst.msk [vmem:[#allocation2 + $0x20] sm:$0xff] %vm379_vm0, %v3368_v0  ;;  %s2618_s21 = sshll.u32 %s4662_s19, 8  ;;  %s3372_s9 = smov 16   ;;  %vm2129_vm2 = vcmask 1041408   ;;  %vm1813_vm3 = vcmask 64512  }
  0x11   : > { %387 = vst.msk [vmem:[#allocation2 + $0x30] sm:$0xff] %vm379_vm0, %v3368_v0  ;;  %388 = vst.msk [vmem:[#allocation2 + $0x38] sm:$0xff] %vm379_vm0, %v3368_v0  ;;  %s3492_s26 = scalar_lea.vmem %s4610_s0, %s2618_s21  ;;  %s3373_s12 = smov 20   ;;  %vm1846_vm4 = vcmask 97280   ;;  %vm1879_vm5 = vcmask 130048   ;;  %vm1912_vm6 = vcmask 162816  }
  0x12   : > { %389 = vst.msk [vmem:[#allocation2 + $0x40] sm:$0x3] %vm382_vm1, %v3368_v0  ;;  %392 = vst.msk [vmem:[#allocation2 + $0x58] sm:$0x3] %vm382_vm1, %v3368_v0  ;;  %v239_v3 = vld [vmem:[%s3492_s26 + $0x10] sm:$0xff]  ;;  %v240_v4 = vld [vmem:[%s3492_s26 + $0x18] sm:$0xff]  ;;  %s4472_s23 = scalar_lea.vmem %s4614_s4, %s2618_s21 }
  0x13   : > { %390 = vst.msk [vmem:[#allocation2 + $0x48] sm:$0xff] %vm379_vm0, %v3368_v0  ;;  %391 = vst.msk [vmem:[#allocation2 + $0x50] sm:$0xff] %vm379_vm0, %v3368_v0  ;;  %v237_v5 = vld [vmem:[%s3492_s26] sm:$0xff]  ;;  %v278_v6 = vmul.f32 %v3485_v1, %v239_v3  ;;  %v279_v7 = vmul.f32 %v3485_v1, %v240_v4  ;;  %v238_v8 = vld [vmem:[%s3492_s26 + $0x8] sm:$0xff]  ;;  %s3374_s15 = smov 24   ;;  %s3375_s16 = smov 28  }
  0x14   : > { %393 = vst.msk [vmem:[#allocation2 + $0x60] sm:$0xff] %vm379_vm0, %v3368_v0  ;;  %394 = vst.msk [vmem:[#allocation2 + $0x68] sm:$0xff] %vm379_vm0, %v3368_v0  ;;  %v276_v9 = vmul.f32 %v3485_v1, %v237_v5  ;;  %v241_v10 = vld [vmem:[%s3492_s26 + $0x20] sm:$0xff]  ;;  %v242_v11 = vld [vmem:[%s3492_s26 + $0x28] sm:$0xff]  ;;  %v277_v14 = vmul.f32 %v3485_v1, %v238_v8  ;;  %s3376_s17 = smov 32   ;;  %vm1945_vm7 = vcmask 195584  }
  0x15   : > { %395 = vst.msk [vmem:[#allocation2 + $0x70] sm:$0x3] %vm382_vm1, %v3368_v0  ;;  %398 = vst.msk [vmem:[#allocation2 + $0x88] sm:$0x3] %vm382_vm1, %v3368_v0  ;;  %v500_v12 = vld [vmem:[#allocation2 + $0x1] sm:$0xff]  ;;  %v280_v15 = vmul.f32 %v3485_v1, %v241_v10  ;;  %v281_v16 = vmul.f32 %v3485_v1, %v242_v11  ;;  %v243_v17 = vld [vmem:[%s3492_s26 + $0x30] sm:$0xff]  ;;  %v317_v19 = vadd.f32 %v3497_v2, %v278_v6 }
  0x16   : > { %396 = vst.msk [vmem:[#allocation2 + $0x78] sm:$0xff] %vm379_vm0, %v3368_v0  ;;  %397 = vst.msk [vmem:[#allocation2 + $0x80] sm:$0xff] %vm379_vm0, %v3368_v0  ;;  %v501_v13 = vld [vmem:[#allocation2 + $0x9] sm:$0xff]  ;;  %v318_v20 = vadd.f32 %v3497_v2, %v279_v7  ;;  %v315_v21 = vadd.f32 %v3497_v2, %v276_v9  ;;  %v244_v22 = vld [vmem:[%s3492_s26 + $0x38] sm:$0xff]  ;;  %v316_v23 = vadd.f32 %v3497_v2, %v277_v14  ;;  %vm1978_vm8 = vcmask 228352   ;;  %s2594_s21 = sshll.u32 %s4662_s19, 1 }
  0x17   : > { %399 = vst.msk [vmem:[#allocation2 + $0x90] sm:$0xff] %vm379_vm0, %v3368_v0  ;;  %400 = vst.msk [vmem:[#allocation2 + $0x98] sm:$0xff] %vm379_vm0, %v3368_v0  ;;  %v2702_v18 = vpack.i.bf16 %v501_v13, %v500_v12  ;;  %v319_v24 = vadd.f32 %v3497_v2, %v280_v15  ;;  %v320_v25 = vadd.f32 %v3497_v2, %v281_v16  ;;  %v245_v27 = vld [vmem:[%s3492_s26 + $0x40] sm:$0xff]  ;;  %v246_v28 = vld [vmem:[%s3492_s26 + $0x48] sm:$0xff]  ;;  %v349_v30 = vmax.f32 %v317_v19, 0.0 }
  0x18   : > { %401 = vst.msk [vmem:[#allocation2 + $0xa0] sm:$0x3] %vm382_vm1, %v3368_v0  ;;  %404 = vst.msk [vmem:[#allocation2 + $0xb8] sm:$0x3] %vm382_vm1, %v3368_v0  ;;  %v282_v26 = vmul.f32 %v3485_v1, %v243_v17  ;;  %v247_v29 = vld [vmem:[%s3492_s26 + $0x50] sm:$0xff]  ;;  %v350_v31 = vmax.f32 %v318_v20, 0.0  ;;  %v283_v33 = vmul.f32 %v3485_v1, %v244_v22  ;;  %v284_v42 = vmul.f32 %v3485_v1, %v245_v27 }
  0x19   : > { %402 = vst.msk [vmem:[#allocation2 + $0xa8] sm:$0xff] %vm379_vm0, %v3368_v0  ;;  %403 = vst.msk [vmem:[#allocation2 + $0xb0] sm:$0xff] %vm379_vm0, %v3368_v0  ;;  %2703 = vrot.lane.b32.xlu0 %v2702_v18, %s3369_s29  ;;  %v347_v32 = vmax.f32 %v315_v21, 0.0  ;;  %v248_v34 = vld [vmem:[%s3492_s26 + $0x58] sm:$0xff]  ;;  %v249_v35 = vld [vmem:[%s3492_s26 + $0x60] sm:$0xff]  ;;  %v348_v37 = vmax.f32 %v316_v23, 0.0  ;;  %v285_v43 = vmul.f32 %v3485_v1, %v246_v28  ;;  %v286_v44 = vmul.f32 %v3485_v1, %v247_v29 }
  0x1a   : > { %405 = vst.msk [vmem:[#allocation2 + $0xc0] sm:$0xff] %vm379_vm0, %v3368_v0  ;;  %406 = vst.msk [vmem:[#allocation2 + $0xc8] sm:$0xff] %vm379_vm0, %v3368_v0  ;;  %v250_v36 = vld [vmem:[%s3492_s26 + $0x68] sm:$0xff]  ;;  %v351_v38 = vmax.f32 %v319_v24, 0.0  ;;  %v352_v39 = vmax.f32 %v320_v25, 0.0  ;;  %v321_v40 = vadd.f32 %v3497_v2, %v282_v26  ;;  %v322_v41 = vadd.f32 %v3497_v2, %v283_v33  ;;  %v251_v45 = vld [vmem:[%s3492_s26 + $0x70] sm:$0xff] }
  0x1b   : > { %407 = vst.msk [vmem:[#allocation2 + $0xd0] sm:$0x3] %vm382_vm1, %v3368_v0  ;;  %410 = vst.msk [vmem:[#allocation2 + $0xe8] sm:$0x3] %vm382_vm1, %v3368_v0  ;;  %v287_v47 = vmul.f32 %v3485_v1, %v248_v34  ;;  %v288_v48 = vmul.f32 %v3485_v1, %v249_v35  ;;  %v289_v49 = vmul.f32 %v3485_v1, %v250_v36  ;;  %v252_v50 = vld [vmem:[%s3492_s26 + $0x78] sm:$0xff]  ;;  %v253_v59 = vld [vmem:[%s3492_s26 + $0x80] sm:$0xff] }
  0x1c   : > { %408 = vst.msk [vmem:[#allocation2 + $0xd8] sm:$0xff] %vm379_vm0, %v3368_v0  ;;  %409 = vst.msk [vmem:[#allocation2 + $0xe0] sm:$0xff] %vm379_vm0, %v3368_v0  ;;  %v353_v46 = vmax.f32 %v321_v40, 0.0  ;;  %v354_v51 = vmax.f32 %v322_v41, 0.0  ;;  %v323_v52 = vadd.f32 %v3497_v2, %v284_v42  ;;  %v324_v53 = vadd.f32 %v3497_v2, %v285_v43  ;;  %v254_v60 = vld [vmem:[%s3492_s26 + $0x88] sm:$0xff]  ;;  %v255_v61 = vld [vmem:[%s3492_s26 + $0x90] sm:$0xff] }
  0x1d   : > { %411 = vst.msk [vmem:[#allocation2 + $0xf0] sm:$0xff] %vm379_vm0, %v3368_v0  ;;  %412 = vst.msk [vmem:[#allocation2 + $0xf8] sm:$0xff] %vm379_vm0, %v3368_v0  ;;  %v325_v54 = vadd.f32 %v3497_v2, %v286_v44  ;;  %v326_v55 = vadd.f32 %v3497_v2, %v287_v47  ;;  %v327_v56 = vadd.f32 %v3497_v2, %v288_v48  ;;  %v256_v4 = vld [vmem:[%s3492_s26 + $0x98] sm:$0xff]  ;;  %v257_v5 = vld [vmem:[%s3492_s26 + $0xa0] sm:$0xff]  ;;  %vm2011_vm9 = vcmask 261120  }
  0x1e   : > { %413 = vst.msk [vmem:[#allocation2 + $0x100] sm:$0x3] %vm382_vm1, %v3368_v0  ;;  %416 = vst.msk [vmem:[#allocation2 + $0x118] sm:$0x3] %vm382_vm1, %v3368_v0  ;;  %v328_v57 = vadd.f32 %v3497_v2, %v289_v49  ;;  %v290_v58 = vmul.f32 %v3485_v1, %v251_v45  ;;  %v355_v62 = vmax.f32 %v323_v52, 0.0  ;;  %v356_v63 = vmax.f32 %v324_v53, 0.0 }
  0x1f   : > { %414 = vst.msk [vmem:[#allocation2 + $0x108] sm:$0xff] %vm379_vm0, %v3368_v0  ;;  %415 = vst.msk [vmem:[#allocation2 + $0x110] sm:$0xff] %vm379_vm0, %v3368_v0  ;;  %v291_v3 = vmul.f32 %v3485_v1, %v252_v50  ;;  %v258_v6 = vld [vmem:[%s3492_s26 + $0xa8] sm:$0xff]  ;;  %v358_v7 = vmax.f32 %v326_v55, 0.0  ;;  %v359_v8 = vmax.f32 %v327_v56, 0.0  ;;  %v292_v12 = vmul.f32 %v3485_v1, %v253_v59  ;;  %v259_v15 = vld [vmem:[%s3492_s26 + $0xb0] sm:$0xff] }
  0x20   : > { %417 = vst.msk [vmem:[#allocation2 + $0x120] sm:$0xff] %vm379_vm0, %v3368_v0  ;;  %418 = vst.msk [vmem:[#allocation2 + $0x128] sm:$0xff] %vm379_vm0, %v3368_v0  ;;  %v360_v9 = vmax.f32 %v328_v57, 0.0  ;;  %v329_v10 = vadd.f32 %v3497_v2, %v290_v58  ;;  %v293_v13 = vmul.f32 %v3485_v1, %v254_v60  ;;  %v294_v14 = vmul.f32 %v3485_v1, %v255_v61  ;;  %v260_v16 = vld [vmem:[%s3492_s26 + $0xb8] sm:$0xff]  ;;  %v261_v35 = vld [vmem:[%s3492_s26 + $0xc0] sm:$0xff] }
  0x21   : > { %419 = vst.msk [vmem:[#allocation2 + $0x130] sm:$0x3] %vm382_vm1, %v3368_v0  ;;  %422 = vst.msk [vmem:[#allocation2 + $0x148] sm:$0x3] %vm382_vm1, %v3368_v0  ;;  %v330_v11 = vadd.f32 %v3497_v2, %v291_v3  ;;  %v295_v21 = vmul.f32 %v3485_v1, %v256_v4  ;;  %v296_v22 = vmul.f32 %v3485_v1, %v257_v5  ;;  %v262_v41 = vld [vmem:[%s3492_s26 + $0xc8] sm:$0xff]  ;;  %v263_v42 = vld [vmem:[%s3492_s26 + $0xd0] sm:$0xff] }
  0x22   : > { %420 = vst.msk [vmem:[#allocation2 + $0x138] sm:$0xff] %vm379_vm0, %v3368_v0  ;;  %421 = vst.msk [vmem:[#allocation2 + $0x140] sm:$0xff] %vm379_vm0, %v3368_v0  ;;  %v361_v20 = vmax.f32 %v329_v10, 0.0  ;;  %v297_v23 = vmul.f32 %v3485_v1, %v258_v6  ;;  %v331_v29 = vadd.f32 %v3497_v2, %v292_v12  ;;  %v333_v33 = vadd.f32 %v3497_v2, %v294_v14  ;;  %v264_v48 = vld [vmem:[%s3492_s26 + $0xd8] sm:$0xff]  ;;  %v265_v49 = vld [vmem:[%s3492_s26 + $0xe0] sm:$0xff] }
  0x23   : > { %423 = vst.msk [vmem:[#allocation2 + $0x150] sm:$0xff] %vm379_vm0, %v3368_v0  ;;  %424 = vst.msk [vmem:[#allocation2 + $0x158] sm:$0xff] %vm379_vm0, %v3368_v0  ;;  %v362_v28 = vmax.f32 %v330_v11, 0.0  ;;  %v334_v34 = vadd.f32 %v3497_v2, %v295_v21  ;;  %v299_v47 = vmul.f32 %v3485_v1, %v260_v16  ;;  %v300_v53 = vmul.f32 %v3485_v1, %v261_v35  ;;  %v266_v3 = vld [vmem:[%s3492_s26 + $0xe8] sm:$0xff] }
  0x24   : > { %425 = vst.msk [vmem:[#allocation2 + $0x160] sm:$0x3] %vm382_vm1, %v3368_v0  ;;  %428 = vst.msk [vmem:[#allocation2 + $0x178] sm:$0x3] %vm382_vm1, %v3368_v0  ;;  %v336_v40 = vadd.f32 %v3497_v2, %v297_v23  ;;  %v365_v44 = vmax.f32 %v333_v33, 0.0  ;;  %v301_v59 = vmul.f32 %v3485_v1, %v262_v41  ;;  %v302_v60 = vmul.f32 %v3485_v1, %v263_v42 }
  0x25   : > { %426 = vst.msk [vmem:[#allocation2 + $0x168] sm:$0xff] %vm379_vm0, %v3368_v0  ;;  %427 = vst.msk [vmem:[#allocation2 + $0x170] sm:$0xff] %vm379_vm0, %v3368_v0  ;;  %v366_v45 = vmax.f32 %v334_v34, 0.0  ;;  %v338_v58 = vadd.f32 %v3497_v2, %v299_v47  ;;  %v304_v4 = vmul.f32 %v3485_v1, %v265_v49  ;;  %v305_v16 = vmul.f32 %v3485_v1, %v266_v3  ;;  %v532_v49 = vld [vmem:[#allocation2 + $0x2] sm:$0xff] }
  0x26   : > { %429 = vst.msk [vmem:[#allocation2 + $0x180] sm:$0xff] %vm379_vm0, %v3368_v0  ;;  %430 = vst.msk [vmem:[#allocation2 + $0x188] sm:$0xff] %vm379_vm0, %v3368_v0  ;;  %v368_v52 = vmax.f32 %v336_v40, 0.0  ;;  %v340_v11 = vadd.f32 %v3497_v2, %v301_v59  ;;  %vm2080_vm10 = vcmask 293888   ;;  %vm2496_vm11 = vcmask 1040384  }
  0x27   : > { %431 = vst.msk [vmem:[#allocation2 + $0x190] sm:$0x3] %vm382_vm1, %v3368_v0  ;;  %434 = vst.msk [vmem:[#allocation2 + $0x1a8] sm:$0x3] %vm382_vm1, %v3368_v0 }
  0x28   : > { %432 = vst.msk [vmem:[#allocation2 + $0x198] sm:$0xff] %vm379_vm0, %v3368_v0  ;;  %433 = vst.msk [vmem:[#allocation2 + $0x1a0] sm:$0xff] %vm379_vm0, %v3368_v0  ;;  %v357_v0 = vmax.f32 %v325_v54, 0.0 }
  0x29   : > { %438 = vst.msk [vmem:[#allocation2 + $0x31] sm:$0xff] %vm379_vm0, %v349_v30  ;;  %439 = vst.msk [vmem:[#allocation2 + $0x39] sm:$0xff] %vm379_vm0, %v350_v31  ;;  %v332_v30 = vadd.f32 %v3497_v2, %v293_v13  ;;  %v341_v13 = vadd.f32 %v3497_v2, %v302_v60 }
  0x2a   : > { %436 = vst.msk [vmem:[#allocation2 + $0x19] sm:$0xff] %vm379_vm0, %v347_v32  ;;  %437 = vst.msk [vmem:[#allocation2 + $0x21] sm:$0xff] %vm379_vm0, %v348_v37  ;;  %v363_v37 = vmax.f32 %v331_v29, 0.0 }
  0x2b   : > { %440 = vst.msk [vmem:[#allocation2 + $0x49] sm:$0xff] %vm379_vm0, %v351_v38  ;;  %441 = vst.msk [vmem:[#allocation2 + $0x51] sm:$0xff] %vm379_vm0, %v352_v39  ;;  %v364_v38 = vmax.f32 %v332_v30, 0.0  ;;  %v335_v39 = vadd.f32 %v3497_v2, %v296_v22 }
  0x2c   : > { %442 = vst.msk [vmem:[#allocation2 + $0x61] sm:$0xff] %vm379_vm0, %v353_v46  ;;  %443 = vst.msk [vmem:[#allocation2 + $0x69] sm:$0xff] %vm379_vm0, %v354_v51  ;;  %v298_v46 = vmul.f32 %v3485_v1, %v259_v15 }
  0x2d   : > { %444 = vst.msk [vmem:[#allocation2 + $0x79] sm:$0xff] %vm379_vm0, %v355_v62  ;;  %445 = vst.msk [vmem:[#allocation2 + $0x81] sm:$0xff] %vm379_vm0, %v356_v63  ;;  %v367_v51 = vmax.f32 %v335_v39, 0.0  ;;  %v339_v63 = vadd.f32 %v3497_v2, %v300_v53 }
  0x2e   : > { %446 = vst.msk [vmem:[#allocation2 + $0x91] sm:$0xff] %vm379_vm0, %v357_v0  ;;  %447 = vst.msk [vmem:[#allocation2 + $0x99] sm:$0xff] %vm379_vm0, %v358_v7  ;;  %v337_v57 = vadd.f32 %v3497_v2, %v298_v46  ;;  %v303_v0 = vmul.f32 %v3485_v1, %v264_v48 }
  0x2f   : > { %448 = vst.msk [vmem:[#allocation2 + $0xa9] sm:$0xff] %vm379_vm0, %v359_v8  ;;  %449 = vst.msk [vmem:[#allocation2 + $0xb1] sm:$0xff] %vm379_vm0, %v360_v9  ;;  %v370_v9 = vmax.f32 %v338_v58, 0.0  ;;  %v371_v12 = vmax.f32 %v339_v63, 0.0 }
  0x30   : > { %v504_v17 = vld [vmem:[#allocation2 + $0x31] sm:$0xff]  ;;  %v505_v18 = vld [vmem:[#allocation2 + $0x39] sm:$0xff]  ;;  %450 = vst.msk [vmem:[#allocation2 + $0xc1] sm:$0xff] %vm379_vm0, %v361_v20  ;;  %451 = vst.msk [vmem:[#allocation2 + $0xc9] sm:$0xff] %vm379_vm0, %v362_v28  ;;  %v369_v8 = vmax.f32 %v337_v57, 0.0  ;;  %v342_v14 = vadd.f32 %v3497_v2, %v303_v0  ;;  %v373_v20 = vmax.f32 %v341_v13, 0.0 }
  0x31   : > { %v502_v19 = vld [vmem:[#allocation2 + $0x19] sm:$0xff]  ;;  %v3576_v24 = vpack.i.bf16 %v505_v18, %v504_v17  ;;  %v503_v25 = vld [vmem:[#allocation2 + $0x21] sm:$0xff]  ;;  %452 = vst.msk [vmem:[#allocation2 + $0xd9] sm:$0xff] %vm379_vm0, %v363_v37  ;;  %453 = vst.msk [vmem:[#allocation2 + $0xe1] sm:$0xff] %vm379_vm0, %v364_v38  ;;  %v343_v17 = vadd.f32 %v3497_v2, %v304_v4 }
  0x32   : > { %v506_v26 = vld [vmem:[#allocation2 + $0x49] sm:$0xff]  ;;  %v507_v27 = vld [vmem:[#allocation2 + $0x51] sm:$0xff]  ;;  %v3580_v31 = vpack.i.bf16 %v503_v25, %v502_v19  ;;  %454 = vst.msk [vmem:[#allocation2 + $0xf1] sm:$0xff] %vm379_vm0, %v365_v44  ;;  %455 = vst.msk [vmem:[#allocation2 + $0xf9] sm:$0xff] %vm379_vm0, %v366_v45  ;;  %v372_v19 = vmax.f32 %v340_v11, 0.0  ;;  %v374_v21 = vmax.f32 %v342_v14, 0.0 }
  0x33   : > { %v3582_v32 = vpack.i.bf16 %v507_v27, %v506_v26  ;;  %2713 = vrot.lane.b32.xlu1 %v3576_v24, %s3369_s29  ;;  %v508_v36 = vld [vmem:[#allocation2 + $0x61] sm:$0xff]  ;;  %v509_v43 = vld [vmem:[#allocation2 + $0x69] sm:$0xff]  ;;  %456 = vst.msk [vmem:[#allocation2 + $0x109] sm:$0xff] %vm379_vm0, %v367_v51  ;;  %457 = vst.msk [vmem:[#allocation2 + $0x111] sm:$0xff] %vm379_vm0, %v368_v52  ;;  %v344_v26 = vadd.f32 %v3497_v2, %v305_v16  ;;  %v375_v27 = vmax.f32 %v343_v17, 0.0 }
  0x34   : > { %2708 = vrot.lane.b32.xlu0 %v3580_v31, %s3369_s29  ;;  %v3601_v50 = vpack.i.bf16 %v509_v43, %v508_v36  ;;  %v510_v54 = vld [vmem:[#allocation2 + $0x79] sm:$0xff]  ;;  %v511_v55 = vld [vmem:[#allocation2 + $0x81] sm:$0xff]  ;;  %458 = vst.msk [vmem:[#allocation2 + $0x121] sm:$0xff] %vm379_vm0, %v369_v8  ;;  %459 = vst.msk [vmem:[#allocation2 + $0x129] sm:$0xff] %vm379_vm0, %v370_v9 }
  0x35   : > { %v512_v56 = vld [vmem:[#allocation2 + $0x91] sm:$0xff]  ;;  %v3614_v61 = vpack.i.bf16 %v511_v55, %v510_v54  ;;  %v513_v62 = vld [vmem:[#allocation2 + $0x99] sm:$0xff]  ;;  %460 = vst.msk [vmem:[#allocation2 + $0x139] sm:$0xff] %vm379_vm0, %v371_v12  ;;  %461 = vst.msk [vmem:[#allocation2 + $0x141] sm:$0xff] %vm379_vm0, %v372_v19  ;;  %v376_v30 = vmax.f32 %v344_v26, 0.0 }
  0x36   : > { %v3624_v5 = vpack.i.bf16 %v513_v62, %v512_v56  ;;  %v514_v6 = vld [vmem:[#allocation2 + $0xa9] sm:$0xff]  ;;  %v515_v7 = vld [vmem:[#allocation2 + $0xb1] sm:$0xff]  ;;  %462 = vst.msk [vmem:[#allocation2 + $0x151] sm:$0xff] %vm379_vm0, %v373_v20  ;;  %463 = vst.msk [vmem:[#allocation2 + $0x159] sm:$0xff] %vm379_vm0, %v374_v21 }
  0x37   : > { %2718 = vrot.lane.b32.xlu1 %v3582_v32, %s3369_s29  ;;  %v516_v10 = vld [vmem:[#allocation2 + $0xc1] sm:$0xff]  ;;  %v517_v15 = vld [vmem:[#allocation2 + $0xc9] sm:$0xff]  ;;  %v3635_v18 = vpack.i.bf16 %v515_v7, %v514_v6  ;;  %464 = vst.msk [vmem:[#allocation2 + $0x169] sm:$0xff] %vm379_vm0, %v375_v27  ;;  %465 = vst.msk [vmem:[#allocation2 + $0x171] sm:$0xff] %vm379_vm0, %v376_v30 }
  0x38   : > { %2723 = vrot.lane.b32.xlu0 %v3601_v50, %s3369_s29  ;;  %v3640_v22 = vpack.i.bf16 %v517_v15, %v516_v10  ;;  %v518_v23 = vld [vmem:[#allocation2 + $0xd9] sm:$0xff]  ;;  %v519_v25 = vld [vmem:[#allocation2 + $0xe1] sm:$0xff]  ;;  %v533_v51 = vld [vmem:[#allocation2 + $0xa] sm:$0xff] }
  0x39   : > { %v520_v28 = vld [vmem:[#allocation2 + $0xf1] sm:$0xff]  ;;  %v521_v29 = vld [vmem:[#allocation2 + $0xf9] sm:$0xff]  ;;  %v3649_v33 = vpack.i.bf16 %v519_v25, %v518_v23  ;;  %v2782_v53 = vpack.i.bf16 %v533_v51, %v532_v49  ;;  %v535_v55 = vld [vmem:[#allocation2 + $0x22] sm:$0xff] }
  0x3a   : > { %v2752_v34 = vpack.i.bf16 %v521_v29, %v520_v28  ;;  %v522_v35 = vld [vmem:[#allocation2 + $0x109] sm:$0xff]  ;;  %v523_v36 = vld [vmem:[#allocation2 + $0x111] sm:$0xff]  ;;  %v534_v54 = vld [vmem:[#allocation2 + $0x1a] sm:$0xff] }
  0x3b   : > { %2728 = vrot.lane.b32.xlu1 %v3614_v61, %s3369_s29  ;;  %v524_v37 = vld [vmem:[#allocation2 + $0x121] sm:$0xff]  ;;  %v525_v38 = vld [vmem:[#allocation2 + $0x129] sm:$0xff]  ;;  %v2757_v39 = vpack.i.bf16 %v523_v36, %v522_v35  ;;  %v536_v56 = vld [vmem:[#allocation2 + $0x32] sm:$0xff]  ;;  %v3662_v58 = vpack.i.bf16 %v535_v55, %v534_v54 }
  0x3c   : > { %2733 = vrot.lane.b32.xlu0 %v3624_v5, %s3369_s29  ;;  %v2762_v40 = vpack.i.bf16 %v525_v38, %v524_v37  ;;  %v526_v41 = vld [vmem:[#allocation2 + $0x139] sm:$0xff]  ;;  %v527_v42 = vld [vmem:[#allocation2 + $0x141] sm:$0xff]  ;;  %v538_v60 = vld [vmem:[#allocation2 + $0x4a] sm:$0xff] }
  0x3d   : > { %v528_v43 = vld [vmem:[#allocation2 + $0x151] sm:$0xff]  ;;  %v529_v44 = vld [vmem:[#allocation2 + $0x159] sm:$0xff]  ;;  %v2767_v45 = vpack.i.bf16 %v527_v42, %v526_v41  ;;  %v540_v63 = vld [vmem:[#allocation2 + $0x62] sm:$0xff] }
  0x3e   : > { %v2772_v46 = vpack.i.bf16 %v529_v44, %v528_v43  ;;  %v530_v47 = vld [vmem:[#allocation2 + $0x169] sm:$0xff]  ;;  %v531_v48 = vld [vmem:[#allocation2 + $0x171] sm:$0xff]  ;;  %v537_v57 = vld [vmem:[#allocation2 + $0x3a] sm:$0xff] }
  0x3f   : > { %2738 = vrot.lane.b32.xlu1 %v3635_v18, %s3369_s29  ;;  %v2777_v52 = vpack.i.bf16 %v531_v48, %v530_v47  ;;  %v3665_v59 = vpack.i.bf16 %v537_v57, %v536_v56  ;;  %v539_v62 = vld [vmem:[#allocation2 + $0x52] sm:$0xff]  ;;  %v541_v0 = vld [vmem:[#allocation2 + $0x6a] sm:$0xff]  ;;  %v542_v6 = vld [vmem:[#allocation2 + $0x7a] sm:$0xff] }
  0x40   : > { %2743 = vrot.lane.b32.xlu0 %v3640_v22, %s3369_s29  ;;  %v3669_v3 = vpack.i.bf16 %v539_v62, %v538_v60  ;;  %v3673_v4 = vpack.i.bf16 %v541_v0, %v540_v63  ;;  %v543_v7 = vld [vmem:[#allocation2 + $0x82] sm:$0xff]  ;;  %v544_v8 = vld [vmem:[#allocation2 + $0x92] sm:$0xff]  ;;  %v545_v9 = vld [vmem:[#allocation2 + $0x9a] sm:$0xff] }
  0x41   : > { %v3677_v10 = vpack.i.bf16 %v543_v7, %v542_v6  ;;  %v3681_v11 = vpack.i.bf16 %v545_v9, %v544_v8  ;;  %v546_v12 = vld [vmem:[#allocation2 + $0xaa] sm:$0xff]  ;;  %v547_v13 = vld [vmem:[#allocation2 + $0xb2] sm:$0xff]  ;;  %v548_v14 = vld [vmem:[#allocation2 + $0xc2] sm:$0xff] }
  0x42   : > { %v549_v15 = vld [vmem:[#allocation2 + $0xca] sm:$0xff]  ;;  %v3685_v16 = vpack.i.bf16 %v547_v13, %v546_v12  ;;  %v550_v19 = vld [vmem:[#allocation2 + $0xda] sm:$0xff]  ;;  %v551_v20 = vld [vmem:[#allocation2 + $0xe2] sm:$0xff] }
  0x43   : > { %2748 = vrot.lane.b32.xlu1 %v3649_v33, %s3369_s29  ;;  %v3689_v17 = vpack.i.bf16 %v549_v15, %v548_v14  ;;  %v552_v21 = vld [vmem:[#allocation2 + $0xf2] sm:$0xff]  ;;  %v553_v23 = vld [vmem:[#allocation2 + $0xfa] sm:$0xff]  ;;  %v3693_v25 = vpack.i.bf16 %v551_v20, %v550_v19  ;;  %v554_v27 = vld [vmem:[#allocation2 + $0x10a] sm:$0xff] }
  0x44   : > { %2753 = vrot.lane.b32.xlu0 %v2752_v34, %s3369_s29  ;;  %v3697_v26 = vpack.i.bf16 %v553_v23, %v552_v21  ;;  %v555_v28 = vld [vmem:[#allocation2 + $0x112] sm:$0xff]  ;;  %v556_v29 = vld [vmem:[#allocation2 + $0x122] sm:$0xff]  ;;  %v557_v30 = vld [vmem:[#allocation2 + $0x12a] sm:$0xff] }
  0x45   : > { %v3701_v34 = vpack.i.bf16 %v555_v28, %v554_v27  ;;  %v2842_v35 = vpack.i.bf16 %v557_v30, %v556_v29  ;;  %v558_v36 = vld [vmem:[#allocation2 + $0x13a] sm:$0xff]  ;;  %v559_v37 = vld [vmem:[#allocation2 + $0x142] sm:$0xff]  ;;  %v560_v38 = vld [vmem:[#allocation2 + $0x152] sm:$0xff] }
  0x46   : > { %v562_v42 = vld [vmem:[#allocation2 + $0x16a] sm:$0xff]  ;;  %v563_v43 = vld [vmem:[#allocation2 + $0x172] sm:$0xff]  ;;  %v3730_v55 = vld [vmem:[#allocation2 + $0x60] sm:$0xff] }
  0x47   : > { %2758 = vrot.lane.b32.xlu1 %v2757_v39, %s3369_s29  ;;  %v561_v39 = vld [vmem:[#allocation2 + $0x15a] sm:$0xff]  ;;  %v3716_v48 = vld [vmem:[#allocation2 + $0x30] sm:$0xff]  ;;  %v3720_v51 = vld [vmem:[#allocation2 + $0x48] sm:$0xff] }
  0x48   : > { %2763 = vrot.lane.b32.xlu0 %v2762_v40, %s3369_s29  ;;  %v2847_v40 = vpack.i.bf16 %v559_v37, %v558_v36  ;;  %v2852_v41 = vpack.i.bf16 %v561_v39, %v560_v38  ;;  %v3708_v44 = vld [vmem:[#allocation2 + $0x18] sm:$0xff]  ;;  %v3732_v56 = vld [vmem:[#allocation2 + $0x68] sm:$0xff]  ;;  %v3736_v60 = vld [vmem:[#allocation2 + $0x80] sm:$0xff] }
  0x49   : > { %v3718_v49 = vld [vmem:[#allocation2 + $0x38] sm:$0xff]  ;;  %v2877_v62 = vpack.i.bf16 %v3732_v56, %v3730_v55  ;;  %v574_v0 = vld [vmem:[#allocation2 + $0x90] sm:$0xff]  ;;  %v576_v7 = vld [vmem:[#allocation2 + $0xa8] sm:$0xff] }
  0x4a   : > { %v3734_v57 = vld [vmem:[#allocation2 + $0x78] sm:$0xff]  ;;  %v577_v8 = vld [vmem:[#allocation2 + $0xb0] sm:$0xff]  ;;  %v3342_v13 = vld [vmem:[%s4613_s3] sm:$0xff]  }
  0x4b   : > { %2768 = vrot.lane.b32.xlu1 %v2767_v45, %s3369_s29  ;;  %v3710_v45 = vld [vmem:[#allocation2 + $0x20] sm:$0xff]  ;;  %v2882_v63 = vpack.i.bf16 %v3736_v60, %v3734_v57  ;;  %v575_v6 = vld [vmem:[#allocation2 + $0x98] sm:$0xff]  ;;  %v3748_v12 = vpack.i.bf16 %v577_v8, %v576_v7  ;;  %2639 = vmatprep.subr.bf16.mxu0 %v3342_v13  ;;  %v3343_v14 = vld [vmem:[%s4613_s3 + $0x8] sm:$0xff]  }
  0x4c   : > { %2773 = vrot.lane.b32.xlu0 %v2772_v46, %s3369_s29  ;;  %v2857_v46 = vpack.i.bf16 %v563_v43, %v562_v42  ;;  %v2862_v47 = vpack.i.bf16 %v3710_v45, %v3708_v44  ;;  %v3745_v9 = vpack.i.bf16 %v575_v6, %v574_v0  ;;  %2677 = vmatprep.subr.bf16.mxu1 %v3342_v13  ;;  %v268_v19 = vld [vmem:[%s3492_s26 + $0xf8] sm:$0xff]  ;;  %v484_v30 = vld [vmem:[#allocation2 + $0xc0] sm:$0xff]  ;;  %v488_v0 = vld [vmem:[#allocation2 + $0xf0] sm:$0xff] }
  0x4d   : > { %2640 = vmatpush3.bf16.msra.mxu0 %v3342_v13  ;;  %2680 = vmatpush3.bf16.msra.mxu1 %v3342_v13  ;;  %v307_v21 = vmul.f32 %v3485_v1, %v268_v19  ;;  %v3866_v42 = vld [vmem:[#allocation2 + $0xe0] sm:$0xff]  ;;  %v489_v6 = vld [vmem:[#allocation2 + $0xf8] sm:$0xff]  ;;  %v491_v19 = vld [vmem:[#allocation2 + $0x110] sm:$0xff] }
  0x4e   : > { %2641 = vmatprep.subr.bf16.mxu0 %v3343_v14  ;;  %2678 = vmatprep.subr.bf16.mxu1 %v3343_v14  ;;  %4634 = vst [vmem:[#allocation8_spill] sm:$0xff] %v3866_v42 }
  0x4f   : > { %2778 = vrot.lane.b32.xlu1 %v2777_v52, %s3369_s29  ;;  %v3722_v52 = vld [vmem:[#allocation2 + $0x50] sm:$0xff]  ;;  %v346_v27 = vadd.f32 %v3497_v2, %v307_v21 }
  0x50   : > { %2783 = vrot.lane.b32.xlu0 %v2782_v53, %s3370_s30  ;;  %v2867_v53 = vpack.i.bf16 %v3718_v49, %v3716_v48  ;;  %v2872_v54 = vpack.i.bf16 %v3722_v52, %v3720_v51 }
  0x51   : > { %2642 = vmatpush3.bf16.msra.mxu0 %v3343_v14  ;;  %2681 = vmatpush3.bf16.msra.mxu1 %v3343_v14  ;;  %v378_v28 = vmax.f32 %v346_v27, 0.0  ;;  %v712_v27 = vld [vmem:[#allocation2 + $0x111] sm:$0xff] }
  0x53   : > { %2788 = vrot.lane.b32.xlu1 %v3662_v58, %s3370_s30  ;;  %467 = vst.msk [vmem:[#allocation2 + $0x189] sm:$0xff] %vm379_vm0, %v378_v28 }
  0x54   : > { %2793 = vrot.lane.b32.xlu0 %v3665_v59, %s3370_s30 }
  0x57   : > { %2798 = vrot.lane.b32.xlu1 %v3669_v3, %s3370_s30 }
  0x58   : > { %2803 = vrot.lane.b32.xlu0 %v3673_v4, %s3370_s30 }
  0x5b   : > { %2808 = vrot.lane.b32.xlu1 %v3677_v10, %s3370_s30 }
  0x5c   : > { %2813 = vrot.lane.b32.xlu0 %v3681_v11, %s3370_s30 }
  0x5f   : > { %2818 = vrot.lane.b32.xlu1 %v3685_v16, %s3370_s30 }
  0x60   : > { %2823 = vrot.lane.b32.xlu0 %v3689_v17, %s3370_s30 }
  0x63   : > { %2828 = vrot.lane.b32.xlu1 %v3693_v25, %s3370_s30 }
  0x64   : > { %2833 = vrot.lane.b32.xlu0 %v3697_v26, %s3370_s30 }
  0x67   : > { %2838 = vrot.lane.b32.xlu1 %v3701_v34, %s3370_s30 }
  0x68   : > { %2843 = vrot.lane.b32.xlu0 %v2842_v35, %s3370_s30  ;;  %v485_v35 = vld [vmem:[#allocation2 + $0xc8] sm:$0xff] }
  0x69   : > { %v3047_v37 = vpack.i.bf16 %v485_v35, %v484_v30  ;;  %v3918_v30 = vld [vmem:[#allocation2 + $0x150] sm:$0xff] }
  0x6b   : > { %2848 = vrot.lane.b32.xlu1 %v2847_v40, %s3370_s30 }
  0x6c   : > { %2853 = vrot.lane.b32.xlu0 %v2852_v41, %s3370_s30  ;;  %v486_v41 = vld [vmem:[#allocation2 + $0xd8] sm:$0xff] }
  0x6f   : > { %2858 = vrot.lane.b32.xlu1 %v2857_v46, %s3370_s30 }
  0x70   : > { %2863 = vrot.lane.b32.xlu0 %v2862_v47, %s3371_s6 }
  0x73   : > { %2868 = vrot.lane.b32.xlu1 %v2867_v53, %s3371_s6 }
  0x74   : > { %2873 = vrot.lane.b32.xlu0 %v2872_v54, %s3371_s6 }
  0x77   : > { %2878 = vrot.lane.b32.xlu1 %v2877_v62, %s3371_s6 }
  0x78   : > { %2883 = vrot.lane.b32.xlu0 %v2882_v63, %s3371_s6 }
  0x7b   : > { %2888 = vrot.lane.b32.xlu1 %v3745_v9, %s3371_s6 }
  0x7c   : > { %2893 = vrot.lane.b32.xlu0 %v3748_v12, %s3371_s6 }
  0x7f   : > { %2898 = vrot.lane.b32.xlu1 %v3580_v31, %s3372_s9  ;;  %v3344_v31 = vld [vmem:[%s4613_s3 + $0x10] ss:$0 sps:$4 sm:$0x33]  }
  0x80   : > { %2903 = vrot.lane.b32.xlu0 %v3576_v24, %s3372_s9  ;;  %2683 = vmatprep.subr.msk.bf16.mxu0 %vm2129_vm2, %v3344_v31  ;;  %v2131_v15 = vsel %vm2129_vm2, %v3344_v31, 0 }
  0x81   : > { %2684 = vmatprep.subr.msk.bf16.mxu1 %vm2129_vm2, %v3344_v31  ;;  %2644 = vmatpush3.bf16.msra.mxu0 %v2131_v15 }
  0x82   : > { %2682 = vmatpush3.bf16.msra.mxu1 %v2131_v15 }
  0x83   : > { %2908 = vrot.lane.b32.xlu1 %v3662_v58, %s3373_s12  ;;  %v267_v58 = vld [vmem:[%s3492_s26 + $0xf0] sm:$0xff]  ;;  %s235_s26 = scalar_lea.vmem %s4615_s5, %s2594_s21 }
  0x84   : > { %2913 = vrot.lane.b32.xlu0 %v3665_v59, %s3373_s12  ;;  %v306_v20 = vmul.f32 %v3485_v1, %v267_v58  ;;  %v490_v58 = vld [vmem:[#allocation2 + $0x108] sm:$0xff] }
  0x85   : > { %v3137_v21 = vpack.i.bf16 %v491_v19, %v490_v58 }
  0x86   : > { %v345_v23 = vadd.f32 %v3497_v2, %v306_v20 }
  0x87   : > { %2918 = vrot.lane.b32.xlu1 %v2867_v53, %s3374_s15 }
  0x88   : > { %2923 = vrot.lane.b32.xlu0 %v2872_v54, %s3374_s15 }
  0x8b   : > { %2928 = vrot.lane.b32.xlu1 %v3576_v24, %s3375_s16  ;;  %v377_v24 = vmax.f32 %v345_v23, 0.0  ;;  %v3803_v1 = vpop.permute.xlu0 %2703  ;;  %v711_v23 = vld [vmem:[#allocation2 + $0x109] sm:$0xff] }
  0x8c   : > { %2933 = vrot.lane.b32.xlu0 %v3582_v32, %s3375_s16 }
  0x8d   : > { %466 = vst.msk [vmem:[#allocation2 + $0x181] sm:$0xff] %vm379_vm0, %v377_v24 }
  0x8f   : > { %2938 = vrot.lane.b32.xlu1 %v3665_v59, %s3376_s17 }
  0x90   : > { %2943 = vrot.lane.b32.xlu0 %v3669_v3, %s3376_s17 }
  0x93   : > { %2948 = vrot.lane.b32.xlu1 %v3582_v32, %s3372_s9 }
  0x94   : > { %2953 = vrot.lane.b32.xlu0 %v3601_v50, %s3372_s9 }
  0x97   : > { %2958 = vrot.lane.b32.xlu1 %v3669_v3, %s3373_s12 }
  0x98   : > { %2963 = vrot.lane.b32.xlu0 %v3673_v4, %s3373_s12 }
  0x9b   : > { %2968 = vrot.lane.b32.xlu1 %v2877_v62, %s3374_s15  ;;  %v612_v62 = vld [vmem:[#allocation2 + $0xd9] sm:$0xff] }
  0x9c   : > { %2973 = vrot.lane.b32.xlu0 %v2882_v63, %s3374_s15  ;;  %v613_v63 = vld [vmem:[#allocation2 + $0xe1] sm:$0xff] }
  0x9d   : > { %v3112_v8 = vpack.i.bf16 %v613_v63, %v612_v62 }
  0x9f   : > { %2978 = vrot.lane.b32.xlu1 %v3601_v50, %s3375_s16 }
  0xa0   : > { %2983 = vrot.lane.b32.xlu0 %v3614_v61, %s3375_s16 }
  0xa3   : > { %2988 = vrot.lane.b32.xlu1 %v3673_v4, %s3376_s17 }
  0xa4   : > { %2993 = vrot.lane.b32.xlu0 %v3677_v10, %s3376_s17 }
  0xa5   : > { %v3809_v2 = vpop.permute.xlu1 %2713 }
  0xa6   : > { %v3811_v32 = vpop.permute.xlu0 %2708 }
  0xa7   : > { %2998 = vrot.lane.b32.xlu1 %v3614_v61, %s3372_s9 }
  0xa8   : > { %3003 = vrot.lane.b32.xlu0 %v3624_v5, %s3372_s9 }
  0xa9   : > { %v3817_v50 = vpop.permute.xlu1 %2718 }
  0xaa   : > { %v3819_v59 = vpop.permute.xlu0 %2723 }
  0xab   : > { %3008 = vrot.lane.b32.xlu1 %v3677_v10, %s3373_s12 }
  0xac   : > { %3013 = vrot.lane.b32.xlu0 %v3681_v11, %s3373_s12 }
  0xad   : > { %v3825_v3 = vpop.permute.xlu1 %2728 }
  0xae   : > { %v3827_v4 = vpop.permute.xlu0 %2733 }
  0xaf   : > { %3018 = vrot.lane.b32.xlu1 %v3745_v9, %s3374_s15  ;;  %v614_v9 = vld [vmem:[#allocation2 + $0xf1] sm:$0xff] }
  0xb0   : > { %3023 = vrot.lane.b32.xlu0 %v3748_v12, %s3374_s15 }
  0xb1   : > { %v3833_v61 = vpop.permute.xlu1 %2738 }
  0xb2   : > { %v3835_v29 = vpop.permute.xlu0 %2743 }
  0xb3   : > { %3028 = vrot.lane.b32.xlu1 %v3624_v5, %s3375_s16 }
  0xb4   : > { %3033 = vrot.lane.b32.xlu0 %v3635_v18, %s3375_s16 }
  0xb5   : > { %v3841_v10 = vpop.permute.xlu1 %2748 }
  0xb6   : > { %4629 = vst [vmem:[#allocation3_spill] sm:$0xff] %v3841_v10  ;;  %v3843_v36 = vpop.permute.xlu0 %2753 }
  0xb7   : > { %4630 = vst [vmem:[#allocation4_spill] sm:$0xff] %v3843_v36  ;;  %3038 = vrot.lane.b32.xlu1 %v3681_v11, %s3376_s17 }
  0xb8   : > { %3043 = vrot.lane.b32.xlu0 %v3685_v16, %s3376_s17 }
  0xb9   : > { %v3849_v38 = vpop.permute.xlu1 %2758 }
  0xba   : > { %4631 = vst [vmem:[#allocation5_spill] sm:$0xff] %v3849_v38  ;;  %v3851_v39 = vpop.permute.xlu0 %2763 }
  0xbb   : > { %4632 = vst [vmem:[#allocation6_spill] sm:$0xff] %v3851_v39  ;;  %3048 = vrot.lane.b32.xlu1 %v3047_v37, %s3371_s6  ;;  %v468_v39 = vld [vmem:[#allocation2] sm:$0xff] }
  0xbc   : > { %3053 = vrot.lane.b32.xlu0 %v3635_v18, %s3372_s9  ;;  %v3077_v18 = vpack.i.bf16 %v3866_v42, %v486_v41  ;;  %v3147_v41 = vpack.i.bf16 %v712_v27, %v711_v23 }
  0xbd   : > { %v3856_v5 = vpop.permute.xlu1 %2768 }
  0xbe   : > { %4633 = vst [vmem:[#allocation7_spill] sm:$0xff] %v3856_v5  ;;  %v3858_v40 = vpop.permute.xlu0 %2773  ;;  %v469_v5 = vld [vmem:[#allocation2 + $0x8] sm:$0xff] }
  0xbf   : > { %3058 = vrot.lane.b32.xlu1 %v3640_v22, %s3372_s9  ;;  %v2776_v24 = vunpack.i.h.bf16 %v3858_v40  ;;  %v2775_v28 = vunpack.i.l.bf16 %v3858_v40 }
  0xc0   : > { %3063 = vrot.lane.b32.xlu0 %v3685_v16, %s3373_s12 }
  0xc1   : > { %v3864_v11 = vpop.permute.xlu1 %2778 }
  0xc2   : > { %v3868_v43 = vpop.permute.xlu0 %2783  ;;  %v2780_v62 = vunpack.i.l.bf16 %v3864_v11 }
  0xc3   : > { %3068 = vrot.lane.b32.xlu1 %v3689_v17, %s3373_s12 }
  0xc4   : > { %3073 = vrot.lane.b32.xlu0 %v3047_v37, %s3374_s15 }
  0xc5   : > { %v3874_v46 = vpop.permute.xlu1 %2788 }
  0xc6   : > { %v3876_v47 = vpop.permute.xlu0 %2793  ;;  %v2790_v36 = vunpack.i.l.bf16 %v3874_v46 }
  0xc7   : > { %3078 = vrot.lane.b32.xlu1 %v3077_v18, %s3374_s15 }
  0xc8   : > { %3083 = vrot.lane.b32.xlu0 %v3640_v22, %s3375_s16  ;;  %v3107_v22 = vpack.i.bf16 %v489_v6, %v488_v0  ;;  %v1809_v6 = vsel %vm379_vm0, %v3918_v30, %v2775_v28 }
  0xc9   : > { %v3881_v16 = vpop.permute.xlu1 %2798 }
  0xca   : > { %v3883_v53 = vpop.permute.xlu0 %2803 }
  0xcb   : > { %3088 = vrot.lane.b32.xlu1 %v3649_v33, %s3375_s16  ;;  %v615_v33 = vld [vmem:[#allocation2 + $0xf9] sm:$0xff] }
  0xcc   : > { %3093 = vrot.lane.b32.xlu0 %v3689_v17, %s3376_s17  ;;  %v3117_v13 = vpack.i.bf16 %v615_v33, %v614_v9 }
  0xcd   : > { %v3889_v54 = vpop.permute.xlu1 %2808 }
  0xce   : > { %v3891_v7 = vpop.permute.xlu0 %2813 }
  0xcf   : > { %3098 = vrot.lane.b32.xlu1 %v3693_v25, %s3376_s17 }
  0xd0   : > { %3103 = vrot.lane.b32.xlu0 %v3077_v18, %s3371_s6  ;;  %v2781_v18 = vunpack.i.h.bf16 %v3864_v11 }
  0xd1   : > { %v3896_v12 = vpop.permute.xlu1 %2818 }
  0xd2   : > { %v3898_v17 = vpop.permute.xlu0 %2823 }
  0xd3   : > { %4635 = vst [vmem:[#allocation9_spill] sm:$0xff] %v3898_v17  ;;  %3108 = vrot.lane.b32.xlu1 %v3107_v22, %s3371_s6 }
  0xd4   : > { %3113 = vrot.lane.b32.xlu0 %v3112_v8, %s3372_s9  ;;  %v3933_v8 = vld [vmem:[#allocation2 + $0x170] sm:$0xff] }
  0xd5   : > { %v3902_v14 = vpop.permute.xlu1 %2828  ;;  %v1812_v27 = vsel %vm379_vm0, %v3933_v8, %v2781_v18 }
  0xd6   : > { %4636 = vst [vmem:[#allocation10_spill] sm:$0xff] %v3902_v14  ;;  %v3904_v31 = vpop.permute.xlu0 %2833 }
  0xd7   : > { %4637 = vst [vmem:[#allocation11_spill] sm:$0xff] %v3904_v31  ;;  %3118 = vrot.lane.b32.xlu1 %v3117_v13, %s3372_s9  ;;  %v2785_v31 = vunpack.i.l.bf16 %v3868_v43 }
  0xd8   : > { %3123 = vrot.lane.b32.xlu0 %v3693_v25, %s3373_s12  ;;  %v3920_v25 = vld [vmem:[#allocation2 + $0x158] sm:$0xff] }
  0xd9   : > { %v3909_v15 = vpop.permute.xlu1 %2838  ;;  %v1810_v40 = vsel %vm379_vm0, %v3920_v25, %v2776_v24 }
  0xda   : > { %4638 = vst [vmem:[#allocation12_spill] sm:$0xff] %v3909_v15  ;;  %v3911_v20 = vpop.permute.xlu0 %2843  ;;  %v2711_v15 = vunpack.i.h.bf16 %v3811_v32 }
  0xdb   : > { %4639 = vst [vmem:[#allocation13_spill] sm:$0xff] %v3911_v20  ;;  %3128 = vrot.lane.b32.xlu1 %v3697_v26, %s3373_s12  ;;  %v623_v20 = vld [vmem:[#allocation2 + $0x159] sm:$0xff] }
  0xdc   : > { %3133 = vrot.lane.b32.xlu0 %v3107_v22, %s3374_s15  ;;  %v3931_v22 = vld [vmem:[#allocation2 + $0x168] sm:$0xff] }
  0xdd   : > { %v3922_v35 = vpop.permute.xlu1 %2848  ;;  %v1811_v24 = vsel %vm379_vm0, %v3931_v22, %v2780_v62  ;;  %v618_v62 = vld [vmem:[#allocation2 + $0x121] sm:$0xff] }
  0xde   : > { %4640 = vst [vmem:[#allocation14_spill] sm:$0xff] %v3922_v35  ;;  %v2854_v37 = vpop.permute.xlu0 %2853  ;;  %v748_v35 = vld [vmem:[#allocation2 + $0x142] sm:$0xff] }
  0xdf   : > { %v2856_v63 = vunpack.i.h.bf16 %v2854_v37  ;;  %v2855_v0 = vunpack.i.l.bf16 %v2854_v37  ;;  %3138 = vrot.lane.b32.xlu1 %v3137_v21, %s3374_s15 }
  0xe0   : > { %3143 = vrot.lane.b32.xlu0 %v3117_v13, %s3375_s16 }
  0xe1   : > { %v3937_v9 = vsel %vm1813_vm3, %v1809_v6, %v2855_v0  ;;  %v3940_v11 = vsel %vm1813_vm3, %v1810_v40, %v2856_v63  ;;  %v2859_v33 = vpop.permute.xlu1 %2858  ;;  %v492_v63 = vld [vmem:[#allocation2 + $0x120] sm:$0xff]  ;;  %v493_v0 = vld [vmem:[#allocation2 + $0x128] sm:$0xff] }
  0xe2   : > { %4641 = vst [vmem:[#allocation15_spill] sm:$0xff] %v3937_v9  ;;  %4642 = vst [vmem:[#allocation16_spill] sm:$0xff] %v3940_v11  ;;  %v2861_v58 = vunpack.i.h.bf16 %v2859_v33  ;;  %v2860_v19 = vunpack.i.l.bf16 %v2859_v33  ;;  %v3942_v23 = vpop.permute.xlu0 %2863  ;;  %v3167_v18 = vpack.i.bf16 %v493_v0, %v492_v63  ;;  %v619_v6 = vld [vmem:[#allocation2 + $0x129] sm:$0xff]  ;;  %v494_v0 = vld [vmem:[#allocation2 + $0x138] sm:$0xff] }
  0xe3   : > { %3148 = vrot.lane.b32.xlu1 %v3147_v41, %s3375_s16  ;;  %v716_v11 = vld [vmem:[#allocation2 + $0x141] sm:$0xff]  ;;  %v2866_v17 = vunpack.i.h.bf16 %v3942_v23 }
  0xe4   : > { %v3950_v13 = vsel %vm1813_vm3, %v1812_v27, %v2861_v58  ;;  %v3953_v28 = vsel %vm1813_vm3, %v1811_v24, %v2860_v19  ;;  %3153 = vrot.lane.b32.xlu0 %v3697_v26, %s3376_s17  ;;  %v3177_v26 = vpack.i.bf16 %v619_v6, %v618_v62  ;;  %v650_v19 = vld [vmem:[#allocation2 + $0x122] sm:$0xff]  ;;  %v651_v27 = vld [vmem:[#allocation2 + $0x12a] sm:$0xff]  ;;  %v747_v9 = vld [vmem:[#allocation2 + $0x13a] sm:$0xff] }
  0xe5   : > { %4643 = vst [vmem:[#allocation17_spill] sm:$0xff] %v3950_v13  ;;  %4644 = vst [vmem:[#allocation18_spill] sm:$0xff] %v3953_v28  ;;  %v3957_v37 = vpop.permute.xlu1 %2868  ;;  %v495_v28 = vld [vmem:[#allocation2 + $0x140] sm:$0xff]  ;;  %v3998_v14 = vpack.i.bf16 %v748_v35, %v747_v9 }
  0xe6   : > { %v3959_v40 = vpop.permute.xlu0 %2873  ;;  %v3985_v6 = vpack.i.bf16 %v495_v28, %v494_v0  ;;  %v2710_v28 = vunpack.i.l.bf16 %v3811_v32  ;;  %v2786_v0 = vunpack.i.h.bf16 %v3868_v43  ;;  %v2865_v32 = vunpack.i.l.bf16 %v3942_v23 }
  0xe7   : > { %3158 = vrot.lane.b32.xlu1 %v3701_v34, %s3376_s17  ;;  %v4006_v43 = vpack.i.bf16 %v3920_v25, %v3918_v30  ;;  %v2871_v35 = vunpack.i.h.bf16 %v3957_v37  ;;  %v2870_v9 = vunpack.i.l.bf16 %v3957_v37  ;;  %v1784_v30 = vsel %vm379_vm0, %v3710_v45, %v2711_v15 }
  0xe8   : > { %3163 = vrot.lane.b32.xlu0 %v3137_v21, %s3371_s6  ;;  %v3975_v21 = vpack.i.bf16 %v651_v27, %v650_v19  ;;  %v2706_v19 = vunpack.i.h.bf16 %v3803_v1  ;;  %v2705_v27 = vunpack.i.l.bf16 %v3803_v1  ;;  %v2791_v1 = vunpack.i.h.bf16 %v3874_v46 }
  0xe9   : > { %v3964_v33 = vpop.permute.xlu1 %2878  ;;  %v1783_v23 = vsel %vm379_vm0, %v3708_v44, %v2710_v28 }
  0xea   : > { %v3966_v58 = vpop.permute.xlu0 %2883  ;;  %v1782_v46 = vsel %vm379_vm0, %v469_v5, %v2706_v19 }
  0xeb   : > { %3168 = vrot.lane.b32.xlu1 %v3167_v18, %s3371_s6 }
  0xec   : > { %3173 = vrot.lane.b32.xlu0 %v3147_v41, %s3372_s9  ;;  %v715_v41 = vld [vmem:[#allocation2 + $0x139] sm:$0xff] }
  0xed   : > { %v3970_v24 = vpop.permute.xlu1 %2888 }
  0xee   : > { %v3972_v13 = vpop.permute.xlu0 %2893 }
  0xef   : > { %3178 = vrot.lane.b32.xlu1 %v3177_v26, %s3372_s9 }
  0xf0   : > { %3183 = vrot.lane.b32.xlu0 %v3701_v34, %s3373_s12  ;;  %v622_v34 = vld [vmem:[#allocation2 + $0x151] sm:$0xff] }
  0xf1   : > { %v3979_v63 = vpop.permute.xlu1 %2898  ;;  %v4008_v10 = vpack.i.bf16 %v623_v20, %v622_v34  ;;  %v1815_v20 = vsel %vm1813_vm3, %v1782_v46, %v2786_v0 }
  0xf2   : > { %v3981_v62 = vpop.permute.xlu0 %2903  ;;  %v2901_v37 = vunpack.i.h.bf16 %v3979_v63 }
  0xf3   : > { %3188 = vrot.lane.b32.xlu1 %v3975_v21, %s3373_s12  ;;  %v2906_v45 = vunpack.i.h.bf16 %v3981_v62  ;;  %v2905_v15 = vunpack.i.l.bf16 %v3981_v62 }
  0xf4   : > { %3193 = vrot.lane.b32.xlu0 %v3167_v18, %s3374_s15  ;;  %v3996_v18 = vpack.i.bf16 %v716_v11, %v715_v41  ;;  %v1781_v11 = vsel %vm379_vm0, %v468_v39, %v2705_v27  ;;  %v1816_v39 = vsel %vm1813_vm3, %v1783_v23, %v2790_v36  ;;  %v1817_v41 = vsel %vm1813_vm3, %v1784_v30, %v2791_v1 }
  0xf5   : > { %v2909_v38 = vpop.permute.xlu1 %2908  ;;  %v1814_v25 = vsel %vm1813_vm3, %v1781_v11, %v2785_v31  ;;  %v1848_v27 = vsel %vm1846_vm4, %v1815_v20, %v2866_v17  ;;  %v1849_v36 = vsel %vm1846_vm4, %v1816_v39, %v2870_v9  ;;  %v1850_v31 = vsel %vm1846_vm4, %v1817_v41, %v2871_v35 }
  0xf6   : > { %v2914_v42 = vpop.permute.xlu0 %2913  ;;  %v1847_v44 = vsel %vm1846_vm4, %v1814_v25, %v2865_v32  ;;  %v2911_v34 = vunpack.i.h.bf16 %v2909_v38  ;;  %v2910_v28 = vunpack.i.l.bf16 %v2909_v38  ;;  %v1881_v46 = vsel %vm1879_vm5, %v1848_v27, %v2901_v37 }
  0xf7   : > { %3198 = vrot.lane.b32.xlu1 %v3985_v6, %s3374_s15  ;;  %v2915_v0 = vunpack.i.l.bf16 %v2914_v42  ;;  %v1882_v35 = vsel %vm1879_vm5, %v1849_v36, %v2905_v15  ;;  %v1883_v38 = vsel %vm1879_vm5, %v1850_v31, %v2906_v45 }
  0xf8   : > { %3203 = vrot.lane.b32.xlu0 %v3177_v26, %s3375_s16  ;;  %v2900_v26 = vunpack.i.l.bf16 %v3979_v63  ;;  %v2916_v63 = vunpack.i.h.bf16 %v2914_v42 }
  0xf9   : > { %v2919_v5 = vpop.permute.xlu1 %2918  ;;  %v1915_v39 = vsel %vm1912_vm6, %v1882_v35, %v2915_v0 }
  0xfa   : > { %v2924_v19 = vpop.permute.xlu0 %2923  ;;  %v2921_v17 = vunpack.i.h.bf16 %v2919_v5  ;;  %v2920_v1 = vunpack.i.l.bf16 %v2919_v5  ;;  %v1880_v62 = vsel %vm1879_vm5, %v1847_v44, %v2900_v26  ;;  %v1916_v41 = vsel %vm1912_vm6, %v1883_v38, %v2916_v63 }
  0xfb   : > { %3208 = vrot.lane.b32.xlu1 %v3996_v18, %s3375_s16  ;;  %v2926_v11 = vunpack.i.h.bf16 %v2924_v19  ;;  %v2925_v23 = vunpack.i.l.bf16 %v2924_v19  ;;  %v1913_v42 = vsel %vm1912_vm6, %v1880_v62, %v2910_v28  ;;  %v655_v62 = vld [vmem:[#allocation2 + $0x15a] sm:$0xff] }
  0xfc   : > { %3213 = vrot.lane.b32.xlu0 %v3975_v21, %s3376_s17  ;;  %v1914_v21 = vsel %vm1912_vm6, %v1881_v46, %v2911_v34  ;;  %v1946_v37 = vsel %vm1945_vm7, %v1913_v42, %v2920_v1  ;;  %v751_v42 = vld [vmem:[#allocation2 + $0x16a] sm:$0xff] }
  0xfd   : > { %v2929_v32 = vpop.permute.xlu1 %2928  ;;  %v1947_v26 = vsel %vm1945_vm7, %v1914_v21, %v2921_v17  ;;  %v1948_v44 = vsel %vm1945_vm7, %v1915_v39, %v2925_v23  ;;  %v1949_v27 = vsel %vm1945_vm7, %v1916_v41, %v2926_v11  ;;  %v2716_v21 = vunpack.i.h.bf16 %v3809_v2  ;;  %v594_v39 = vld [vmem:[#allocation2 + $0x180] sm:$0xff]  ;;  %v595_v41 = vld [vmem:[#allocation2 + $0x188] sm:$0xff] }
  0xfe   : > { %v2934_v9 = vpop.permute.xlu0 %2933  ;;  %v2931_v30 = vunpack.i.h.bf16 %v2929_v32  ;;  %v2930_v20 = vunpack.i.l.bf16 %v2929_v32  ;;  %v654_v32 = vld [vmem:[#allocation2 + $0x152] sm:$0xff] }
  0xff   : > { %3218 = vrot.lane.b32.xlu1 %v3998_v14, %s3376_s17  ;;  %v2936_v25 = vunpack.i.h.bf16 %v2934_v9  ;;  %v2935_v5 = vunpack.i.l.bf16 %v2934_v9 }
 0x100   : > { %3223 = vrot.lane.b32.xlu0 %v3985_v6, %s3371_s6  ;;  %v1979_v6 = vsel %vm1978_vm8, %v1946_v37, %v2930_v20  ;;  %v1980_v28 = vsel %vm1978_vm8, %v1947_v26, %v2931_v30  ;;  %v719_v30 = vld [vmem:[#allocation2 + $0x169] sm:$0xff]  ;;  %v720_v20 = vld [vmem:[#allocation2 + $0x171] sm:$0xff]  ;;  %v2721_v37 = vunpack.i.h.bf16 %v3817_v50  ;;  %v2720_v26 = vunpack.i.l.bf16 %v3817_v50 }
 0x101   : > { %v2939_v19 = vpop.permute.xlu1 %2938  ;;  %v1981_v63 = vsel %vm1978_vm8, %v1948_v44, %v2935_v5  ;;  %v1982_v0 = vsel %vm1978_vm8, %v1949_v27, %v2936_v25  ;;  %v2715_v25 = vunpack.i.l.bf16 %v3809_v2  ;;  %v752_v5 = vld [vmem:[#allocation2 + $0x172] sm:$0xff]  ;;  %v2795_v44 = vunpack.i.l.bf16 %v3876_v47 }
 0x102   : > { %v2941_v45 = vunpack.i.h.bf16 %v2939_v19  ;;  %v2940_v15 = vunpack.i.l.bf16 %v2939_v19  ;;  %v2944_v36 = vpop.permute.xlu0 %2943  ;;  %v2796_v19 = vunpack.i.h.bf16 %v3876_v47  ;;  %v2800_v2 = vunpack.i.l.bf16 %v3881_v16 }
 0x103   : > { %v2946_v31 = vunpack.i.h.bf16 %v2944_v36  ;;  %v2945_v34 = vunpack.i.l.bf16 %v2944_v36  ;;  %3228 = vrot.lane.b32.xlu1 %v4006_v43, %s3371_s6  ;;  %v4087_v36 = vpack.i.bf16 %v720_v20, %v719_v30  ;;  %v2875_v50 = vunpack.i.l.bf16 %v3959_v40 }
 0x104   : > { %3233 = vrot.lane.b32.xlu0 %v3996_v18, %s3372_s9  ;;  %v2012_v17 = vsel %vm2011_vm9, %v1979_v6, %v2940_v15  ;;  %v2013_v1 = vsel %vm2011_vm9, %v1980_v28, %v2941_v45  ;;  %v4070_v18 = vpack.i.bf16 %v655_v62, %v654_v32  ;;  %v2801_v45 = vunpack.i.h.bf16 %v3881_v16 }
 0x105   : > { %v2014_v46 = vsel %vm2011_vm9, %v1981_v63, %v2945_v34  ;;  %v2015_v11 = vsel %vm2011_vm9, %v1982_v0, %v2946_v31  ;;  %v4063_v23 = vpop.permute.xlu1 %2948  ;;  %v2044_v9 = vpack.c.bf16 %v2013_v1, %v2012_v17  ;;  %v2876_v31 = vunpack.i.h.bf16 %v3959_v40 }
 0x106   : > { %v2045_v35 = vpack.c.bf16 %v2015_v11, %v2014_v46  ;;  %v4065_v38 = vpop.permute.xlu0 %2953  ;;  %v4093_v47 = vpack.i.bf16 %v752_v5, %v751_v42  ;;  %v4095_v34 = vpack.i.bf16 %v595_v41, %v594_v39  ;;  %v1785_v16 = vsel %vm379_vm0, %v3716_v48, %v2715_v25 }
 0x107   : > { %3238 = vrot.lane.b32.xlu1 %v4008_v10, %s3372_s9  ;;  %2645 = vmatprep.mubr.msk.bf16.mxu0 %vm2080_vm10, %v2044_v9  ;;  %v2880_v6 = vunpack.i.l.bf16 %v3964_v33  ;;  %v1788_v40 = vsel %vm379_vm0, %v3722_v52, %v2721_v37  ;;  %v1787_v28 = vsel %vm379_vm0, %v3720_v51, %v2720_v26  ;;  %v1818_v48 = vsel %vm1813_vm3, %v1785_v16, %v2795_v44 }
 0x108   : > { %3243 = vrot.lane.b32.xlu0 %v3998_v14, %s3373_s12  ;;  %2646 = vmatmul.mubr.msk.bf16.vlgmr.msra.gmra.mrb[0].mxu0 %vm2080_vm10, %v2045_v35  ;;  %v4085_v14 = vpack.i.bf16 %v3933_v8, %v3931_v22  ;;  %v1786_v22 = vsel %vm379_vm0, %v3718_v49, %v2716_v21  ;;  %v2881_v8 = vunpack.i.h.bf16 %v3964_v33  ;;  %v1821_v49 = vsel %vm1813_vm3, %v1788_v40, %v2801_v45 }
 0x109   : > { %v2959_v27 = vpop.permute.xlu1 %2958  ;;  %v1819_v63 = vsel %vm1813_vm3, %v1786_v22, %v2796_v19  ;;  %v1820_v17 = vsel %vm1813_vm3, %v1787_v28, %v2800_v2  ;;  %v2951_v33 = vunpack.i.h.bf16 %v4063_v23  ;;  %v2950_v1 = vunpack.i.l.bf16 %v4063_v23 }
 0x10a   : > { %v2964_v15 = vpop.permute.xlu0 %2963  ;;  %v1851_v32 = vsel %vm1846_vm4, %v1818_v48, %v2875_v50  ;;  %v1852_v52 = vsel %vm1846_vm4, %v1819_v63, %v2876_v31  ;;  %v2956_v51 = vunpack.i.h.bf16 %v4065_v38  ;;  %v2955_v62 = vunpack.i.l.bf16 %v4065_v38 }
 0x10b   : > { %3248 = vrot.lane.b32.xlu1 %v4070_v18, %s3373_s12  ;;  %v1853_v46 = vsel %vm1846_vm4, %v1820_v17, %v2880_v6  ;;  %v1854_v11 = vsel %vm1846_vm4, %v1821_v49, %v2881_v8  ;;  %v2961_v9 = vunpack.i.h.bf16 %v2959_v27  ;;  %v2960_v35 = vunpack.i.l.bf16 %v2959_v27 }
 0x10c   : > { %3253 = vrot.lane.b32.xlu0 %v4006_v43, %s3374_s15  ;;  %v2966_v23 = vunpack.i.h.bf16 %v2964_v15  ;;  %v2965_v30 = vunpack.i.l.bf16 %v2964_v15  ;;  %v1884_v25 = vsel %vm1879_vm5, %v1851_v32, %v2950_v1  ;;  %v1885_v38 = vsel %vm1879_vm5, %v1852_v52, %v2951_v33  ;;  %v626_v32 = vld [vmem:[#allocation2 + $0x181] sm:$0xff]  ;;  %v627_v52 = vld [vmem:[#allocation2 + $0x189] sm:$0xff] }
 0x10d   : > { %v2969_v0 = vpop.permute.xlu1 %2968  ;;  %v1887_v37 = vsel %vm1879_vm5, %v1854_v11, %v2956_v51  ;;  %v1886_v26 = vsel %vm1879_vm5, %v1853_v46, %v2955_v62  ;;  %v1918_v27 = vsel %vm1912_vm6, %v1885_v38, %v2961_v9  ;;  %v4169_v38 = vld [vmem:[#allocation2 + $0x199] sm:$0xff] }
 0x10e   : > { %v2974_v43 = vpop.permute.xlu0 %2973  ;;  %v2971_v20 = vunpack.i.h.bf16 %v2969_v0  ;;  %v2970_v42 = vunpack.i.l.bf16 %v2969_v0  ;;  %v1919_v15 = vsel %vm1912_vm6, %v1886_v26, %v2965_v30  ;;  %v1920_v31 = vsel %vm1912_vm6, %v1887_v37, %v2966_v23  ;;  %v658_v23 = vld [vmem:[#allocation2 + $0x182] sm:$0xff] }
 0x10f   : > { %3258 = vrot.lane.b32.xlu1 %v4085_v14, %s3374_s15  ;;  %v2976_v5 = vunpack.i.h.bf16 %v2974_v43  ;;  %v2975_v39 = vunpack.i.l.bf16 %v2974_v43  ;;  %v2726_v30 = vunpack.i.h.bf16 %v3819_v59  ;;  %v2806_v37 = vunpack.i.h.bf16 %v3883_v53 }
 0x110   : > { %3263 = vrot.lane.b32.xlu0 %v4008_v10, %s3375_s16  ;;  %v1917_v10 = vsel %vm1912_vm6, %v1884_v25, %v2960_v35  ;;  %v1951_v16 = vsel %vm1945_vm7, %v1918_v27, %v2971_v20  ;;  %v659_v20 = vld [vmem:[#allocation2 + $0x18a] sm:$0xff]  ;;  %v2725_v25 = vunpack.i.l.bf16 %v3819_v59  ;;  %v2805_v26 = vunpack.i.l.bf16 %v3883_v53  ;;  %v4179_v59 = vld [vmem:[#allocation2 + $0x1a2] sm:$0xff] }
 0x111   : > { %v2979_v21 = vpop.permute.xlu1 %2978  ;;  %v1950_v50 = vsel %vm1945_vm7, %v1917_v10, %v2970_v42  ;;  %v1952_v8 = vsel %vm1945_vm7, %v1919_v15, %v2975_v39  ;;  %v1953_v6 = vsel %vm1945_vm7, %v1920_v31, %v2976_v5  ;;  %v4163_v42 = vld [vmem:[#allocation2 + $0x198] sm:$0xff]  ;;  %v4171_v5 = vld [vmem:[#allocation2 + $0x1a1] sm:$0xff]  ;;  %v2731_v39 = vunpack.i.h.bf16 %v3825_v3 }
 0x112   : > { %v2984_v41 = vpop.permute.xlu0 %2983  ;;  %v2981_v19 = vunpack.i.h.bf16 %v2979_v21  ;;  %v2980_v44 = vunpack.i.l.bf16 %v2979_v21  ;;  %v692_v21 = vld [vmem:[#allocation2 + $0x1a0] sm:$0xff]  ;;  %v2810_v10 = vunpack.i.l.bf16 %v3889_v54  ;;  %v2886_v15 = vunpack.i.h.bf16 %v3966_v58 }
 0x113   : > { %3268 = vrot.lane.b32.xlu1 %v4087_v36, %s3375_s16  ;;  %v2986_v45 = vunpack.i.h.bf16 %v2984_v41  ;;  %v2985_v2 = vunpack.i.l.bf16 %v2984_v41  ;;  %v2730_v41 = vunpack.i.l.bf16 %v3825_v3  ;;  %v1790_v3 = vsel %vm379_vm0, %v3732_v56, %v2726_v30 }
 0x114   : > { %3273 = vrot.lane.b32.xlu0 %v4070_v18, %s3376_s17  ;;  %v1983_v48 = vsel %vm1978_vm8, %v1950_v50, %v2980_v44  ;;  %v1984_v18 = vsel %vm1978_vm8, %v1951_v16, %v2981_v19  ;;  %v4177_v44 = vld [vmem:[#allocation2 + $0x19a] sm:$0xff]  ;;  %v2885_v53 = vunpack.i.l.bf16 %v3966_v58  ;;  %v3327_v31 = vpack.i.bf16 %v4171_v5, %v4169_v38 }
 0x115   : > { %v2989_v22 = vpop.permute.xlu1 %2988  ;;  %v1985_v17 = vsel %vm1978_vm8, %v1952_v8, %v2985_v2  ;;  %v1986_v33 = vsel %vm1978_vm8, %v1953_v6, %v2986_v45  ;;  %v4183_v45 = vpack.i.bf16 %v659_v20, %v658_v23  ;;  %v3317_v2 = vpack.i.bf16 %v692_v21, %v4163_v42 }
 0x116   : > { %v2991_v40 = vunpack.i.h.bf16 %v2989_v22  ;;  %v2990_v28 = vunpack.i.l.bf16 %v2989_v22  ;;  %v2994_v63 = vpop.permute.xlu0 %2993  ;;  %v2891_v50 = vunpack.i.h.bf16 %v3970_v24  ;;  %v2890_v16 = vunpack.i.l.bf16 %v3970_v24 }
 0x117   : > { %v2996_v0 = vunpack.i.h.bf16 %v2994_v63  ;;  %v2995_v49 = vunpack.i.l.bf16 %v2994_v63  ;;  %3278 = vrot.lane.b32.xlu1 %v4093_v47, %s3376_s17  ;;  %v3337_v56 = vpack.i.bf16 %v4179_v59, %v4177_v44  ;;  %v1792_v58 = vsel %vm379_vm0, %v3736_v60, %v2731_v39 }
 0x118   : > { %v2016_v1 = vsel %vm2011_vm9, %v1983_v48, %v2990_v28  ;;  %v2017_v43 = vsel %vm2011_vm9, %v1984_v18, %v2991_v40  ;;  %3283 = vrot.lane.b32.xlu0 %v4085_v14, %s3371_s6  ;;  %v4161_v14 = vpack.i.bf16 %v627_v52, %v626_v32  ;;  %v1791_v22 = vsel %vm379_vm0, %v3734_v57, %v2730_v41 }
 0x119   : > { %v2046_v51 = vpack.c.bf16 %v2017_v43, %v2016_v1  ;;  %v2018_v62 = vsel %vm2011_vm9, %v1985_v17, %v2995_v49  ;;  %v2019_v46 = vsel %vm2011_vm9, %v1986_v33, %v2996_v0  ;;  %v4153_v11 = vpop.permute.xlu1 %2998  ;;  %v1824_v24 = vsel %vm1813_vm3, %v1791_v22, %v2810_v10 }
 0x11a   : > { %v2047_v9 = vpack.c.bf16 %v2019_v46, %v2018_v62  ;;  %v4155_v35 = vpop.permute.xlu0 %3003  ;;  %v3000_v28 = vunpack.i.l.bf16 %v4153_v11  ;;  %v1857_v0 = vsel %vm1846_vm4, %v1824_v24, %v2890_v16  ;;  %v2815_v44 = vunpack.i.l.bf16 %v3891_v7 }
 0x11b   : > { %3288 = vrot.lane.b32.xlu1 %v4095_v34, %s3371_s6  ;;  %2649 = vmatprep.mubr.msk.bf16.mxu0 %vm2080_vm10, %v2046_v51  ;;  %v3006_v57 = vunpack.i.h.bf16 %v4155_v35  ;;  %v3005_v18 = vunpack.i.l.bf16 %v4155_v35  ;;  %v2821_v59 = vunpack.i.h.bf16 %v3896_v12 }
 0x11c   : > { %3293 = vrot.lane.b32.xlu0 %v4087_v36, %s3372_s9  ;;  %2650 = vmatmul.mubr.msk.bf16.gmra.mrb[4].mxu0 %vm2080_vm10, %v2047_v9  ;;  %v2811_v36 = vunpack.i.h.bf16 %v3889_v54  ;;  %v1789_v54 = vsel %vm379_vm0, %v3730_v55, %v2725_v25  ;;  %v1823_v55 = vsel %vm1813_vm3, %v1790_v3, %v2806_v37 }
 0x11d   : > { %v3009_v19 = vpop.permute.xlu1 %3008  ;;  %v1822_v8 = vsel %vm1813_vm3, %v1789_v54, %v2805_v26  ;;  %v1856_v60 = vsel %vm1846_vm4, %v1823_v55, %v2886_v15  ;;  %v1890_v30 = vsel %vm1879_vm5, %v1857_v0, %v3005_v18  ;;  %v3345_v0 = vld [vmem:[#allocation2 + $0x98] sm:$0xff] }
 0x11e   : > { %v3014_v27 = vpop.permute.xlu0 %3013  ;;  %v1825_v40 = vsel %vm1813_vm3, %v1792_v58, %v2811_v36  ;;  %v1855_v48 = vsel %vm1846_vm4, %v1822_v8, %v2885_v53  ;;  %v3011_v17 = vunpack.i.h.bf16 %v3009_v19  ;;  %v3010_v33 = vunpack.i.l.bf16 %v3009_v19 }
 0x11f   : > { %3298 = vrot.lane.b32.xlu1 %v4161_v14, %s3372_s9  ;;  %v1858_v49 = vsel %vm1846_vm4, %v1825_v40, %v2891_v50  ;;  %v3016_v1 = vunpack.i.h.bf16 %v3014_v27  ;;  %v3015_v43 = vunpack.i.l.bf16 %v3014_v27  ;;  %v1888_v62 = vsel %vm1879_vm5, %v1855_v48, %v3000_v28 }
 0x120   : > { %3303 = vrot.lane.b32.xlu0 %v4093_v47, %s3373_s12  ;;  %v3001_v47 = vunpack.i.h.bf16 %v4153_v11  ;;  %v1891_v23 = vsel %vm1879_vm5, %v1858_v49, %v3006_v57  ;;  %v2741_v28 = vunpack.i.h.bf16 %v3833_v61  ;;  %v2740_v48 = vunpack.i.l.bf16 %v3833_v61 }
 0x121   : > { %v3019_v6 = vpop.permute.xlu1 %3018  ;;  %v1923_v5 = vsel %vm1912_vm6, %v1890_v30, %v3015_v43  ;;  %v1924_v39 = vsel %vm1912_vm6, %v1891_v23, %v3016_v1  ;;  %v2895_v57 = vunpack.i.l.bf16 %v3972_v13  ;;  %v2896_v1 = vunpack.i.h.bf16 %v3972_v13 }
 0x122   : > { %v3024_v63 = vpop.permute.xlu0 %3023  ;;  %v3021_v32 = vunpack.i.h.bf16 %v3019_v6  ;;  %v3020_v52 = vunpack.i.l.bf16 %v3019_v6  ;;  %v1889_v46 = vsel %vm1879_vm5, %v1856_v60, %v3001_v47  ;;  %v2735_v47 = vunpack.i.l.bf16 %v3827_v4 }
 0x123   : > { %3308 = vrot.lane.b32.xlu1 %v4183_v45, %s3373_s12  ;;  %v3026_v11 = vunpack.i.h.bf16 %v3024_v63  ;;  %v3025_v9 = vunpack.i.l.bf16 %v3024_v63  ;;  %v1922_v21 = vsel %vm1912_vm6, %v1889_v46, %v3011_v17  ;;  %v2816_v60 = vunpack.i.h.bf16 %v3891_v7 }
 0x124   : > { %3313 = vrot.lane.b32.xlu0 %v4095_v34, %s3374_s15  ;;  %v1921_v34 = vsel %vm1912_vm6, %v1888_v62, %v3010_v33  ;;  %v1955_v37 = vsel %vm1945_vm7, %v1922_v21, %v3021_v32  ;;  %v3347_v33 = vld [vmem:[#allocation2 + $0xb0] sm:$0xff] }
 0x125   : > { %v3029_v51 = vpop.permute.xlu1 %3028  ;;  %v1954_v41 = vsel %vm1945_vm7, %v1921_v34, %v3020_v52  ;;  %v1956_v19 = vsel %vm1945_vm7, %v1923_v5, %v3025_v9  ;;  %v1957_v36 = vsel %vm1945_vm7, %v1924_v39, %v3026_v11  ;;  %v1796_v61 = vsel %vm379_vm0, %v3347_v33, %v2741_v28 }
 0x126   : > { %v3034_v35 = vpop.permute.xlu0 %3033  ;;  %v3031_v20 = vunpack.i.h.bf16 %v3029_v51  ;;  %v3030_v42 = vunpack.i.l.bf16 %v3029_v51  ;;  %v1829_v9 = vsel %vm1813_vm3, %v1796_v61, %v2821_v59 }
 0x127   : > { %3318 = vrot.lane.b32.xlu1 %v3317_v2, %s3374_s15  ;;  %v3036_v25 = vunpack.i.h.bf16 %v3034_v35  ;;  %v3035_v38 = vunpack.i.l.bf16 %v3034_v35 }
 0x128   : > { %3323 = vrot.lane.b32.xlu0 %v4161_v14, %s3375_s16  ;;  %v1987_v3 = vsel %vm1978_vm8, %v1954_v41, %v3030_v42  ;;  %v1988_v14 = vsel %vm1978_vm8, %v1955_v37, %v3031_v20 }
 0x129   : > { %v3039_v26 = vpop.permute.xlu1 %3038  ;;  %v1989_v54 = vsel %vm1978_vm8, %v1956_v19, %v3035_v38  ;;  %v1990_v50 = vsel %vm1978_vm8, %v1957_v36, %v3036_v25 }
 0x12a   : > { %v3041_v10 = vunpack.i.h.bf16 %v3039_v26  ;;  %v3040_v27 = vunpack.i.l.bf16 %v3039_v26  ;;  %v3044_v2 = vpop.permute.xlu0 %3043 }
 0x12b   : > { %v3046_v15 = vunpack.i.h.bf16 %v3044_v2  ;;  %v3045_v53 = vunpack.i.l.bf16 %v3044_v2  ;;  %3328 = vrot.lane.b32.xlu1 %v3327_v31, %s3375_s16 }
 0x12c   : > { %v2020_v16 = vsel %vm2011_vm9, %v1987_v3, %v3040_v27  ;;  %v2021_v58 = vsel %vm2011_vm9, %v1988_v14, %v3041_v10  ;;  %3333 = vrot.lane.b32.xlu0 %v4183_v45, %s3376_s17  ;;  %v2736_v45 = vunpack.i.h.bf16 %v3827_v4  ;;  %v3346_v4 = vld [vmem:[#allocation2 + $0x90] sm:$0xff] }
 0x12d   : > { %v2048_v22 = vpack.c.bf16 %v2021_v58, %v2020_v16  ;;  %v2022_v8 = vsel %vm2011_vm9, %v1989_v54, %v3045_v53  ;;  %v2023_v55 = vsel %vm2011_vm9, %v1990_v50, %v3046_v15  ;;  %v3049_v6 = vpop.permute.xlu1 %3048  ;;  %v1793_v17 = vsel %vm379_vm0, %v3346_v4, %v2735_v47 }
 0x12e   : > { %v2049_v40 = vpack.c.bf16 %v2023_v55, %v2022_v8  ;;  %v3054_v24 = vpop.permute.xlu0 %3053  ;;  %v1794_v49 = vsel %vm379_vm0, %v3345_v0, %v2736_v45  ;;  %v3051_v7 = vunpack.i.h.bf16 %v3049_v6  ;;  %v3050_v32 = vunpack.i.l.bf16 %v3049_v6 }
 0x12f   : > { %3338 = vrot.lane.b32.xlu1 %v3337_v56, %s3376_s17  ;;  %2653 = vmatprep.mubr.msk.bf16.mxu0 %vm2080_vm10, %v2048_v22  ;;  %v2820_v56 = vunpack.i.l.bf16 %v3896_v12  ;;  %v3056_v52 = vunpack.i.h.bf16 %v3054_v24  ;;  %v3055_v51 = vunpack.i.l.bf16 %v3054_v24  ;;  %v3348_v12 = vld [vmem:[#allocation2 + $0xa8] sm:$0xff]  ;;  %v1826_v46 = vsel %vm1813_vm3, %v1793_v17, %v2815_v44 }
 0x130   : > { %2654 = vmatmul.mubr.msk.bf16.gmra.mrb[8].mxu0 %vm2080_vm10, %v2049_v40  ;;  %v1795_v62 = vsel %vm379_vm0, %v3348_v12, %v2740_v48  ;;  %v1827_v11 = vsel %vm1813_vm3, %v1794_v49, %v2816_v60  ;;  %v1859_v23 = vsel %vm1846_vm4, %v1826_v46, %v2895_v57  ;;  %v1862_v39 = vsel %vm1846_vm4, %v1829_v9, %v3051_v7  ;;  %v4646_v46 = vld [vmem:[#allocation9_spill] sm:$0xff] }
 0x131   : > { %v4254_v31 = vpop.permute.xlu1 %3058  ;;  %v1828_v35 = vsel %vm1813_vm3, %v1795_v62, %v2820_v56  ;;  %v1860_v42 = vsel %vm1846_vm4, %v1827_v11, %v2896_v1  ;;  %v1892_v41 = vsel %vm1879_vm5, %v1859_v23, %v3055_v51  ;;  %v2746_v7 = vunpack.i.h.bf16 %v3835_v29 }
 0x132   : > { %v3064_v63 = vpop.permute.xlu0 %3063  ;;  %v3060_v34 = vunpack.i.l.bf16 %v4254_v31  ;;  %v1861_v5 = vsel %vm1846_vm4, %v1828_v35, %v3050_v32  ;;  %v1893_v37 = vsel %vm1879_vm5, %v1860_v42, %v3056_v52  ;;  %v3061_v26 = vunpack.i.h.bf16 %v4254_v31  ;;  %v4645_v52 = vld [vmem:[#allocation3_spill] sm:$0xff]  ;;  %v4647_v35 = vld [vmem:[#allocation10_spill] sm:$0xff] }
 0x133   : > { %v3066_v30 = vunpack.i.h.bf16 %v3064_v63  ;;  %v3065_v13 = vunpack.i.l.bf16 %v3064_v63  ;;  %v2745_v32 = vunpack.i.l.bf16 %v3835_v29  ;;  %v2751_v51 = vunpack.i.h.bf16 %v4645_v52  ;;  %v3349_v42 = vld [vmem:[#allocation2 + $0xc8] sm:$0xff] }
 0x134   : > { %v1894_v53 = vsel %vm1879_vm5, %v1861_v5, %v3060_v34  ;;  %v1895_v40 = vsel %vm1879_vm5, %v1862_v39, %v3061_v26  ;;  %v2750_v62 = vunpack.i.l.bf16 %v4645_v52  ;;  %v2826_v11 = vunpack.i.h.bf16 %v4646_v46 }
 0x135   : > { %v3069_v18 = vpop.permute.xlu1 %3068  ;;  %v1925_v27 = vsel %vm1912_vm6, %v1892_v41, %v3065_v13  ;;  %v1926_v2 = vsel %vm1912_vm6, %v1893_v37, %v3066_v30  ;;  %v2825_v9 = vunpack.i.l.bf16 %v4646_v46  ;;  %v2831_v23 = vunpack.i.h.bf16 %v4647_v35 }
 0x136   : > { %v3074_v43 = vpop.permute.xlu0 %3073  ;;  %v3070_v19 = vunpack.i.l.bf16 %v3069_v18  ;;  %v3071_v3 = vunpack.i.h.bf16 %v3069_v18  ;;  %v2830_v30 = vunpack.i.l.bf16 %v4647_v35  ;;  %v1798_v34 = vsel %vm379_vm0, %v3349_v42, %v2746_v7 }
 0x137   : > { %v3076_v21 = vunpack.i.h.bf16 %v3074_v43  ;;  %v3075_v25 = vunpack.i.l.bf16 %v3074_v43 }
 0x138   : > { %v1927_v24 = vsel %vm1912_vm6, %v1894_v53, %v3070_v19  ;;  %v1928_v47 = vsel %vm1912_vm6, %v1895_v40, %v3071_v3 }
 0x139   : > { %v3079_v20 = vpop.permute.xlu1 %3078  ;;  %v1958_v54 = vsel %vm1945_vm7, %v1925_v27, %v3075_v25  ;;  %v1959_v50 = vsel %vm1945_vm7, %v1926_v2, %v3076_v21  ;;  %v3350_v21 = vld [vmem:[#allocation2 + $0xc0] sm:$0xff]  ;;  %v4648_v25 = vld [vmem:[#allocation8_spill] sm:$0xff]  ;;  %v1831_v2 = vsel %vm1813_vm3, %v1798_v34, %v2826_v11 }
 0x13a   : > { %v3084_v38 = vpop.permute.xlu0 %3083  ;;  %v3080_v14 = vunpack.i.l.bf16 %v3079_v20  ;;  %v3081_v16 = vunpack.i.h.bf16 %v3079_v20  ;;  %v1797_v29 = vsel %vm379_vm0, %v3350_v21, %v2745_v32 }
 0x13b   : > { %v3086_v36 = vunpack.i.h.bf16 %v3084_v38  ;;  %v3085_v10 = vunpack.i.l.bf16 %v3084_v38  ;;  %v1800_v38 = vsel %vm379_vm0, %v4648_v25, %v2751_v51  ;;  %v1830_v27 = vsel %vm1813_vm3, %v1797_v29, %v2825_v9 }
 0x13c   : > { %v1960_v28 = vsel %vm1945_vm7, %v1927_v24, %v3080_v14  ;;  %v1961_v44 = vsel %vm1945_vm7, %v1928_v47, %v3081_v16  ;;  %v1833_v3 = vsel %vm1813_vm3, %v1800_v38, %v2831_v23 }
 0x13d   : > { %v3089_v15 = vpop.permute.xlu1 %3088  ;;  %v1991_v31 = vsel %vm1978_vm8, %v1958_v54, %v3085_v10  ;;  %v1992_v45 = vsel %vm1978_vm8, %v1959_v50, %v3086_v36  ;;  %v3351_v36 = vld [vmem:[#allocation2 + $0xd8] sm:$0xff] }
 0x13e   : > { %v3094_v58 = vpop.permute.xlu0 %3093  ;;  %v3091_v22 = vunpack.i.h.bf16 %v3089_v15  ;;  %v3090_v8 = vunpack.i.l.bf16 %v3089_v15  ;;  %v1799_v10 = vsel %vm379_vm0, %v3351_v36, %v2750_v62 }
 0x13f   : > { %v3096_v55 = vunpack.i.h.bf16 %v3094_v58  ;;  %v3095_v6 = vunpack.i.l.bf16 %v3094_v58  ;;  %v1832_v14 = vsel %vm1813_vm3, %v1799_v10, %v2830_v30 }
 0x140   : > { %v1993_v0 = vsel %vm1978_vm8, %v1960_v28, %v3090_v8  ;;  %v1994_v49 = vsel %vm1978_vm8, %v1961_v44, %v3091_v22 }
 0x141   : > { %v2024_v63 = vsel %vm2011_vm9, %v1991_v31, %v3095_v6  ;;  %v2025_v48 = vsel %vm2011_vm9, %v1992_v45, %v3096_v55  ;;  %v3099_v60 = vpop.permute.xlu1 %3098 }
 0x142   : > { %v2050_v59 = vpack.c.bf16 %v2025_v48, %v2024_v63  ;;  %v3101_v56 = vunpack.i.h.bf16 %v3099_v60  ;;  %v3100_v57 = vunpack.i.l.bf16 %v3099_v60  ;;  %v3104_v18 = vpop.permute.xlu0 %3103 }
 0x143   : > { %v3105_v13 = vunpack.i.l.bf16 %v3104_v18  ;;  %v3106_v5 = vunpack.i.h.bf16 %v3104_v18 }
 0x144   : > { %v2026_v4 = vsel %vm2011_vm9, %v1993_v0, %v3100_v57  ;;  %v2027_v17 = vsel %vm2011_vm9, %v1994_v49, %v3101_v56  ;;  %2657 = vmatprep.mubr.msk.bf16.mxu0 %vm2080_vm10, %v2050_v59 }
 0x145   : > { %v2051_v33 = vpack.c.bf16 %v2027_v17, %v2026_v4  ;;  %v3109_v61 = vpop.permute.xlu1 %3108  ;;  %v1863_v15 = vsel %vm1846_vm4, %v1830_v27, %v3105_v13  ;;  %v1864_v16 = vsel %vm1846_vm4, %v1831_v2, %v3106_v5  ;;  %v4651_v27 = vld [vmem:[#allocation11_spill] sm:$0xff] }
 0x146   : > { %v3114_v1 = vpop.permute.xlu0 %3113  ;;  %v3111_v41 = vunpack.i.h.bf16 %v3109_v61  ;;  %v3110_v37 = vunpack.i.l.bf16 %v3109_v61  ;;  %v2836_v2 = vunpack.i.h.bf16 %v4651_v27 }
 0x147   : > { %2658 = vmatmul.mubr.msk.bf16.gmra.mrb[12].mxu0 %vm2080_vm10, %v2051_v33  ;;  %v3116_v26 = vunpack.i.h.bf16 %v3114_v1  ;;  %v3115_v19 = vunpack.i.l.bf16 %v3114_v1 }
 0x148   : > { %v1865_v6 = vsel %vm1846_vm4, %v1832_v14, %v3110_v37  ;;  %v1866_v40 = vsel %vm1846_vm4, %v1833_v3, %v3111_v41  ;;  %v2835_v3 = vunpack.i.l.bf16 %v4651_v27  ;;  %v4652_v14 = vld [vmem:[#allocation12_spill] sm:$0xff] }
 0x149   : > { %v3119_v43 = vpop.permute.xlu1 %3118  ;;  %v1896_v24 = vsel %vm1879_vm5, %v1863_v15, %v3115_v19  ;;  %v1897_v31 = vsel %vm1879_vm5, %v1864_v16, %v3116_v26  ;;  %v4650_v26 = vld [vmem:[#allocation5_spill] sm:$0xff]  ;;  %v2841_v15 = vunpack.i.h.bf16 %v4652_v14  ;;  %v3352_v16 = vld [vmem:[#allocation2 + $0xf8] sm:$0xff] }
 0x14a   : > { %v3124_v12 = vpop.permute.xlu0 %3123  ;;  %v3120_v58 = vunpack.i.l.bf16 %v3119_v43  ;;  %v3121_v45 = vunpack.i.h.bf16 %v3119_v43  ;;  %v2761_v19 = vunpack.i.h.bf16 %v4650_v26  ;;  %v2760_v10 = vunpack.i.l.bf16 %v4650_v26 }
 0x14b   : > { %v3126_v53 = vunpack.i.h.bf16 %v3124_v12  ;;  %v3125_v54 = vunpack.i.l.bf16 %v3124_v12 }
 0x14c   : > { %v1898_v57 = vsel %vm1879_vm5, %v1865_v6, %v3120_v58  ;;  %v1899_v43 = vsel %vm1879_vm5, %v1866_v40, %v3121_v45 }
 0x14d   : > { %v3129_v20 = vpop.permute.xlu1 %3128  ;;  %v1929_v48 = vsel %vm1912_vm6, %v1896_v24, %v3125_v54  ;;  %v1930_v60 = vsel %vm1912_vm6, %v1897_v31, %v3126_v53  ;;  %v2840_v53 = vunpack.i.l.bf16 %v4652_v14 }
 0x14e   : > { %v3134_v39 = vpop.permute.xlu0 %3133  ;;  %v3130_v47 = vunpack.i.l.bf16 %v3129_v20  ;;  %v3131_v44 = vunpack.i.h.bf16 %v3129_v20 }
 0x14f   : > { %v3136_v22 = vunpack.i.h.bf16 %v3134_v39  ;;  %v3135_v8 = vunpack.i.l.bf16 %v3134_v39  ;;  %v4649_v39 = vld [vmem:[#allocation4_spill] sm:$0xff] }
 0x150   : > { %v1931_v7 = vsel %vm1912_vm6, %v1898_v57, %v3130_v47  ;;  %v1932_v51 = vsel %vm1912_vm6, %v1899_v43, %v3131_v44  ;;  %v2756_v41 = vunpack.i.h.bf16 %v4649_v39  ;;  %v2755_v37 = vunpack.i.l.bf16 %v4649_v39 }
 0x151   : > { %v3139_v50 = vpop.permute.xlu1 %3138  ;;  %v1962_v18 = vsel %vm1945_vm7, %v1929_v48, %v3135_v8  ;;  %v1963_v0 = vsel %vm1945_vm7, %v1930_v60, %v3136_v22  ;;  %v3353_v22 = vld [vmem:[#allocation2 + $0xf0] sm:$0xff] }
 0x152   : > { %v3144_v55 = vpop.permute.xlu0 %3143  ;;  %v3140_v59 = vunpack.i.l.bf16 %v3139_v50  ;;  %v3141_v49 = vunpack.i.h.bf16 %v3139_v50  ;;  %v1802_v58 = vsel %vm379_vm0, %v3352_v16, %v2756_v41  ;;  %v1801_v8 = vsel %vm379_vm0, %v3353_v22, %v2755_v37 }
 0x153   : > { %v3146_v28 = vunpack.i.h.bf16 %v3144_v55  ;;  %v3145_v63 = vunpack.i.l.bf16 %v3144_v55  ;;  %v3354_v55 = vld [vmem:[#allocation2 + $0x110] sm:$0xff]  ;;  %v1834_v60 = vsel %vm1813_vm3, %v1801_v8, %v2835_v3  ;;  %v1835_v44 = vsel %vm1813_vm3, %v1802_v58, %v2836_v2 }
 0x154   : > { %v1964_v12 = vsel %vm1945_vm7, %v1931_v7, %v3140_v59  ;;  %v1965_v9 = vsel %vm1945_vm7, %v1932_v51, %v3141_v49  ;;  %v1804_v6 = vsel %vm379_vm0, %v3354_v55, %v2761_v19 }
 0x155   : > { %v3149_v56 = vpop.permute.xlu1 %3148  ;;  %v1995_v32 = vsel %vm1978_vm8, %v1962_v18, %v3145_v63  ;;  %v1996_v52 = vsel %vm1978_vm8, %v1963_v0, %v3146_v28  ;;  %v3355_v63 = vld [vmem:[#allocation2 + $0x108] sm:$0xff]  ;;  %v1837_v59 = vsel %vm1813_vm3, %v1804_v6, %v2841_v15 }
 0x156   : > { %v3154_v4 = vpop.permute.xlu0 %3153  ;;  %v3151_v17 = vunpack.i.h.bf16 %v3149_v56  ;;  %v3150_v33 = vunpack.i.l.bf16 %v3149_v56  ;;  %v1803_v48 = vsel %vm379_vm0, %v3355_v63, %v2760_v10 }
 0x157   : > { %v3156_v61 = vunpack.i.h.bf16 %v3154_v4  ;;  %v3155_v1 = vunpack.i.l.bf16 %v3154_v4  ;;  %v1836_v56 = vsel %vm1813_vm3, %v1803_v48, %v2840_v53 }
 0x158   : > { %v1997_v20 = vsel %vm1978_vm8, %v1964_v12, %v3150_v33  ;;  %v1998_v42 = vsel %vm1978_vm8, %v1965_v9, %v3151_v17 }
 0x159   : > { %v3159_v62 = vpop.permute.xlu1 %3158  ;;  %v2028_v46 = vsel %vm2011_vm9, %v1995_v32, %v3155_v1  ;;  %v2029_v11 = vsel %vm2011_vm9, %v1996_v52, %v3156_v61 }
 0x15a   : > { %v3161_v35 = vunpack.i.h.bf16 %v3159_v62  ;;  %v3160_v23 = vunpack.i.l.bf16 %v3159_v62  ;;  %v3164_v30 = vpop.permute.xlu0 %3163  ;;  %v2052_v13 = vpack.c.bf16 %v2029_v11, %v2028_v46 }
 0x15b   : > { %v3165_v54 = vunpack.i.l.bf16 %v3164_v30  ;;  %v3166_v40 = vunpack.i.h.bf16 %v3164_v30 }
 0x15c   : > { %v2030_v34 = vsel %vm2011_vm9, %v1997_v20, %v3160_v23  ;;  %v2031_v21 = vsel %vm2011_vm9, %v1998_v42, %v3161_v35  ;;  %2661 = vmatprep.mubr.msk.bf16.mxu1 %vm2080_vm10, %v2052_v13 }
 0x15d   : > { %v2053_v29 = vpack.c.bf16 %v2031_v21, %v2030_v34  ;;  %v3169_v25 = vpop.permute.xlu1 %3168  ;;  %v1867_v57 = vsel %vm1846_vm4, %v1834_v60, %v3165_v54  ;;  %v1868_v4 = vsel %vm1846_vm4, %v1835_v44, %v3166_v40  ;;  %v4655_v60 = vld [vmem:[#allocation13_spill] sm:$0xff] }
 0x15e   : > { %v3174_v38 = vpop.permute.xlu0 %3173  ;;  %v3171_v31 = vunpack.i.h.bf16 %v3169_v25  ;;  %v3170_v45 = vunpack.i.l.bf16 %v3169_v25  ;;  %v2846_v44 = vunpack.i.h.bf16 %v4655_v60 }
 0x15f   : > { %2662 = vmatmul.mubr.msk.bf16.vlgmr.msra.gmra.mrb[0].mxu1 %vm2080_vm10, %v2053_v29  ;;  %v3176_v47 = vunpack.i.h.bf16 %v3174_v38  ;;  %v3175_v28 = vunpack.i.l.bf16 %v3174_v38 }
 0x160   : > { %v1869_v43 = vsel %vm1846_vm4, %v1836_v56, %v3170_v45  ;;  %v1870_v7 = vsel %vm1846_vm4, %v1837_v59, %v3171_v31  ;;  %v2845_v59 = vunpack.i.l.bf16 %v4655_v60  ;;  %v4656_v56 = vld [vmem:[#allocation14_spill] sm:$0xff] }
 0x161   : > { %v4345_v5 = vpop.permute.xlu1 %3178  ;;  %v1900_v32 = vsel %vm1879_vm5, %v1867_v57, %v3175_v28  ;;  %v1901_v52 = vsel %vm1879_vm5, %v1868_v4, %v3176_v47  ;;  %v4654_v47 = vld [vmem:[#allocation7_spill] sm:$0xff]  ;;  %v2851_v57 = vunpack.i.h.bf16 %v4656_v56  ;;  %v3356_v4 = vld [vmem:[#allocation2 + $0x128] sm:$0xff] }
 0x162   : > { %v3184_v36 = vpop.permute.xlu0 %3183  ;;  %v3180_v17 = vunpack.i.l.bf16 %v4345_v5  ;;  %v3181_v51 = vunpack.i.h.bf16 %v4345_v5  ;;  %v2771_v28 = vunpack.i.h.bf16 %v4654_v47  ;;  %v2770_v48 = vunpack.i.l.bf16 %v4654_v47 }
 0x163   : > { %v3186_v18 = vunpack.i.h.bf16 %v3184_v36  ;;  %v3185_v0 = vunpack.i.l.bf16 %v3184_v36 }
 0x164   : > { %v1902_v13 = vsel %vm1879_vm5, %v1869_v43, %v3180_v17  ;;  %v1903_v39 = vsel %vm1879_vm5, %v1870_v7, %v3181_v51 }
 0x165   : > { %v3189_v50 = vpop.permute.xlu1 %3188  ;;  %v1933_v11 = vsel %vm1912_vm6, %v1900_v32, %v3185_v0  ;;  %v1934_v9 = vsel %vm1912_vm6, %v1901_v52, %v3186_v18  ;;  %v2850_v18 = vunpack.i.l.bf16 %v4656_v56 }
 0x166   : > { %v3194_v24 = vpop.permute.xlu0 %3193  ;;  %v3190_v12 = vunpack.i.l.bf16 %v3189_v50  ;;  %v3191_v35 = vunpack.i.h.bf16 %v3189_v50 }
 0x167   : > { %v3196_v33 = vunpack.i.h.bf16 %v3194_v24  ;;  %v3195_v61 = vunpack.i.l.bf16 %v3194_v24  ;;  %v4653_v24 = vld [vmem:[#allocation6_spill] sm:$0xff] }
 0x168   : > { %v1935_v41 = vsel %vm1912_vm6, %v1902_v13, %v3190_v12  ;;  %v1936_v19 = vsel %vm1912_vm6, %v1903_v39, %v3191_v35  ;;  %v2766_v31 = vunpack.i.h.bf16 %v4653_v24  ;;  %v2765_v45 = vunpack.i.l.bf16 %v4653_v24 }
 0x169   : > { %v3199_v49 = vpop.permute.xlu1 %3198  ;;  %v1966_v20 = vsel %vm1945_vm7, %v1933_v11, %v3195_v61  ;;  %v1967_v42 = vsel %vm1945_vm7, %v1934_v9, %v3196_v33  ;;  %v3357_v33 = vld [vmem:[#allocation2 + $0x120] sm:$0xff] }
 0x16a   : > { %v3204_v1 = vpop.permute.xlu0 %3203  ;;  %v3200_v23 = vunpack.i.l.bf16 %v3199_v49  ;;  %v3201_v34 = vunpack.i.h.bf16 %v3199_v49  ;;  %v1806_v17 = vsel %vm379_vm0, %v3356_v4, %v2766_v31  ;;  %v1805_v61 = vsel %vm379_vm0, %v3357_v33, %v2765_v45 }
 0x16b   : > { %v3206_v62 = vunpack.i.h.bf16 %v3204_v1  ;;  %v3205_v46 = vunpack.i.l.bf16 %v3204_v1  ;;  %v3358_v1 = vld [vmem:[#allocation2 + $0x140] sm:$0xff]  ;;  %v1838_v9 = vsel %vm1813_vm3, %v1805_v61, %v2845_v59  ;;  %v1839_v35 = vsel %vm1813_vm3, %v1806_v17, %v2846_v44 }
 0x16c   : > { %v1968_v36 = vsel %vm1945_vm7, %v1935_v41, %v3200_v23  ;;  %v1969_v3 = vsel %vm1945_vm7, %v1936_v19, %v3201_v34  ;;  %v1808_v43 = vsel %vm379_vm0, %v3358_v1, %v2771_v28 }
 0x16d   : > { %v3209_v30 = vpop.permute.xlu1 %3208  ;;  %v1999_v37 = vsel %vm1978_vm8, %v1966_v20, %v3205_v46  ;;  %v2000_v26 = vsel %vm1978_vm8, %v1967_v42, %v3206_v62  ;;  %v3359_v46 = vld [vmem:[#allocation2 + $0x138] sm:$0xff]  ;;  %v1841_v23 = vsel %vm1813_vm3, %v1808_v43, %v2851_v57 }
 0x16e   : > { %v3214_v21 = vpop.permute.xlu0 %3213  ;;  %v3211_v29 = vunpack.i.h.bf16 %v3209_v30  ;;  %v3210_v25 = vunpack.i.l.bf16 %v3209_v30  ;;  %v1807_v11 = vsel %vm379_vm0, %v3359_v46, %v2770_v48 }
 0x16f   : > { %v3216_v38 = vunpack.i.h.bf16 %v3214_v21  ;;  %v3215_v5 = vunpack.i.l.bf16 %v3214_v21  ;;  %v1840_v30 = vsel %vm1813_vm3, %v1807_v11, %v2850_v18 }
 0x170   : > { %v2001_v50 = vsel %vm1978_vm8, %v1968_v36, %v3210_v25  ;;  %v2002_v16 = vsel %vm1978_vm8, %v1969_v3, %v3211_v29 }
 0x171   : > { %v2032_v10 = vsel %vm2011_vm9, %v1999_v37, %v3215_v5  ;;  %v2033_v27 = vsel %vm2011_vm9, %v2000_v26, %v3216_v38  ;;  %v3219_v2 = vpop.permute.xlu1 %3218 }
 0x172   : > { %v2054_v14 = vpack.c.bf16 %v2033_v27, %v2032_v10  ;;  %v3221_v15 = vunpack.i.h.bf16 %v3219_v2  ;;  %v3220_v53 = vunpack.i.l.bf16 %v3219_v2  ;;  %v3224_v54 = vpop.permute.xlu0 %3223 }
 0x173   : > { %v3225_v0 = vunpack.i.l.bf16 %v3224_v54  ;;  %v3226_v7 = vunpack.i.h.bf16 %v3224_v54 }
 0x174   : > { %v2034_v58 = vsel %vm2011_vm9, %v2001_v50, %v3220_v53  ;;  %v2035_v22 = vsel %vm2011_vm9, %v2002_v16, %v3221_v15  ;;  %2665 = vmatprep.mubr.msk.bf16.mxu1 %vm2080_vm10, %v2054_v14 }
 0x175   : > { %v2055_v8 = vpack.c.bf16 %v2035_v22, %v2034_v58  ;;  %v3229_v55 = vpop.permute.xlu1 %3228  ;;  %v1871_v13 = vsel %vm1846_vm4, %v1838_v9, %v3225_v0  ;;  %v1872_v21 = vsel %vm1846_vm4, %v1839_v35, %v3226_v7 }
 0x176   : > { %v3234_v6 = vpop.permute.xlu0 %3233  ;;  %v3231_v52 = vunpack.i.h.bf16 %v3229_v55  ;;  %v3230_v51 = vunpack.i.l.bf16 %v3229_v55 }
 0x177   : > { %2666 = vmatmul.mubr.msk.bf16.gmra.mrb[4].mxu1 %vm2080_vm10, %v2055_v8  ;;  %v3236_v12 = vunpack.i.h.bf16 %v3234_v6  ;;  %v3235_v62 = vunpack.i.l.bf16 %v3234_v6 }
 0x178   : > { %v1873_v39 = vsel %vm1846_vm4, %v1840_v30, %v3230_v51  ;;  %v1874_v41 = vsel %vm1846_vm4, %v1841_v23, %v3231_v52  ;;  %v4657_v23 = vld [vmem:[#allocation15_spill] sm:$0xff] }
 0x179   : > { %v4391_v40 = vpop.permute.xlu1 %3238  ;;  %v1904_v37 = vsel %vm1879_vm5, %v1871_v13, %v3235_v62  ;;  %v1905_v26 = vsel %vm1879_vm5, %v1872_v21, %v3236_v12 }
 0x17a   : > { %v3244_v63 = vpop.permute.xlu0 %3243  ;;  %v3240_v29 = vunpack.i.l.bf16 %v4391_v40  ;;  %v3241_v19 = vunpack.i.h.bf16 %v4391_v40 }
 0x17b   : > { %v3246_v20 = vunpack.i.h.bf16 %v3244_v63  ;;  %v3245_v42 = vunpack.i.l.bf16 %v3244_v63 }
 0x17c   : > { %v1906_v54 = vsel %vm1879_vm5, %v1873_v39, %v3240_v29  ;;  %v1907_v24 = vsel %vm1879_vm5, %v1874_v41, %v3241_v19  ;;  %v4659_v39 = vld [vmem:[#allocation18_spill] sm:$0xff] }
 0x17d   : > { %v3249_v49 = vpop.permute.xlu1 %3248  ;;  %v1937_v2 = vsel %vm1912_vm6, %v1904_v37, %v3245_v42  ;;  %v1938_v3 = vsel %vm1912_vm6, %v1905_v26, %v3246_v20  ;;  %v4660_v37 = vld [vmem:[#allocation17_spill] sm:$0xff] }
 0x17e   : > { %v3254_v32 = vpop.permute.xlu0 %3253  ;;  %v3250_v36 = vunpack.i.l.bf16 %v3249_v49  ;;  %v3251_v14 = vunpack.i.h.bf16 %v3249_v49 }
 0x17f   : > { %v3256_v25 = vunpack.i.h.bf16 %v3254_v32  ;;  %v3255_v38 = vunpack.i.l.bf16 %v3254_v32 }
 0x180   : > { %v1939_v31 = vsel %vm1912_vm6, %v1906_v54, %v3250_v36  ;;  %v1940_v28 = vsel %vm1912_vm6, %v1907_v24, %v3251_v14 }
 0x181   : > { %v3259_v34 = vpop.permute.xlu1 %3258  ;;  %v1970_v50 = vsel %vm1945_vm7, %v1937_v2, %v3255_v38  ;;  %v1971_v16 = vsel %vm1945_vm7, %v1938_v3, %v3256_v25 }
 0x182   : > { %v3264_v5 = vpop.permute.xlu0 %3263  ;;  %v3260_v15 = vunpack.i.l.bf16 %v3259_v34  ;;  %v3261_v58 = vunpack.i.h.bf16 %v3259_v34  ;;  %v4658_v34 = vld [vmem:[#allocation16_spill] sm:$0xff] }
 0x183   : > { %v3266_v10 = vunpack.i.h.bf16 %v3264_v5  ;;  %v3265_v27 = vunpack.i.l.bf16 %v3264_v5 }
 0x184   : > { %v1972_v63 = vsel %vm1945_vm7, %v1939_v31, %v3260_v15  ;;  %v1973_v59 = vsel %vm1945_vm7, %v1940_v28, %v3261_v58 }
 0x185   : > { %v3269_v53 = vpop.permute.xlu1 %3268  ;;  %v2003_v45 = vsel %vm1978_vm8, %v1970_v50, %v3265_v27  ;;  %v2004_v47 = vsel %vm1978_vm8, %v1971_v16, %v3266_v10 }
 0x186   : > { %v3274_v22 = vpop.permute.xlu0 %3273  ;;  %v3271_v8 = vunpack.i.h.bf16 %v3269_v53  ;;  %v3270_v55 = vunpack.i.l.bf16 %v3269_v53 }
 0x187   : > { %v3276_v6 = vunpack.i.h.bf16 %v3274_v22  ;;  %v3275_v40 = vunpack.i.l.bf16 %v3274_v22 }
 0x188   : > { %v2005_v49 = vsel %vm1978_vm8, %v1972_v63, %v3270_v55  ;;  %v2006_v4 = vsel %vm1978_vm8, %v1973_v59, %v3271_v8 }
 0x189   : > { %v2036_v48 = vsel %vm2011_vm9, %v2003_v45, %v3275_v40  ;;  %v2037_v60 = vsel %vm2011_vm9, %v2004_v47, %v3276_v6  ;;  %v3279_v44 = vpop.permute.xlu1 %3278 }
 0x18a   : > { %v2056_v56 = vpack.c.bf16 %v2037_v60, %v2036_v48  ;;  %v3281_v57 = vunpack.i.h.bf16 %v3279_v44  ;;  %v3280_v18 = vunpack.i.l.bf16 %v3279_v44  ;;  %v3284_v0 = vpop.permute.xlu0 %3283 }
 0x18b   : > { %v3285_v52 = vunpack.i.l.bf16 %v3284_v0  ;;  %v3286_v12 = vunpack.i.h.bf16 %v3284_v0 }
 0x18c   : > { %v2038_v17 = vsel %vm2011_vm9, %v2005_v49, %v3280_v18  ;;  %v2039_v33 = vsel %vm2011_vm9, %v2006_v4, %v3281_v57  ;;  %2669 = vmatprep.mubr.msk.bf16.mxu1 %vm2080_vm10, %v2056_v56 }
 0x18d   : > { %v2057_v61 = vpack.c.bf16 %v2039_v33, %v2038_v17  ;;  %v3289_v1 = vpop.permute.xlu1 %3288  ;;  %v1875_v30 = vsel %vm1846_vm4, %v4657_v23, %v3285_v52  ;;  %v1876_v21 = vsel %vm1846_vm4, %v4658_v34, %v3286_v12 }
 0x18e   : > { %v3294_v43 = vpop.permute.xlu0 %3293  ;;  %v3291_v46 = vunpack.i.h.bf16 %v3289_v1  ;;  %v3290_v11 = vunpack.i.l.bf16 %v3289_v1 }
 0x18f   : > { %2670 = vmatmul.mubr.msk.bf16.gmra.mrb[8].mxu1 %vm2080_vm10, %v2057_v61  ;;  %v3296_v9 = vunpack.i.h.bf16 %v3294_v43  ;;  %v3295_v35 = vunpack.i.l.bf16 %v3294_v43 }
 0x190   : > { %v1877_v41 = vsel %vm1846_vm4, %v4659_v39, %v3290_v11  ;;  %v1878_v26 = vsel %vm1846_vm4, %v4660_v37, %v3291_v46 }
 0x191   : > { %v3299_v7 = vpop.permute.xlu1 %3298  ;;  %v1908_v19 = vsel %vm1879_vm5, %v1875_v30, %v3295_v35  ;;  %v1909_v36 = vsel %vm1879_vm5, %v1876_v21, %v3296_v9 }
 0x192   : > { %v3304_v32 = vpop.permute.xlu0 %3303  ;;  %v3300_v29 = vunpack.i.l.bf16 %v3299_v7  ;;  %v3301_v10 = vunpack.i.h.bf16 %v3299_v7 }
 0x193   : > { %v3306_v13 = vunpack.i.h.bf16 %v3304_v32  ;;  %v3305_v20 = vunpack.i.l.bf16 %v3304_v32 }
 0x194   : > { %v1910_v16 = vsel %vm1879_vm5, %v1877_v41, %v3300_v29  ;;  %v1911_v45 = vsel %vm1879_vm5, %v1878_v26, %v3301_v10 }
 0x195   : > { %v3309_v51 = vpop.permute.xlu1 %3308  ;;  %v1941_v14 = vsel %vm1912_vm6, %v1908_v19, %v3305_v20  ;;  %v1942_v15 = vsel %vm1912_vm6, %v1909_v36, %v3306_v13 }
 0x196   : > { %v3314_v62 = vpop.permute.xlu0 %3313  ;;  %v3310_v27 = vunpack.i.l.bf16 %v3309_v51  ;;  %v3311_v53 = vunpack.i.h.bf16 %v3309_v51 }
 0x197   : > { %v3316_v25 = vunpack.i.h.bf16 %v3314_v62  ;;  %v3315_v38 = vunpack.i.l.bf16 %v3314_v62 }
 0x198   : > { %v1943_v47 = vsel %vm1912_vm6, %v1910_v16, %v3310_v27  ;;  %v1944_v48 = vsel %vm1912_vm6, %v1911_v45, %v3311_v53 }
 0x199   : > { %v3319_v42 = vpop.permute.xlu1 %3318  ;;  %v1974_v58 = vsel %vm1945_vm7, %v1941_v14, %v3315_v38  ;;  %v1975_v22 = vsel %vm1945_vm7, %v1942_v15, %v3316_v25 }
 0x19a   : > { %v3324_v5 = vpop.permute.xlu0 %3323  ;;  %v3320_v54 = vunpack.i.l.bf16 %v3319_v42  ;;  %v3321_v8 = vunpack.i.h.bf16 %v3319_v42 }
 0x19b   : > { %v3326_v2 = vunpack.i.h.bf16 %v3324_v5  ;;  %v3325_v3 = vunpack.i.l.bf16 %v3324_v5 }
 0x19c   : > { %v1976_v60 = vsel %vm1945_vm7, %v1943_v47, %v3320_v54  ;;  %v1977_v57 = vsel %vm1945_vm7, %v1944_v48, %v3321_v8 }
 0x19d   : > { %v3329_v50 = vpop.permute.xlu1 %3328  ;;  %v2007_v28 = vsel %vm1978_vm8, %v1974_v58, %v3325_v3  ;;  %v2008_v63 = vsel %vm1978_vm8, %v1975_v22, %v3326_v2 }
 0x19e   : > { %v3334_v55 = vpop.permute.xlu0 %3333  ;;  %v3331_v6 = vunpack.i.h.bf16 %v3329_v50  ;;  %v3330_v40 = vunpack.i.l.bf16 %v3329_v50 }
 0x19f   : > { %v3336_v24 = vunpack.i.h.bf16 %v3334_v55  ;;  %v3335_v31 = vunpack.i.l.bf16 %v3334_v55 }
 0x1a0   : > { %v2009_v4 = vsel %vm1978_vm8, %v1976_v60, %v3330_v40  ;;  %v2010_v17 = vsel %vm1978_vm8, %v1977_v57, %v3331_v6 }
 0x1a1   : > { %v2040_v44 = vsel %vm2011_vm9, %v2007_v28, %v3335_v31  ;;  %v2041_v59 = vsel %vm2011_vm9, %v2008_v63, %v3336_v24  ;;  %v3339_v56 = vpop.permute.xlu1 %3338 }
 0x1a2   : > { %v2058_v18 = vpack.c.bf16 %v2041_v59, %v2040_v44  ;;  %v3341_v0 = vunpack.i.h.bf16 %v3339_v56  ;;  %v3340_v49 = vunpack.i.l.bf16 %v3339_v56 }
 0x1a4   : > { %v2042_v33 = vsel %vm2011_vm9, %v2009_v4, %v3340_v49  ;;  %v2043_v61 = vsel %vm2011_vm9, %v2010_v17, %v3341_v0  ;;  %2673 = vmatprep.mubr.msk.bf16.mxu1 %vm2080_vm10, %v2058_v18 }
 0x1a5   : > { %v2059_v1 = vpack.c.bf16 %v2043_v61, %v2042_v33 }
 0x1a7   : > { %2674 = vmatmul.mubr.msk.bf16.gmra.mrb[12].mxu1 %vm2080_vm10, %v2059_v1 }
 0x1db   : > { %v2647_v43 = vpop.f32.mrb[0].mxu0 }
 0x1dc   : > { %2296 = vst.msk [vmem:[%s4472_s23 + $0x10] sm:$0xff] %vm379_vm0, %v2647_v43  ;;  %v2167_v7 = vpop.f32.mrb[1].mxu0  ;;  %v2397_v12 = vmul.f32 %v2647_v43, %v2647_v43  ;;  %v2329_v35 = vsel %vm379_vm0, %v2647_v43, 0.0 }
 0x1dd   : > { %2294 = vst.msk [vmem:[%s4472_s23] sm:$0xff] %vm379_vm0, %v2167_v7  ;;  %v2395_v32 = vmul.f32 %v2167_v7, %v2167_v7  ;;  %v2648_v52 = vpop.f32.mrb[2].mxu0  ;;  %v2326_v62 = vsel %vm379_vm0, %v2167_v7, 0.0 }
 0x1de   : > { %2297 = vst.msk [vmem:[%s4472_s23 + $0x18] sm:$0xff] %vm379_vm0, %v2648_v52  ;;  %v2170_v51 = vpop.f32.mrb[3].mxu0  ;;  %v2398_v30 = vmul.f32 %v2648_v52, %v2648_v52  ;;  %v2430_v34 = vsel %vm379_vm0, %v2397_v12, 0.0  ;;  %v2331_v21 = vsel %vm379_vm0, %v2648_v52, 0.0 }
 0x1df   : > { %2295 = vst.msk [vmem:[%s4472_s23 + $0x8] sm:$0xff] %vm379_vm0, %v2170_v51  ;;  %v2327_v46 = vsel %vm379_vm0, %v2170_v51, 0.0  ;;  %v2396_v11 = vmul.f32 %v2170_v51, %v2170_v51  ;;  %v2427_v23 = vsel %vm379_vm0, %v2395_v32, 0.0 }
 0x1e0   : > { %v2328_v9 = vadd.f32 %v2327_v46, %v2326_v62  ;;  %v2432_v38 = vsel %vm379_vm0, %v2398_v30, 0.0 }
 0x1e1   : > { %v2428_v13 = vsel %vm379_vm0, %v2396_v11, 0.0 }
 0x1e2   : > { %v2330_v20 = vadd.f32 %v2329_v35, %v2328_v9  ;;  %v2429_v42 = vadd.f32 %v2428_v13, %v2427_v23 }
 0x1e4   : > { %v2431_v29 = vadd.f32 %v2430_v34, %v2429_v42  ;;  %v2332_v25 = vadd.f32 %v2331_v21, %v2330_v20 }
 0x1e6   : > { %v2433_v5 = vadd.f32 %v2432_v38, %v2431_v29 }
 0x1ef   : > { %v2651_v39 = vpop.f32.mrb[4].mxu0 }
 0x1f0   : > { %2300 = vst.msk [vmem:[%s4472_s23 + $0x30] sm:$0xff] %vm379_vm0, %v2651_v39  ;;  %v2183_v41 = vpop.f32.mrb[5].mxu0  ;;  %v2401_v27 = vmul.f32 %v2651_v39, %v2651_v39  ;;  %v2337_v54 = vsel %vm379_vm0, %v2651_v39, 0.0 }
 0x1f1   : > { %2298 = vst.msk [vmem:[%s4472_s23 + $0x20] sm:$0xff] %vm379_vm0, %v2183_v41  ;;  %v2333_v37 = vsel %vm379_vm0, %v2183_v41, 0.0  ;;  %v2399_v26 = vmul.f32 %v2183_v41, %v2183_v41  ;;  %v2652_v19 = vpop.f32.mrb[6].mxu0 }
 0x1f2   : > { %v2334_v36 = vadd.f32 %v2333_v37, %v2332_v25  ;;  %2301 = vst.msk [vmem:[%s4472_s23 + $0x38] sm:$0xff] %vm379_vm0, %v2652_v19  ;;  %v2186_v10 = vpop.f32.mrb[7].mxu0  ;;  %v2402_v50 = vmul.f32 %v2652_v19, %v2652_v19  ;;  %v2438_v8 = vsel %vm379_vm0, %v2401_v27, 0.0  ;;  %v2339_v55 = vsel %vm379_vm0, %v2652_v19, 0.0 }
 0x1f3   : > { %v2434_v2 = vsel %vm379_vm0, %v2399_v26, 0.0  ;;  %2299 = vst.msk [vmem:[%s4472_s23 + $0x28] sm:$0xff] %vm379_vm0, %v2186_v10  ;;  %v2335_v3 = vsel %vm379_vm0, %v2186_v10, 0.0  ;;  %v2400_v14 = vmul.f32 %v2186_v10, %v2186_v10 }
 0x1f4   : > { %v2435_v15 = vadd.f32 %v2434_v2, %v2433_v5  ;;  %v2336_v53 = vadd.f32 %v2335_v3, %v2334_v36  ;;  %v2440_v24 = vsel %vm379_vm0, %v2402_v50, 0.0 }
 0x1f5   : > { %v2436_v16 = vsel %vm379_vm0, %v2400_v14, 0.0 }
 0x1f6   : > { %v2338_v58 = vadd.f32 %v2337_v54, %v2336_v53  ;;  %v2437_v22 = vadd.f32 %v2436_v16, %v2435_v15 }
 0x1f8   : > { %v2439_v6 = vadd.f32 %v2438_v8, %v2437_v22  ;;  %v2340_v40 = vadd.f32 %v2339_v55, %v2338_v58 }
 0x1fa   : > { %v2441_v31 = vadd.f32 %v2440_v24, %v2439_v6 }
 0x203   : > { %v2655_v45 = vpop.f32.mrb[8].mxu0 }
 0x204   : > { %2304 = vst.msk [vmem:[%s4472_s23 + $0x50] sm:$0xff] %vm379_vm0, %v2655_v45  ;;  %v2199_v47 = vpop.f32.mrb[9].mxu0  ;;  %v2405_v59 = vmul.f32 %v2655_v45, %v2655_v45  ;;  %v2345_v4 = vsel %vm379_vm0, %v2655_v45, 0.0 }
 0x205   : > { %2302 = vst.msk [vmem:[%s4472_s23 + $0x40] sm:$0xff] %vm379_vm0, %v2199_v47  ;;  %v2341_v28 = vsel %vm379_vm0, %v2199_v47, 0.0  ;;  %v2403_v63 = vmul.f32 %v2199_v47, %v2199_v47  ;;  %v2656_v48 = vpop.f32.mrb[10].mxu0 }
 0x206   : > { %v2342_v60 = vadd.f32 %v2341_v28, %v2340_v40  ;;  %2305 = vst.msk [vmem:[%s4472_s23 + $0x58] sm:$0xff] %vm379_vm0, %v2656_v48  ;;  %v2202_v44 = vpop.f32.mrb[11].mxu0  ;;  %v2406_v17 = vmul.f32 %v2656_v48, %v2656_v48  ;;  %v2446_v43 = vsel %vm379_vm0, %v2405_v59, 0.0  ;;  %v2347_v7 = vsel %vm379_vm0, %v2656_v48, 0.0 }
 0x207   : > { %v2442_v56 = vsel %vm379_vm0, %v2403_v63, 0.0  ;;  %2303 = vst.msk [vmem:[%s4472_s23 + $0x48] sm:$0xff] %vm379_vm0, %v2202_v44  ;;  %v2343_v57 = vsel %vm379_vm0, %v2202_v44, 0.0  ;;  %v2404_v18 = vmul.f32 %v2202_v44, %v2202_v44 }
 0x208   : > { %v2443_v0 = vadd.f32 %v2442_v56, %v2441_v31  ;;  %v2344_v49 = vadd.f32 %v2343_v57, %v2342_v60  ;;  %v2448_v51 = vsel %vm379_vm0, %v2406_v17, 0.0 }
 0x209   : > { %v2444_v33 = vsel %vm379_vm0, %v2404_v18, 0.0 }
 0x20a   : > { %v2346_v61 = vadd.f32 %v2345_v4, %v2344_v49  ;;  %v2445_v1 = vadd.f32 %v2444_v33, %v2443_v0 }
 0x20c   : > { %v2447_v32 = vadd.f32 %v2446_v43, %v2445_v1  ;;  %v2348_v52 = vadd.f32 %v2347_v7, %v2346_v61 }
 0x20e   : > { %v2449_v12 = vadd.f32 %v2448_v51, %v2447_v32 }
 0x21a   : > { %v2659_v62 = vpop.f32.mrb[12].mxu0 }
 0x21b   : > { %2308 = vst.msk [vmem:[%s4472_s23 + $0x70] sm:$0xff] %vm379_vm0, %v2659_v62  ;;  %v2215_v46 = vpop.f32.mrb[13].mxu0  ;;  %v2409_v13 = vmul.f32 %v2659_v62, %v2659_v62  ;;  %v2353_v25 = vsel %vm379_vm0, %v2659_v62, 0.0 }
 0x21c   : > { %2306 = vst.msk [vmem:[%s4472_s23 + $0x60] sm:$0xff] %vm379_vm0, %v2215_v46  ;;  %v2349_v11 = vsel %vm379_vm0, %v2215_v46, 0.0  ;;  %v2407_v9 = vmul.f32 %v2215_v46, %v2215_v46  ;;  %v2660_v35 = vpop.f32.mrb[14].mxu0 }
 0x21d   : > { %v2350_v23 = vadd.f32 %v2349_v11, %v2348_v52  ;;  %2309 = vst.msk [vmem:[%s4472_s23 + $0x78] sm:$0xff] %vm379_vm0, %v2660_v35  ;;  %v2218_v30 = vpop.f32.mrb[15].mxu0  ;;  %v2410_v38 = vmul.f32 %v2660_v35, %v2660_v35  ;;  %v2454_v37 = vsel %vm379_vm0, %v2409_v13, 0.0  ;;  %v2355_v26 = vsel %vm379_vm0, %v2660_v35, 0.0 }
 0x21e   : > { %v2450_v20 = vsel %vm379_vm0, %v2407_v9, 0.0  ;;  %2307 = vst.msk [vmem:[%s4472_s23 + $0x68] sm:$0xff] %vm379_vm0, %v2218_v30  ;;  %v2351_v42 = vsel %vm379_vm0, %v2218_v30, 0.0  ;;  %v2408_v34 = vmul.f32 %v2218_v30, %v2218_v30 }
 0x21f   : > { %v2451_v21 = vadd.f32 %v2450_v20, %v2449_v12  ;;  %v2352_v29 = vadd.f32 %v2351_v42, %v2350_v23  ;;  %v2456_v10 = vsel %vm379_vm0, %v2410_v38, 0.0 }
 0x220   : > { %v2452_v5 = vsel %vm379_vm0, %v2408_v34, 0.0 }
 0x221   : > { %v2354_v39 = vadd.f32 %v2353_v25, %v2352_v29  ;;  %v2453_v41 = vadd.f32 %v2452_v5, %v2451_v21 }
 0x223   : > { %v2455_v19 = vadd.f32 %v2454_v37, %v2453_v41  ;;  %v2356_v36 = vadd.f32 %v2355_v26, %v2354_v39 }
 0x225   : > { %v2457_v27 = vadd.f32 %v2456_v10, %v2455_v19 }
 0x232   : > { %v2663_v2 = vpop.f32.mrb[0].mxu1 }
 0x233   : > { %2312 = vst.msk [vmem:[%s4472_s23 + $0x90] sm:$0xff] %vm379_vm0, %v2663_v2  ;;  %v2231_v3 = vpop.f32.mrb[1].mxu1  ;;  %v2413_v16 = vmul.f32 %v2663_v2, %v2663_v2  ;;  %v2361_v40 = vsel %vm379_vm0, %v2663_v2, 0.0 }
 0x234   : > { %2310 = vst.msk [vmem:[%s4472_s23 + $0x80] sm:$0xff] %vm379_vm0, %v2231_v3  ;;  %v2357_v14 = vsel %vm379_vm0, %v2231_v3, 0.0  ;;  %v2411_v15 = vmul.f32 %v2231_v3, %v2231_v3  ;;  %v2664_v53 = vpop.f32.mrb[2].mxu1 }
 0x235   : > { %v2358_v54 = vadd.f32 %v2357_v14, %v2356_v36  ;;  %2313 = vst.msk [vmem:[%s4472_s23 + $0x98] sm:$0xff] %vm379_vm0, %v2664_v53  ;;  %v2234_v50 = vpop.f32.mrb[3].mxu1  ;;  %v2414_v24 = vmul.f32 %v2664_v53, %v2664_v53  ;;  %v2462_v28 = vsel %vm379_vm0, %v2413_v16, 0.0  ;;  %v2363_v63 = vsel %vm379_vm0, %v2664_v53, 0.0 }
 0x236   : > { %v2458_v58 = vsel %vm379_vm0, %v2411_v15, 0.0  ;;  %2311 = vst.msk [vmem:[%s4472_s23 + $0x88] sm:$0xff] %vm379_vm0, %v2234_v50  ;;  %v2359_v22 = vsel %vm379_vm0, %v2234_v50, 0.0  ;;  %v2412_v8 = vmul.f32 %v2234_v50, %v2234_v50 }
 0x237   : > { %v2459_v55 = vadd.f32 %v2458_v58, %v2457_v27  ;;  %v2360_v6 = vadd.f32 %v2359_v22, %v2358_v54  ;;  %v2464_v44 = vsel %vm379_vm0, %v2414_v24, 0.0 }
 0x238   : > { %v2460_v31 = vsel %vm379_vm0, %v2412_v8, 0.0 }
 0x239   : > { %v2362_v45 = vadd.f32 %v2361_v40, %v2360_v6  ;;  %v2461_v47 = vadd.f32 %v2460_v31, %v2459_v55 }
 0x23b   : > { %v2463_v48 = vadd.f32 %v2462_v28, %v2461_v47  ;;  %v2364_v60 = vadd.f32 %v2363_v63, %v2362_v45 }
 0x23d   : > { %v2465_v59 = vadd.f32 %v2464_v44, %v2463_v48 }
 0x24a   : > { %v2667_v56 = vpop.f32.mrb[4].mxu1 }
 0x24b   : > { %2316 = vst.msk [vmem:[%s4472_s23 + $0xb0] sm:$0xff] %vm379_vm0, %v2667_v56  ;;  %v2247_v57 = vpop.f32.mrb[5].mxu1  ;;  %v2417_v33 = vmul.f32 %v2667_v56, %v2667_v56  ;;  %v2369_v52 = vsel %vm379_vm0, %v2667_v56, 0.0 }
 0x24c   : > { %2314 = vst.msk [vmem:[%s4472_s23 + $0xa0] sm:$0xff] %vm379_vm0, %v2247_v57  ;;  %v2365_v18 = vsel %vm379_vm0, %v2247_v57, 0.0  ;;  %v2415_v0 = vmul.f32 %v2247_v57, %v2247_v57  ;;  %v2668_v49 = vpop.f32.mrb[6].mxu1 }
 0x24d   : > { %v2366_v4 = vadd.f32 %v2365_v18, %v2364_v60  ;;  %2317 = vst.msk [vmem:[%s4472_s23 + $0xb8] sm:$0xff] %vm379_vm0, %v2668_v49  ;;  %v2250_v17 = vpop.f32.mrb[7].mxu1  ;;  %v2418_v51 = vmul.f32 %v2668_v49, %v2668_v49  ;;  %v2470_v11 = vsel %vm379_vm0, %v2417_v33, 0.0  ;;  %v2371_v9 = vsel %vm379_vm0, %v2668_v49, 0.0 }
 0x24e   : > { %v2466_v61 = vsel %vm379_vm0, %v2415_v0, 0.0  ;;  %2315 = vst.msk [vmem:[%s4472_s23 + $0xa8] sm:$0xff] %vm379_vm0, %v2250_v17  ;;  %v2367_v1 = vsel %vm379_vm0, %v2250_v17, 0.0  ;;  %v2416_v43 = vmul.f32 %v2250_v17, %v2250_v17 }
 0x24f   : > { %v2467_v7 = vadd.f32 %v2466_v61, %v2465_v59  ;;  %v2368_v32 = vadd.f32 %v2367_v1, %v2366_v4  ;;  %v2472_v30 = vsel %vm379_vm0, %v2418_v51, 0.0 }
 0x250   : > { %v2468_v12 = vsel %vm379_vm0, %v2416_v43, 0.0 }
 0x251   : > { %v2370_v62 = vadd.f32 %v2369_v52, %v2368_v32  ;;  %v2469_v46 = vadd.f32 %v2468_v12, %v2467_v7 }
 0x253   : > { %v2471_v35 = vadd.f32 %v2470_v11, %v2469_v46  ;;  %v2372_v23 = vadd.f32 %v2371_v9, %v2370_v62 }
 0x255   : > { %v2473_v13 = vadd.f32 %v2472_v30, %v2471_v35 }
 0x262   : > { %v2671_v20 = vpop.f32.mrb[8].mxu1 }
 0x263   : > { %2320 = vst.msk [vmem:[%s4472_s23 + $0xd0] sm:$0xff] %vm379_vm0, %v2671_v20  ;;  %v2263_v42 = vpop.f32.mrb[9].mxu1  ;;  %v2421_v5 = vmul.f32 %v2671_v20, %v2671_v20  ;;  %v2377_v36 = vsel %vm379_vm0, %v2671_v20, 0.0 }
 0x264   : > { %2318 = vst.msk [vmem:[%s4472_s23 + $0xc0] sm:$0xff] %vm379_vm0, %v2263_v42  ;;  %v2373_v34 = vsel %vm379_vm0, %v2263_v42, 0.0  ;;  %v2419_v21 = vmul.f32 %v2263_v42, %v2263_v42  ;;  %v2672_v29 = vpop.f32.mrb[10].mxu1 }
 0x265   : > { %v2374_v25 = vadd.f32 %v2373_v34, %v2372_v23  ;;  %2321 = vst.msk [vmem:[%s4472_s23 + $0xd8] sm:$0xff] %vm379_vm0, %v2672_v29  ;;  %v2266_v38 = vpop.f32.mrb[11].mxu1  ;;  %v2422_v10 = vmul.f32 %v2672_v29, %v2672_v29  ;;  %v2478_v14 = vsel %vm379_vm0, %v2421_v5, 0.0  ;;  %v2379_v15 = vsel %vm379_vm0, %v2672_v29, 0.0 }
 0x266   : > { %v2474_v39 = vsel %vm379_vm0, %v2419_v21, 0.0  ;;  %2319 = vst.msk [vmem:[%s4472_s23 + $0xc8] sm:$0xff] %vm379_vm0, %v2266_v38  ;;  %v2375_v41 = vsel %vm379_vm0, %v2266_v38, 0.0  ;;  %v2420_v37 = vmul.f32 %v2266_v38, %v2266_v38 }
 0x267   : > { %v2475_v26 = vadd.f32 %v2474_v39, %v2473_v13  ;;  %v2376_v19 = vadd.f32 %v2375_v41, %v2374_v25  ;;  %v2480_v50 = vsel %vm379_vm0, %v2422_v10, 0.0 }
 0x268   : > { %v2476_v27 = vsel %vm379_vm0, %v2420_v37, 0.0 }
 0x269   : > { %v2378_v2 = vadd.f32 %v2377_v36, %v2376_v19  ;;  %v2477_v3 = vadd.f32 %v2476_v27, %v2475_v26 }
 0x26b   : > { %v2479_v53 = vadd.f32 %v2478_v14, %v2477_v3  ;;  %v2380_v54 = vadd.f32 %v2379_v15, %v2378_v2 }
 0x26d   : > { %v2481_v16 = vadd.f32 %v2480_v50, %v2479_v53 }
 0x27a   : > { %v2675_v58 = vpop.f32.mrb[12].mxu1 }
 0x27b   : > { %2324 = vst.msk [vmem:[%s4472_s23 + $0xf0] sm:$0xff] %vm379_vm0, %v2675_v58  ;;  %v2279_v22 = vpop.f32.mrb[13].mxu1  ;;  %v2425_v31 = vmul.f32 %v2675_v58, %v2675_v58  ;;  %v2385_v60 = vsel %vm379_vm0, %v2675_v58, 0.0 }
 0x27c   : > { %2322 = vst.msk [vmem:[%s4472_s23 + $0xe0] sm:$0xff] %vm379_vm0, %v2279_v22  ;;  %v2381_v8 = vsel %vm379_vm0, %v2279_v22, 0.0  ;;  %v2423_v55 = vmul.f32 %v2279_v22, %v2279_v22  ;;  %v2676_v6 = vpop.f32.mrb[14].mxu1 }
 0x27d   : > { %v2382_v40 = vadd.f32 %v2381_v8, %v2380_v54  ;;  %2325 = vst.msk [vmem:[%s4472_s23 + $0xf8] sm:$0xff] %vm379_vm0, %v2676_v6  ;;  %v2282_v24 = vpop.f32.mrb[15].mxu1  ;;  %v2426_v44 = vmul.f32 %v2676_v6, %v2676_v6  ;;  %v2486_v18 = vsel %vm379_vm0, %v2425_v31, 0.0  ;;  %v2387_v0 = vsel %vm379_vm0, %v2676_v6, 0.0 }
 0x27e   : > { %v2482_v45 = vsel %vm379_vm0, %v2423_v55, 0.0  ;;  %2323 = vst.msk [vmem:[%s4472_s23 + $0xe8] sm:$0xff] %vm379_vm0, %v2282_v24  ;;  %v2383_v47 = vsel %vm379_vm0, %v2282_v24, 0.0  ;;  %v2424_v28 = vmul.f32 %v2282_v24, %v2282_v24 }
 0x27f   : > { %v2483_v63 = vadd.f32 %v2482_v45, %v2481_v16  ;;  %v2384_v48 = vadd.f32 %v2383_v47, %v2382_v40  ;;  %v2488_v17 = vsel %vm379_vm0, %v2426_v44, 0.0 }
 0x280   : > { %v2484_v59 = vsel %vm379_vm0, %v2424_v28, 0.0 }
 0x281   : > { %v2386_v56 = vadd.f32 %v2385_v60, %v2384_v48  ;;  %v2485_v57 = vadd.f32 %v2484_v59, %v2483_v63 }
 0x283   : > { %v2388_v49 = vadd.f32 %v2387_v0, %v2386_v56  ;;  %v2487_v4 = vadd.f32 %v2486_v18, %v2485_v57 }
 0x285   : > { %v2389_v33 = vrot.slane %v2388_v49, 4  ;;  %v2489_v61 = vadd.f32 %v2488_v17, %v2487_v4 }
 0x287   : > { %v2390_v1 = vadd.f32 %v2389_v33, %v2388_v49  ;;  %v2490_v43 = vrot.slane %v2489_v61, 4 }
 0x289   : > { %v2391_v7 = vrot.slane %v2390_v1, 2  ;;  %v2491_v32 = vadd.f32 %v2490_v43, %v2489_v61 }
 0x28b   : > { %v2392_v52 = vadd.f32 %v2391_v7, %v2390_v1  ;;  %v2492_v51 = vrot.slane %v2491_v32, 2 }
 0x28d   : > { %v2393_v12 = vrot.slane %v2392_v52, 1  ;;  %v2493_v62 = vadd.f32 %v2492_v51, %v2491_v32 }
 0x28f   : > { %v2494_v46 = vrot.slane %v2493_v62, 1  ;;  %v2394_v11 = vadd.f32 %v2393_v12, %v2392_v52 }
 0x291   : > { %v2495_v9 = vadd.f32 %v2494_v46, %v2493_v62 }
 0x293   : > { %v2497_v35 = vsel %vm2496_vm11, %v2394_v11, %v2495_v9 }
 0x294   : > { %2498 = vst.msk [vmem:[%s235_s26] sm:$0x3] %vm382_vm1, %v2497_v35 }
 0x295 PF: > { %s16_s18 = sadd.s32 1, %s3366_s18  }
 0x296   : > { %p13_p4 = scmp.ge.s32.totalorder %s16_s18, 4  }
 0x298   :  { %15 = sbr.rel (!%p13_p4) target bundleno = 1 (0x1), region = 80 }

// kernel: resblock_forward.3
= control target key start
LH: loop header
LB: loop body
LE: loop exit
PB: predicated region body
PF: predicated region fallthrough
CT: control target
= control target key end

     0   :  { %s3227_s12 = smov 0   ;;  %s4361_s0 = inlined_call_operand.vmem [shape: f32[2,16,16,4], index: 0, kind: input, shape index: {}]   ;;  %s4362_s1 = inlined_call_operand.vmem [shape: bf16[36,4], index: 1, kind: input, shape index: {}]   ;;  %s4363_s2 = inlined_call_operand.vmem [shape: f32[2,16,16,4], index: 2, kind: output, shape index: {0}]   ;;  %s4364_s3 = inlined_call_operand.vmem [shape: f32[2,2,4], index: 3, kind: output, shape index: {1}]  }
   0x1 LB: > { %s2421_s13 = sadd.s32 4294967295, %s3196_s12   ;;  %p2425_p0 = scmp.ge.s32.totalorder %s3196_s12, 1  ;;  %s3196_s12 = sphi %s3227_s12, %s14_s12  }
   0x2   : > { %p140_p1 = scmp.lt.s32.totalorder %s3196_s12, 3 }
   0x4   : > { %p141_p2 = pnand %p2425_p0, %p140_p1 }
   0x6   : > { %144 = sbr.rel (%p141_p2) target bundleno = 661 (0x295), region = 28 }
   0xd   : > { %vm183_vm0 = vcmask 31744   ;;  %vm186_vm1 = vcmask 25600   ;;  %p3237_p3 = scmp.lt.s32.totalorder %s2421_s13, 1  ;;  %v3198_v0 = vmov 0.0   ;;  %s3199_s19 = smov 4   ;;  %vm1965_vm2 = vcmask 1041408  }
   0xe   : > { %184 = vst.msk [vmem:[#allocation2] sm:$0xff] %vm183_vm0, %v3198_v0  ;;  %185 = vst.msk [vmem:[#allocation2 + $0x8] sm:$0xff] %vm183_vm0, %v3198_v0  ;;  %s3200_s20 = smov 8   ;;  %s3201_s21 = smov 12   ;;  %vm1649_vm3 = vcmask 64512   ;;  %vm1682_vm4 = vcmask 97280  }
   0xf   : > { %187 = vst.msk [vmem:[#allocation2 + $0x10] sm:$0x3] %vm186_vm1, %v3198_v0  ;;  %190 = vst.msk [vmem:[#allocation2 + $0x28] sm:$0x3] %vm186_vm1, %v3198_v0  ;;  %s4423_s13 = smov (!%p3237_p3, %s2421_s13), 1  ;;  %s3202_s24 = smov 16  }
  0x10   : > { %188 = vst.msk [vmem:[#allocation2 + $0x18] sm:$0xff] %vm183_vm0, %v3198_v0  ;;  %189 = vst.msk [vmem:[#allocation2 + $0x20] sm:$0xff] %vm183_vm0, %v3198_v0  ;;  %s2452_s15 = sshll.u32 %s4423_s13, 8  ;;  %s3203_s27 = smov 20   ;;  %vm1715_vm5 = vcmask 130048   ;;  %vm1748_vm6 = vcmask 162816  }
  0x11   : > { %191 = vst.msk [vmem:[#allocation2 + $0x30] sm:$0xff] %vm183_vm0, %v3198_v0  ;;  %192 = vst.msk [vmem:[#allocation2 + $0x38] sm:$0xff] %vm183_vm0, %v3198_v0  ;;  %s3307_s18 = scalar_lea.vmem %s4361_s0, %s2452_s15  ;;  %s3204_s30 = smov 24   ;;  %vm1781_vm7 = vcmask 195584   ;;  %vm1814_vm8 = vcmask 228352   ;;  %vm1847_vm9 = vcmask 261120  }
  0x12   : > { %193 = vst.msk [vmem:[#allocation2 + $0x40] sm:$0x3] %vm186_vm1, %v3198_v0  ;;  %196 = vst.msk [vmem:[#allocation2 + $0x58] sm:$0x3] %vm186_vm1, %v3198_v0  ;;  %v241_v1 = vld [vmem:[%s3307_s18 + $0x10] sm:$0xff]  ;;  %v242_v2 = vld [vmem:[%s3307_s18 + $0x18] sm:$0xff]  ;;  %s4223_s8 = scalar_lea.vmem %s4363_s2, %s2452_s15 }
  0x13   : > { %194 = vst.msk [vmem:[#allocation2 + $0x48] sm:$0xff] %vm183_vm0, %v3198_v0  ;;  %195 = vst.msk [vmem:[#allocation2 + $0x50] sm:$0xff] %vm183_vm0, %v3198_v0  ;;  %v239_v3 = vld [vmem:[%s3307_s18] sm:$0xff]  ;;  %v240_v4 = vld [vmem:[%s3307_s18 + $0x8] sm:$0xff]  ;;  %s3205_s4 = smov 28   ;;  %s3206_s5 = smov 32  }
  0x14   : > { %197 = vst.msk [vmem:[#allocation2 + $0x60] sm:$0xff] %vm183_vm0, %v3198_v0  ;;  %198 = vst.msk [vmem:[#allocation2 + $0x68] sm:$0xff] %vm183_vm0, %v3198_v0  ;;  %v243_v5 = vld [vmem:[%s3307_s18 + $0x20] sm:$0xff]  ;;  %v244_v6 = vld [vmem:[%s3307_s18 + $0x28] sm:$0xff]  ;;  %vm1916_vm10 = vcmask 293888   ;;  %s2430_s9 = sshll.u32 %s4423_s13, 1 }
  0x15   : > { %199 = vst.msk [vmem:[#allocation2 + $0x70] sm:$0x3] %vm186_vm1, %v3198_v0  ;;  %202 = vst.msk [vmem:[#allocation2 + $0x88] sm:$0x3] %vm186_vm1, %v3198_v0  ;;  %v336_v7 = vld [vmem:[#allocation2 + $0x1] sm:$0xff]  ;;  %v245_v9 = vld [vmem:[%s3307_s18 + $0x30] sm:$0xff]  ;;  %s181_s14 = scalar_lea.vmem %s4364_s3, %s2430_s9 }
  0x16   : > { %200 = vst.msk [vmem:[#allocation2 + $0x78] sm:$0xff] %vm183_vm0, %v3198_v0  ;;  %201 = vst.msk [vmem:[#allocation2 + $0x80] sm:$0xff] %vm183_vm0, %v3198_v0  ;;  %v337_v8 = vld [vmem:[#allocation2 + $0x9] sm:$0xff]  ;;  %v246_v11 = vld [vmem:[%s3307_s18 + $0x38] sm:$0xff]  ;;  %vm2332_vm11 = vcmask 1040384  }
  0x17   : > { %203 = vst.msk [vmem:[#allocation2 + $0x90] sm:$0xff] %vm183_vm0, %v3198_v0  ;;  %204 = vst.msk [vmem:[#allocation2 + $0x98] sm:$0xff] %vm183_vm0, %v3198_v0  ;;  %v2536_v10 = vpack.i.bf16 %v337_v8, %v336_v7  ;;  %v247_v12 = vld [vmem:[%s3307_s18 + $0x40] sm:$0xff]  ;;  %v248_v13 = vld [vmem:[%s3307_s18 + $0x48] sm:$0xff] }
  0x18   : > { %205 = vst.msk [vmem:[#allocation2 + $0xa0] sm:$0x3] %vm186_vm1, %v3198_v0  ;;  %208 = vst.msk [vmem:[#allocation2 + $0xb8] sm:$0x3] %vm186_vm1, %v3198_v0  ;;  %v249_v14 = vld [vmem:[%s3307_s18 + $0x50] sm:$0xff]  ;;  %v250_v15 = vld [vmem:[%s3307_s18 + $0x58] sm:$0xff] }
  0x19   : > { %206 = vst.msk [vmem:[#allocation2 + $0xa8] sm:$0xff] %vm183_vm0, %v3198_v0  ;;  %207 = vst.msk [vmem:[#allocation2 + $0xb0] sm:$0xff] %vm183_vm0, %v3198_v0  ;;  %v251_v16 = vld [vmem:[%s3307_s18 + $0x60] sm:$0xff]  ;;  %2537 = vrot.lane.b32.xlu0 %v2536_v10, %s3199_s19  ;;  %v252_v17 = vld [vmem:[%s3307_s18 + $0x68] sm:$0xff] }
  0x1a   : > { %209 = vst.msk [vmem:[#allocation2 + $0xc0] sm:$0xff] %vm183_vm0, %v3198_v0  ;;  %210 = vst.msk [vmem:[#allocation2 + $0xc8] sm:$0xff] %vm183_vm0, %v3198_v0  ;;  %v253_v18 = vld [vmem:[%s3307_s18 + $0x70] sm:$0xff]  ;;  %v254_v19 = vld [vmem:[%s3307_s18 + $0x78] sm:$0xff] }
  0x1b   : > { %211 = vst.msk [vmem:[#allocation2 + $0xd0] sm:$0x3] %vm186_vm1, %v3198_v0  ;;  %214 = vst.msk [vmem:[#allocation2 + $0xe8] sm:$0x3] %vm186_vm1, %v3198_v0  ;;  %v255_v20 = vld [vmem:[%s3307_s18 + $0x80] sm:$0xff]  ;;  %v256_v21 = vld [vmem:[%s3307_s18 + $0x88] sm:$0xff] }
  0x1c   : > { %212 = vst.msk [vmem:[#allocation2 + $0xd8] sm:$0xff] %vm183_vm0, %v3198_v0  ;;  %213 = vst.msk [vmem:[#allocation2 + $0xe0] sm:$0xff] %vm183_vm0, %v3198_v0  ;;  %v257_v22 = vld [vmem:[%s3307_s18 + $0x90] sm:$0xff]  ;;  %v258_v23 = vld [vmem:[%s3307_s18 + $0x98] sm:$0xff] }
  0x1d   : > { %215 = vst.msk [vmem:[#allocation2 + $0xf0] sm:$0xff] %vm183_vm0, %v3198_v0  ;;  %216 = vst.msk [vmem:[#allocation2 + $0xf8] sm:$0xff] %vm183_vm0, %v3198_v0  ;;  %v259_v24 = vld [vmem:[%s3307_s18 + $0xa0] sm:$0xff]  ;;  %v260_v25 = vld [vmem:[%s3307_s18 + $0xa8] sm:$0xff] }
  0x1e   : > { %217 = vst.msk [vmem:[#allocation2 + $0x100] sm:$0x3] %vm186_vm1, %v3198_v0  ;;  %220 = vst.msk [vmem:[#allocation2 + $0x118] sm:$0x3] %vm186_vm1, %v3198_v0  ;;  %v261_v35 = vld [vmem:[%s3307_s18 + $0xb0] sm:$0xff]  ;;  %v262_v36 = vld [vmem:[%s3307_s18 + $0xb8] sm:$0xff] }
  0x1f   : > { %218 = vst.msk [vmem:[#allocation2 + $0x108] sm:$0xff] %vm183_vm0, %v3198_v0  ;;  %219 = vst.msk [vmem:[#allocation2 + $0x110] sm:$0xff] %vm183_vm0, %v3198_v0  ;;  %v263_v50 = vld [vmem:[%s3307_s18 + $0xc0] sm:$0xff]  ;;  %v264_v51 = vld [vmem:[%s3307_s18 + $0xc8] sm:$0xff] }
  0x20   : > { %221 = vst.msk [vmem:[#allocation2 + $0x120] sm:$0xff] %vm183_vm0, %v3198_v0  ;;  %222 = vst.msk [vmem:[#allocation2 + $0x128] sm:$0xff] %vm183_vm0, %v3198_v0  ;;  %v265_v52 = vld [vmem:[%s3307_s18 + $0xd0] sm:$0xff]  ;;  %v266_v53 = vld [vmem:[%s3307_s18 + $0xd8] sm:$0xff] }
  0x21   : > { %223 = vst.msk [vmem:[#allocation2 + $0x130] sm:$0x3] %vm186_vm1, %v3198_v0  ;;  %226 = vst.msk [vmem:[#allocation2 + $0x148] sm:$0x3] %vm186_vm1, %v3198_v0  ;;  %v267_v54 = vld [vmem:[%s3307_s18 + $0xe0] sm:$0xff]  ;;  %v268_v55 = vld [vmem:[%s3307_s18 + $0xe8] sm:$0xff] }
  0x22   : > { %224 = vst.msk [vmem:[#allocation2 + $0x138] sm:$0xff] %vm183_vm0, %v3198_v0  ;;  %225 = vst.msk [vmem:[#allocation2 + $0x140] sm:$0xff] %vm183_vm0, %v3198_v0 }
  0x23   : > { %227 = vst.msk [vmem:[#allocation2 + $0x150] sm:$0xff] %vm183_vm0, %v3198_v0  ;;  %228 = vst.msk [vmem:[#allocation2 + $0x158] sm:$0xff] %vm183_vm0, %v3198_v0 }
  0x24   : > { %229 = vst.msk [vmem:[#allocation2 + $0x160] sm:$0x3] %vm186_vm1, %v3198_v0  ;;  %232 = vst.msk [vmem:[#allocation2 + $0x178] sm:$0x3] %vm186_vm1, %v3198_v0 }
  0x25   : > { %230 = vst.msk [vmem:[#allocation2 + $0x168] sm:$0xff] %vm183_vm0, %v3198_v0  ;;  %231 = vst.msk [vmem:[#allocation2 + $0x170] sm:$0xff] %vm183_vm0, %v3198_v0 }
  0x26   : > { %233 = vst.msk [vmem:[#allocation2 + $0x180] sm:$0xff] %vm183_vm0, %v3198_v0  ;;  %234 = vst.msk [vmem:[#allocation2 + $0x188] sm:$0xff] %vm183_vm0, %v3198_v0 }
  0x27   : > { %235 = vst.msk [vmem:[#allocation2 + $0x190] sm:$0x3] %vm186_vm1, %v3198_v0  ;;  %238 = vst.msk [vmem:[#allocation2 + $0x1a8] sm:$0x3] %vm186_vm1, %v3198_v0 }
  0x28   : > { %236 = vst.msk [vmem:[#allocation2 + $0x198] sm:$0xff] %vm183_vm0, %v3198_v0  ;;  %237 = vst.msk [vmem:[#allocation2 + $0x1a0] sm:$0xff] %vm183_vm0, %v3198_v0 }
  0x29   : > { %274 = vst.msk [vmem:[#allocation2 + $0x31] sm:$0xff] %vm183_vm0, %v241_v1  ;;  %275 = vst.msk [vmem:[#allocation2 + $0x39] sm:$0xff] %vm183_vm0, %v242_v2 }
  0x2a   : > { %272 = vst.msk [vmem:[#allocation2 + $0x19] sm:$0xff] %vm183_vm0, %v239_v3  ;;  %273 = vst.msk [vmem:[#allocation2 + $0x21] sm:$0xff] %vm183_vm0, %v240_v4 }
  0x2b   : > { %276 = vst.msk [vmem:[#allocation2 + $0x49] sm:$0xff] %vm183_vm0, %v243_v5  ;;  %277 = vst.msk [vmem:[#allocation2 + $0x51] sm:$0xff] %vm183_vm0, %v244_v6 }
  0x2c   : > { %278 = vst.msk [vmem:[#allocation2 + $0x61] sm:$0xff] %vm183_vm0, %v245_v9  ;;  %279 = vst.msk [vmem:[#allocation2 + $0x69] sm:$0xff] %vm183_vm0, %v246_v11 }
  0x2d   : > { %280 = vst.msk [vmem:[#allocation2 + $0x79] sm:$0xff] %vm183_vm0, %v247_v12  ;;  %281 = vst.msk [vmem:[#allocation2 + $0x81] sm:$0xff] %vm183_vm0, %v248_v13 }
  0x2e   : > { %282 = vst.msk [vmem:[#allocation2 + $0x91] sm:$0xff] %vm183_vm0, %v249_v14  ;;  %283 = vst.msk [vmem:[#allocation2 + $0x99] sm:$0xff] %vm183_vm0, %v250_v15  ;;  %v368_v14 = vld [vmem:[#allocation2 + $0x2] sm:$0xff]  ;;  %v369_v15 = vld [vmem:[#allocation2 + $0xa] sm:$0xff] }
  0x2f   : > { %284 = vst.msk [vmem:[#allocation2 + $0xa9] sm:$0xff] %vm183_vm0, %v251_v16  ;;  %285 = vst.msk [vmem:[#allocation2 + $0xb1] sm:$0xff] %vm183_vm0, %v252_v17  ;;  %v2616_v17 = vpack.i.bf16 %v369_v15, %v368_v14 }
  0x30   : > { %286 = vst.msk [vmem:[#allocation2 + $0xc1] sm:$0xff] %vm183_vm0, %v253_v18  ;;  %287 = vst.msk [vmem:[#allocation2 + $0xc9] sm:$0xff] %vm183_vm0, %v254_v19  ;;  %v340_v26 = vld [vmem:[#allocation2 + $0x31] sm:$0xff]  ;;  %v341_v27 = vld [vmem:[#allocation2 + $0x39] sm:$0xff] }
  0x31   : > { %288 = vst.msk [vmem:[#allocation2 + $0xd9] sm:$0xff] %vm183_vm0, %v255_v20  ;;  %289 = vst.msk [vmem:[#allocation2 + $0xe1] sm:$0xff] %vm183_vm0, %v256_v21  ;;  %v338_v28 = vld [vmem:[#allocation2 + $0x19] sm:$0xff]  ;;  %v3354_v29 = vpack.i.bf16 %v341_v27, %v340_v26  ;;  %v339_v30 = vld [vmem:[#allocation2 + $0x21] sm:$0xff] }
  0x32   : > { %290 = vst.msk [vmem:[#allocation2 + $0xf1] sm:$0xff] %vm183_vm0, %v257_v22  ;;  %291 = vst.msk [vmem:[#allocation2 + $0xf9] sm:$0xff] %vm183_vm0, %v258_v23  ;;  %v342_v31 = vld [vmem:[#allocation2 + $0x49] sm:$0xff]  ;;  %v343_v32 = vld [vmem:[#allocation2 + $0x51] sm:$0xff]  ;;  %v3356_v33 = vpack.i.bf16 %v339_v30, %v338_v28 }
  0x33   : > { %292 = vst.msk [vmem:[#allocation2 + $0x109] sm:$0xff] %vm183_vm0, %v259_v24  ;;  %293 = vst.msk [vmem:[#allocation2 + $0x111] sm:$0xff] %vm183_vm0, %v260_v25  ;;  %v344_v34 = vld [vmem:[#allocation2 + $0x61] sm:$0xff]  ;;  %2547 = vrot.lane.b32.xlu1 %v3354_v29, %s3199_s19  ;;  %v3362_v37 = vpack.i.bf16 %v343_v32, %v342_v31  ;;  %v345_v38 = vld [vmem:[#allocation2 + $0x69] sm:$0xff] }
  0x34   : > { %294 = vst.msk [vmem:[#allocation2 + $0x121] sm:$0xff] %vm183_vm0, %v261_v35  ;;  %295 = vst.msk [vmem:[#allocation2 + $0x129] sm:$0xff] %vm183_vm0, %v262_v36  ;;  %2542 = vrot.lane.b32.xlu0 %v3356_v33, %s3199_s19  ;;  %v3368_v39 = vpack.i.bf16 %v345_v38, %v344_v34  ;;  %v346_v40 = vld [vmem:[#allocation2 + $0x79] sm:$0xff]  ;;  %v347_v41 = vld [vmem:[#allocation2 + $0x81] sm:$0xff] }
  0x35   : > { %v348_v42 = vld [vmem:[#allocation2 + $0x91] sm:$0xff]  ;;  %v349_v43 = vld [vmem:[#allocation2 + $0x99] sm:$0xff]  ;;  %v3372_v45 = vpack.i.bf16 %v347_v41, %v346_v40  ;;  %296 = vst.msk [vmem:[#allocation2 + $0x139] sm:$0xff] %vm183_vm0, %v263_v50  ;;  %297 = vst.msk [vmem:[#allocation2 + $0x141] sm:$0xff] %vm183_vm0, %v264_v51 }
  0x36   : > { %v350_v44 = vld [vmem:[#allocation2 + $0xa9] sm:$0xff]  ;;  %v351_v46 = vld [vmem:[#allocation2 + $0xb1] sm:$0xff]  ;;  %v3376_v49 = vpack.i.bf16 %v349_v43, %v348_v42  ;;  %298 = vst.msk [vmem:[#allocation2 + $0x151] sm:$0xff] %vm183_vm0, %v265_v52  ;;  %299 = vst.msk [vmem:[#allocation2 + $0x159] sm:$0xff] %vm183_vm0, %v266_v53 }
  0x37   : > { %2552 = vrot.lane.b32.xlu1 %v3362_v37, %s3199_s19  ;;  %v352_v47 = vld [vmem:[#allocation2 + $0xc1] sm:$0xff]  ;;  %v353_v48 = vld [vmem:[#allocation2 + $0xc9] sm:$0xff]  ;;  %300 = vst.msk [vmem:[#allocation2 + $0x169] sm:$0xff] %vm183_vm0, %v267_v54  ;;  %301 = vst.msk [vmem:[#allocation2 + $0x171] sm:$0xff] %vm183_vm0, %v268_v55  ;;  %v3392_v56 = vpack.i.bf16 %v351_v46, %v350_v44 }
  0x38   : > { %2557 = vrot.lane.b32.xlu0 %v3368_v39, %s3199_s19  ;;  %v3396_v57 = vpack.i.bf16 %v353_v48, %v352_v47  ;;  %v354_v58 = vld [vmem:[#allocation2 + $0xd9] sm:$0xff]  ;;  %v355_v59 = vld [vmem:[#allocation2 + $0xe1] sm:$0xff]  ;;  %v374_v24 = vld [vmem:[#allocation2 + $0x4a] sm:$0xff] }
  0x39   : > { %v356_v60 = vld [vmem:[#allocation2 + $0xf1] sm:$0xff]  ;;  %v357_v61 = vld [vmem:[#allocation2 + $0xf9] sm:$0xff]  ;;  %v3400_v62 = vpack.i.bf16 %v355_v59, %v354_v58  ;;  %v371_v19 = vld [vmem:[#allocation2 + $0x22] sm:$0xff] }
  0x3a   : > { %v3404_v63 = vpack.i.bf16 %v357_v61, %v356_v60  ;;  %v358_v0 = vld [vmem:[#allocation2 + $0x109] sm:$0xff]  ;;  %v359_v1 = vld [vmem:[#allocation2 + $0x111] sm:$0xff]  ;;  %v370_v18 = vld [vmem:[#allocation2 + $0x1a] sm:$0xff] }
  0x3b   : > { %2562 = vrot.lane.b32.xlu1 %v3372_v45, %s3199_s19  ;;  %v360_v2 = vld [vmem:[#allocation2 + $0x121] sm:$0xff]  ;;  %v361_v3 = vld [vmem:[#allocation2 + $0x129] sm:$0xff]  ;;  %v2591_v4 = vpack.i.bf16 %v359_v1, %v358_v0  ;;  %v372_v20 = vld [vmem:[#allocation2 + $0x32] sm:$0xff]  ;;  %v3415_v22 = vpack.i.bf16 %v371_v19, %v370_v18 }
  0x3c   : > { %2567 = vrot.lane.b32.xlu0 %v3376_v49, %s3199_s19  ;;  %v2596_v5 = vpack.i.bf16 %v361_v3, %v360_v2  ;;  %v362_v6 = vld [vmem:[#allocation2 + $0x139] sm:$0xff]  ;;  %v363_v7 = vld [vmem:[#allocation2 + $0x141] sm:$0xff]  ;;  %v377_v27 = vld [vmem:[#allocation2 + $0x6a] sm:$0xff] }
  0x3d   : > { %v364_v8 = vld [vmem:[#allocation2 + $0x151] sm:$0xff]  ;;  %v365_v9 = vld [vmem:[#allocation2 + $0x159] sm:$0xff]  ;;  %v2601_v10 = vpack.i.bf16 %v363_v7, %v362_v6  ;;  %v376_v26 = vld [vmem:[#allocation2 + $0x62] sm:$0xff] }
  0x3e   : > { %v2606_v11 = vpack.i.bf16 %v365_v9, %v364_v8  ;;  %v366_v12 = vld [vmem:[#allocation2 + $0x169] sm:$0xff]  ;;  %v367_v13 = vld [vmem:[#allocation2 + $0x171] sm:$0xff]  ;;  %v373_v21 = vld [vmem:[#allocation2 + $0x3a] sm:$0xff]  ;;  %v3426_v30 = vpack.i.bf16 %v377_v27, %v376_v26 }
  0x3f   : > { %2572 = vrot.lane.b32.xlu1 %v3392_v56, %s3199_s19  ;;  %v2611_v16 = vpack.i.bf16 %v367_v13, %v366_v12  ;;  %v3418_v23 = vpack.i.bf16 %v373_v21, %v372_v20  ;;  %v375_v25 = vld [vmem:[#allocation2 + $0x52] sm:$0xff]  ;;  %v378_v31 = vld [vmem:[#allocation2 + $0x7a] sm:$0xff]  ;;  %v379_v32 = vld [vmem:[#allocation2 + $0x82] sm:$0xff] }
  0x40   : > { %2577 = vrot.lane.b32.xlu0 %v3396_v57, %s3199_s19  ;;  %v3422_v28 = vpack.i.bf16 %v375_v25, %v374_v24  ;;  %v380_v34 = vld [vmem:[#allocation2 + $0x92] sm:$0xff]  ;;  %v381_v35 = vld [vmem:[#allocation2 + $0x9a] sm:$0xff]  ;;  %v3430_v36 = vpack.i.bf16 %v379_v32, %v378_v31  ;;  %v382_v40 = vld [vmem:[#allocation2 + $0xaa] sm:$0xff] }
  0x41   : > { %v3434_v38 = vpack.i.bf16 %v381_v35, %v380_v34  ;;  %v383_v41 = vld [vmem:[#allocation2 + $0xb2] sm:$0xff]  ;;  %v384_v42 = vld [vmem:[#allocation2 + $0xc2] sm:$0xff]  ;;  %v385_v43 = vld [vmem:[#allocation2 + $0xca] sm:$0xff] }
  0x42   : > { %v3438_v44 = vpack.i.bf16 %v383_v41, %v382_v40  ;;  %v3442_v46 = vpack.i.bf16 %v385_v43, %v384_v42  ;;  %v386_v47 = vld [vmem:[#allocation2 + $0xda] sm:$0xff]  ;;  %v387_v48 = vld [vmem:[#allocation2 + $0xe2] sm:$0xff]  ;;  %v388_v50 = vld [vmem:[#allocation2 + $0xf2] sm:$0xff] }
  0x43   : > { %2582 = vrot.lane.b32.xlu1 %v3400_v62, %s3199_s19  ;;  %v389_v51 = vld [vmem:[#allocation2 + $0xfa] sm:$0xff]  ;;  %v3446_v52 = vpack.i.bf16 %v387_v48, %v386_v47  ;;  %v390_v54 = vld [vmem:[#allocation2 + $0x10a] sm:$0xff]  ;;  %v391_v55 = vld [vmem:[#allocation2 + $0x112] sm:$0xff] }
  0x44   : > { %2587 = vrot.lane.b32.xlu0 %v3404_v63, %s3199_s19  ;;  %v3450_v53 = vpack.i.bf16 %v389_v51, %v388_v50  ;;  %v392_v58 = vld [vmem:[#allocation2 + $0x122] sm:$0xff]  ;;  %v393_v59 = vld [vmem:[#allocation2 + $0x12a] sm:$0xff]  ;;  %v3454_v60 = vpack.i.bf16 %v391_v55, %v390_v54  ;;  %v394_v0 = vld [vmem:[#allocation2 + $0x13a] sm:$0xff] }
  0x45   : > { %v2676_v61 = vpack.i.bf16 %v393_v59, %v392_v58  ;;  %v395_v1 = vld [vmem:[#allocation2 + $0x142] sm:$0xff]  ;;  %v396_v2 = vld [vmem:[#allocation2 + $0x152] sm:$0xff]  ;;  %v397_v3 = vld [vmem:[#allocation2 + $0x15a] sm:$0xff] }
  0x46   : > { %v398_v6 = vld [vmem:[#allocation2 + $0x16a] sm:$0xff]  ;;  %v399_v7 = vld [vmem:[#allocation2 + $0x172] sm:$0xff]  ;;  %v3463_v9 = vld [vmem:[#allocation2 + $0x20] sm:$0xff] }
  0x47   : > { %2592 = vrot.lane.b32.xlu1 %v2591_v4, %s3199_s19  ;;  %v2681_v4 = vpack.i.bf16 %v395_v1, %v394_v0  ;;  %v3461_v8 = vld [vmem:[#allocation2 + $0x18] sm:$0xff]  ;;  %v3469_v12 = vld [vmem:[#allocation2 + $0x30] sm:$0xff]  ;;  %v3473_v14 = vld [vmem:[#allocation2 + $0x48] sm:$0xff] }
  0x48   : > { %2597 = vrot.lane.b32.xlu0 %v2596_v5, %s3199_s19  ;;  %v2686_v5 = vpack.i.bf16 %v397_v3, %v396_v2  ;;  %v3471_v13 = vld [vmem:[#allocation2 + $0x38] sm:$0xff]  ;;  %v3475_v15 = vld [vmem:[#allocation2 + $0x50] sm:$0xff]  ;;  %v3483_v18 = vld [vmem:[#allocation2 + $0x60] sm:$0xff] }
  0x49   : > { %v3485_v19 = vld [vmem:[#allocation2 + $0x68] sm:$0xff]  ;;  %v3487_v20 = vld [vmem:[#allocation2 + $0x78] sm:$0xff]  ;;  %v3489_v21 = vld [vmem:[#allocation2 + $0x80] sm:$0xff] }
  0x4a   : > { %v2711_v24 = vpack.i.bf16 %v3485_v19, %v3483_v18  ;;  %v2716_v25 = vpack.i.bf16 %v3489_v21, %v3487_v20  ;;  %v3497_v26 = vld [vmem:[#allocation2 + $0x90] sm:$0xff]  ;;  %v3499_v27 = vld [vmem:[#allocation2 + $0x98] sm:$0xff]  ;;  %v412_v31 = vld [vmem:[#allocation2 + $0xa8] sm:$0xff] }
  0x4b   : > { %2602 = vrot.lane.b32.xlu1 %v2601_v10, %s3199_s19  ;;  %v2691_v10 = vpack.i.bf16 %v399_v7, %v398_v6  ;;  %4382 = vst [vmem:[#allocation3_spill] sm:$0xff] %v3497_v26  ;;  %v3501_v32 = vld [vmem:[#allocation2 + $0xb0] sm:$0xff]  ;;  %v2721_v34 = vpack.i.bf16 %v3499_v27, %v3497_v26  ;;  %v3176_v40 = vld [vmem:[%s4362_s1] sm:$0xff]   ;;  %v3177_v41 = vld [vmem:[%s4362_s1 + $0x8] sm:$0xff]  }
  0x4c   : > { %2607 = vrot.lane.b32.xlu0 %v2606_v11, %s3199_s19  ;;  %v2696_v11 = vpack.i.bf16 %v3463_v9, %v3461_v8  ;;  %4383 = vst [vmem:[#allocation4_spill] sm:$0xff] %v3501_v32  ;;  %v2726_v35 = vpack.i.bf16 %v3501_v32, %v412_v31  ;;  %2473 = vmatprep.subr.bf16.mxu0 %v3176_v40  ;;  %v3178_v42 = vld [vmem:[%s4362_s1 + $0x10] ss:$0 sps:$4 sm:$0x33]   ;;  %v270_v43 = vld [vmem:[%s3307_s18 + $0xf8] sm:$0xff]  ;;  %v320_v50 = vld [vmem:[#allocation2 + $0xc0] sm:$0xff] }
  0x4d   : > { %2511 = vmatprep.subr.bf16.mxu1 %v3176_v40  ;;  %2474 = vmatpush3.bf16.msra.mxu0 %v3176_v40  ;;  %303 = vst.msk [vmem:[#allocation2 + $0x189] sm:$0xff] %vm183_vm0, %v270_v43  ;;  %v321_v51 = vld [vmem:[#allocation2 + $0xc8] sm:$0xff]  ;;  %v3614_v0 = vld [vmem:[#allocation2 + $0xd8] sm:$0xff]  ;;  %v3616_v1 = vld [vmem:[#allocation2 + $0xe0] sm:$0xff] }
  0x4e   : > { %2514 = vmatpush3.bf16.msra.mxu1 %v3176_v40  ;;  %2475 = vmatprep.subr.bf16.mxu0 %v3177_v41  ;;  %v2881_v55 = vpack.i.bf16 %v321_v51, %v320_v50  ;;  %4390 = vst [vmem:[#allocation11_spill] sm:$0xff] %v3614_v0  ;;  %4391 = vst [vmem:[#allocation12_spill] sm:$0xff] %v3616_v1  ;;  %v324_v7 = vld [vmem:[#allocation2 + $0xf0] sm:$0xff]  ;;  %v3671_v50 = vld [vmem:[#allocation2 + $0x158] sm:$0xff] }
  0x4f   : > { %2612 = vrot.lane.b32.xlu1 %v2611_v16, %s3199_s19  ;;  %v2701_v16 = vpack.i.bf16 %v3471_v13, %v3469_v12  ;;  %2512 = vmatprep.subr.bf16.mxu1 %v3177_v41  ;;  %v545_v31 = vld [vmem:[#allocation2 + $0xf1] sm:$0xff] }
  0x50   : > { %2617 = vrot.lane.b32.xlu0 %v2616_v17, %s3200_s20  ;;  %v2706_v17 = vpack.i.bf16 %v3475_v15, %v3473_v14  ;;  %v327_v40 = vld [vmem:[#allocation2 + $0x110] sm:$0xff] }
  0x51   : > { %2476 = vmatpush3.bf16.msra.mxu0 %v3177_v41 }
  0x52   : > { %2515 = vmatpush3.bf16.msra.mxu1 %v3177_v41  ;;  %2517 = vmatprep.subr.msk.bf16.mxu0 %vm1965_vm2, %v3178_v42 }
  0x53   : > { %2622 = vrot.lane.b32.xlu1 %v3415_v22, %s3200_s20  ;;  %2518 = vmatprep.subr.msk.bf16.mxu1 %vm1965_vm2, %v3178_v42 }
  0x54   : > { %2627 = vrot.lane.b32.xlu0 %v3418_v23, %s3200_s20 }
  0x57   : > { %2632 = vrot.lane.b32.xlu1 %v3422_v28, %s3200_s20 }
  0x58   : > { %2637 = vrot.lane.b32.xlu0 %v3426_v30, %s3200_s20 }
  0x5b   : > { %2642 = vrot.lane.b32.xlu1 %v3430_v36, %s3200_s20 }
  0x5c   : > { %2647 = vrot.lane.b32.xlu0 %v3434_v38, %s3200_s20 }
  0x5f   : > { %2652 = vrot.lane.b32.xlu1 %v3438_v44, %s3200_s20 }
  0x60   : > { %2657 = vrot.lane.b32.xlu0 %v3442_v46, %s3200_s20 }
  0x63   : > { %2662 = vrot.lane.b32.xlu1 %v3446_v52, %s3200_s20 }
  0x64   : > { %2667 = vrot.lane.b32.xlu0 %v3450_v53, %s3200_s20 }
  0x67   : > { %2672 = vrot.lane.b32.xlu1 %v3454_v60, %s3200_s20 }
  0x68   : > { %2677 = vrot.lane.b32.xlu0 %v2676_v61, %s3200_s20 }
  0x6b   : > { %2682 = vrot.lane.b32.xlu1 %v2681_v4, %s3200_s20 }
  0x6c   : > { %2687 = vrot.lane.b32.xlu0 %v2686_v5, %s3200_s20 }
  0x6f   : > { %2692 = vrot.lane.b32.xlu1 %v2691_v10, %s3200_s20  ;;  %v325_v10 = vld [vmem:[#allocation2 + $0xf8] sm:$0xff] }
  0x70   : > { %2697 = vrot.lane.b32.xlu0 %v2696_v11, %s3201_s21 }
  0x73   : > { %2702 = vrot.lane.b32.xlu1 %v2701_v16, %s3201_s21 }
  0x74   : > { %2707 = vrot.lane.b32.xlu0 %v2706_v17, %s3201_s21 }
  0x77   : > { %2712 = vrot.lane.b32.xlu1 %v2711_v24, %s3201_s21 }
  0x78   : > { %2717 = vrot.lane.b32.xlu0 %v2716_v25, %s3201_s21 }
  0x7b   : > { %2722 = vrot.lane.b32.xlu1 %v2721_v34, %s3201_s21 }
  0x7c   : > { %2727 = vrot.lane.b32.xlu0 %v2726_v35, %s3201_s21 }
  0x7f   : > { %2732 = vrot.lane.b32.xlu1 %v3356_v33, %s3202_s24  ;;  %v1967_v33 = vsel %vm1965_vm2, %v3178_v42, 0  ;;  %v547_v42 = vld [vmem:[#allocation2 + $0x109] sm:$0xff] }
  0x80   : > { %2737 = vrot.lane.b32.xlu0 %v3354_v29, %s3202_s24  ;;  %2478 = vmatpush3.bf16.msra.mxu0 %v1967_v33 }
  0x81   : > { %2516 = vmatpush3.bf16.msra.mxu1 %v1967_v33  ;;  %v548_v33 = vld [vmem:[#allocation2 + $0x111] sm:$0xff] }
  0x83   : > { %2742 = vrot.lane.b32.xlu1 %v3415_v22, %s3203_s27  ;;  %v269_v22 = vld [vmem:[%s3307_s18 + $0xf0] sm:$0xff] }
  0x84   : > { %2747 = vrot.lane.b32.xlu0 %v3418_v23, %s3203_s27  ;;  %302 = vst.msk [vmem:[#allocation2 + $0x181] sm:$0xff] %vm183_vm0, %v269_v22 }
  0x87   : > { %2752 = vrot.lane.b32.xlu1 %v2701_v16, %s3204_s30 }
  0x88   : > { %2757 = vrot.lane.b32.xlu0 %v2706_v17, %s3204_s30 }
  0x8b   : > { %2762 = vrot.lane.b32.xlu1 %v3354_v29, %s3205_s4  ;;  %v3555_v29 = vpop.permute.xlu0 %2537 }
  0x8c   : > { %2767 = vrot.lane.b32.xlu0 %v3362_v37, %s3205_s4 }
  0x8f   : > { %2772 = vrot.lane.b32.xlu1 %v3418_v23, %s3206_s5 }
  0x90   : > { %2777 = vrot.lane.b32.xlu0 %v3422_v28, %s3206_s5 }
  0x93   : > { %2782 = vrot.lane.b32.xlu1 %v3362_v37, %s3202_s24 }
  0x94   : > { %2787 = vrot.lane.b32.xlu0 %v3368_v39, %s3202_s24 }
  0x97   : > { %2792 = vrot.lane.b32.xlu1 %v3422_v28, %s3203_s27 }
  0x98   : > { %2797 = vrot.lane.b32.xlu0 %v3426_v30, %s3203_s27 }
  0x9b   : > { %2802 = vrot.lane.b32.xlu1 %v2711_v24, %s3204_s30 }
  0x9c   : > { %2807 = vrot.lane.b32.xlu0 %v2716_v25, %s3204_s30 }
  0x9f   : > { %2812 = vrot.lane.b32.xlu1 %v3368_v39, %s3205_s4 }
  0xa0   : > { %2817 = vrot.lane.b32.xlu0 %v3372_v45, %s3205_s4 }
  0xa3   : > { %2822 = vrot.lane.b32.xlu1 %v3426_v30, %s3206_s5 }
  0xa4   : > { %2827 = vrot.lane.b32.xlu0 %v3430_v36, %s3206_s5 }
  0xa5   : > { %v3561_v37 = vpop.permute.xlu1 %2547 }
  0xa6   : > { %v3563_v23 = vpop.permute.xlu0 %2542 }
  0xa7   : > { %2832 = vrot.lane.b32.xlu1 %v3372_v45, %s3202_s24 }
  0xa8   : > { %2837 = vrot.lane.b32.xlu0 %v3376_v49, %s3202_s24 }
  0xa9   : > { %v3569_v39 = vpop.permute.xlu1 %2552 }
  0xaa   : > { %v3571_v28 = vpop.permute.xlu0 %2557 }
  0xab   : > { %2842 = vrot.lane.b32.xlu1 %v3430_v36, %s3203_s27 }
  0xac   : > { %2847 = vrot.lane.b32.xlu0 %v3434_v38, %s3203_s27 }
  0xad   : > { %v3577_v30 = vpop.permute.xlu1 %2562 }
  0xae   : > { %v3579_v47 = vpop.permute.xlu0 %2567 }
  0xaf   : > { %2852 = vrot.lane.b32.xlu1 %v2721_v34, %s3204_s30  ;;  %v546_v34 = vld [vmem:[#allocation2 + $0xf9] sm:$0xff] }
  0xb0   : > { %2857 = vrot.lane.b32.xlu0 %v2726_v35, %s3204_s30  ;;  %v326_v35 = vld [vmem:[#allocation2 + $0x108] sm:$0xff] }
  0xb1   : > { %v3583_v45 = vpop.permute.xlu1 %2572 }
  0xb2   : > { %v3585_v48 = vpop.permute.xlu0 %2577 }
  0xb3   : > { %4384 = vst [vmem:[#allocation5_spill] sm:$0xff] %v3585_v48  ;;  %2862 = vrot.lane.b32.xlu1 %v3376_v49, %s3205_s4 }
  0xb4   : > { %2867 = vrot.lane.b32.xlu0 %v3392_v56, %s3205_s4 }
  0xb5   : > { %v3591_v36 = vpop.permute.xlu1 %2582 }
  0xb6   : > { %4385 = vst [vmem:[#allocation6_spill] sm:$0xff] %v3591_v36  ;;  %v3593_v54 = vpop.permute.xlu0 %2587 }
  0xb7   : > { %4386 = vst [vmem:[#allocation7_spill] sm:$0xff] %v3593_v54  ;;  %2872 = vrot.lane.b32.xlu1 %v3434_v38, %s3206_s5  ;;  %v304_v54 = vld [vmem:[#allocation2] sm:$0xff] }
  0xb8   : > { %2877 = vrot.lane.b32.xlu0 %v3438_v44, %s3206_s5 }
  0xb9   : > { %v3599_v58 = vpop.permute.xlu1 %2592 }
  0xba   : > { %4387 = vst [vmem:[#allocation8_spill] sm:$0xff] %v3599_v58  ;;  %v3601_v59 = vpop.permute.xlu0 %2597  ;;  %v305_v58 = vld [vmem:[#allocation2 + $0x8] sm:$0xff] }
  0xbb   : > { %4388 = vst [vmem:[#allocation9_spill] sm:$0xff] %v3601_v59  ;;  %2882 = vrot.lane.b32.xlu1 %v2881_v55, %s3201_s21  ;;  %v583_v59 = vld [vmem:[#allocation2 + $0x13a] sm:$0xff] }
  0xbc   : > { %2887 = vrot.lane.b32.xlu0 %v3392_v56, %s3202_s24  ;;  %v2911_v56 = vpack.i.bf16 %v3616_v1, %v3614_v0  ;;  %v2545_v0 = vunpack.i.h.bf16 %v3563_v23 }
  0xbd   : > { %v3606_v49 = vpop.permute.xlu1 %2602 }
  0xbe   : > { %4389 = vst [vmem:[#allocation10_spill] sm:$0xff] %v3606_v49  ;;  %v2608_v61 = vpop.permute.xlu0 %2607  ;;  %v552_v49 = vld [vmem:[#allocation2 + $0x141] sm:$0xff] }
  0xbf   : > { %2892 = vrot.lane.b32.xlu1 %v3396_v57, %s3202_s24  ;;  %v2610_v22 = vunpack.i.h.bf16 %v2608_v61  ;;  %v2609_v43 = vunpack.i.l.bf16 %v2608_v61 }
  0xc0   : > { %2897 = vrot.lane.b32.xlu0 %v3438_v44, %s3203_s27 }
  0xc1   : > { %v3612_v38 = vpop.permute.xlu1 %2612  ;;  %v1646_v61 = vsel %vm183_vm0, %v3671_v50, %v2610_v22 }
  0xc2   : > { %v3618_v2 = vpop.permute.xlu0 %2617 }
  0xc3   : > { %2902 = vrot.lane.b32.xlu1 %v3442_v46, %s3203_s27  ;;  %v2619_v1 = vunpack.i.l.bf16 %v3618_v2 }
  0xc4   : > { %2907 = vrot.lane.b32.xlu0 %v2881_v55, %s3204_s30 }
  0xc5   : > { %v3625_v3 = vpop.permute.xlu1 %2622 }
  0xc6   : > { %v3627_v4 = vpop.permute.xlu0 %2627 }
  0xc7   : > { %2912 = vrot.lane.b32.xlu1 %v2911_v56, %s3204_s30 }
  0xc8   : > { %2917 = vrot.lane.b32.xlu0 %v3396_v57, %s3205_s4  ;;  %v2941_v57 = vpack.i.bf16 %v325_v10, %v324_v7  ;;  %v2615_v7 = vunpack.i.h.bf16 %v3612_v38  ;;  %v2614_v10 = vunpack.i.l.bf16 %v3612_v38 }
  0xc9   : > { %v3632_v44 = vpop.permute.xlu1 %2632 }
  0xca   : > { %v3634_v5 = vpop.permute.xlu0 %2637 }
  0xcb   : > { %2922 = vrot.lane.b32.xlu1 %v3400_v62, %s3205_s4 }
  0xcc   : > { %2927 = vrot.lane.b32.xlu0 %v3442_v46, %s3206_s5 }
  0xcd   : > { %v3640_v6 = vpop.permute.xlu1 %2642 }
  0xce   : > { %v3642_v11 = vpop.permute.xlu0 %2647 }
  0xcf   : > { %2932 = vrot.lane.b32.xlu1 %v3446_v52, %s3206_s5 }
  0xd0   : > { %2937 = vrot.lane.b32.xlu0 %v2911_v56, %s3201_s21  ;;  %v2981_v56 = vpack.i.bf16 %v548_v33, %v547_v42 }
  0xd1   : > { %v3647_v16 = vpop.permute.xlu1 %2652 }
  0xd2   : > { %v3649_v17 = vpop.permute.xlu0 %2657 }
  0xd3   : > { %4392 = vst [vmem:[#allocation13_spill] sm:$0xff] %v3649_v17  ;;  %2942 = vrot.lane.b32.xlu1 %v2941_v57, %s3201_s21  ;;  %v2624_v17 = vunpack.i.l.bf16 %v3625_v3 }
  0xd4   : > { %2947 = vrot.lane.b32.xlu0 %v3400_v62, %s3202_s24  ;;  %v2971_v62 = vpack.i.bf16 %v327_v40, %v326_v35 }
  0xd5   : > { %v3654_v46 = vpop.permute.xlu1 %2662 }
  0xd6   : > { %4393 = vst [vmem:[#allocation14_spill] sm:$0xff] %v3654_v46  ;;  %v3656_v24 = vpop.permute.xlu0 %2667 }
  0xd7   : > { %4394 = vst [vmem:[#allocation15_spill] sm:$0xff] %v3656_v24  ;;  %2952 = vrot.lane.b32.xlu1 %v3404_v63, %s3202_s24  ;;  %v2976_v63 = vpack.i.bf16 %v546_v34, %v545_v31  ;;  %v3682_v31 = vld [vmem:[#allocation2 + $0x168] sm:$0xff]  ;;  %v3684_v34 = vld [vmem:[#allocation2 + $0x170] sm:$0xff]  ;;  %v459_v24 = vld [vmem:[#allocation2 + $0x159] sm:$0xff] }
  0xd8   : > { %2957 = vrot.lane.b32.xlu0 %v3446_v52, %s3203_s27  ;;  %v3669_v52 = vld [vmem:[#allocation2 + $0x150] sm:$0xff] }
  0xd9   : > { %v3662_v25 = vpop.permute.xlu1 %2672 }
  0xda   : > { %4395 = vst [vmem:[#allocation16_spill] sm:$0xff] %v3662_v25  ;;  %v3664_v41 = vpop.permute.xlu0 %2677  ;;  %v584_v25 = vld [vmem:[#allocation2 + $0x142] sm:$0xff] }
  0xdb   : > { %4396 = vst [vmem:[#allocation17_spill] sm:$0xff] %v3664_v41  ;;  %2962 = vrot.lane.b32.xlu1 %v3450_v53, %s3203_s27  ;;  %v1647_v41 = vsel %vm183_vm0, %v3682_v31, %v2614_v10  ;;  %v454_v10 = vld [vmem:[#allocation2 + $0x121] sm:$0xff]  ;;  %v3749_v48 = vpack.i.bf16 %v584_v25, %v583_v59 }
  0xdc   : > { %2967 = vrot.lane.b32.xlu0 %v2941_v57, %s3204_s30  ;;  %v1645_v57 = vsel %vm183_vm0, %v3669_v52, %v2609_v43  ;;  %v1648_v43 = vsel %vm183_vm0, %v3684_v34, %v2615_v7 }
  0xdd   : > { %v3673_v51 = vpop.permute.xlu1 %2682 }
  0xde   : > { %4397 = vst [vmem:[#allocation18_spill] sm:$0xff] %v3673_v51  ;;  %v2688_v55 = vpop.permute.xlu0 %2687 }
  0xdf   : > { %v2690_v35 = vunpack.i.h.bf16 %v2688_v55  ;;  %v2689_v40 = vunpack.i.l.bf16 %v2688_v55  ;;  %2972 = vrot.lane.b32.xlu1 %v2971_v62, %s3204_s30 }
  0xe0   : > { %2977 = vrot.lane.b32.xlu0 %v2976_v63, %s3205_s4 }
  0xe1   : > { %v3688_v42 = vsel %vm1649_vm3, %v1645_v57, %v2689_v40  ;;  %v3691_v38 = vsel %vm1649_vm3, %v1646_v61, %v2690_v35  ;;  %v2693_v33 = vpop.permute.xlu1 %2692  ;;  %v328_v61 = vld [vmem:[#allocation2 + $0x120] sm:$0xff]  ;;  %v329_v57 = vld [vmem:[#allocation2 + $0x128] sm:$0xff] }
  0xe2   : > { %4398 = vst [vmem:[#allocation19_spill] sm:$0xff] %v3688_v42  ;;  %4399 = vst [vmem:[#allocation20_spill] sm:$0xff] %v3691_v38  ;;  %v2695_v55 = vunpack.i.h.bf16 %v2693_v33  ;;  %v2694_v51 = vunpack.i.l.bf16 %v2693_v33  ;;  %v3693_v22 = vpop.permute.xlu0 %2697  ;;  %v3001_v7 = vpack.i.bf16 %v329_v57, %v328_v61  ;;  %v330_v57 = vld [vmem:[#allocation2 + $0x138] sm:$0xff]  ;;  %v331_v42 = vld [vmem:[#allocation2 + $0x140] sm:$0xff] }
  0xe3   : > { %2982 = vrot.lane.b32.xlu1 %v2981_v56, %s3205_s4  ;;  %v2700_v32 = vunpack.i.h.bf16 %v3693_v22 }
  0xe4   : > { %v3701_v63 = vsel %vm1649_vm3, %v1648_v43, %v2695_v55  ;;  %v3704_v40 = vsel %vm1649_vm3, %v1647_v41, %v2694_v51  ;;  %2987 = vrot.lane.b32.xlu0 %v3450_v53, %s3206_s5  ;;  %v455_v55 = vld [vmem:[#allocation2 + $0x129] sm:$0xff] }
  0xe5   : > { %4400 = vst [vmem:[#allocation21_spill] sm:$0xff] %v3701_v63  ;;  %4401 = vst [vmem:[#allocation22_spill] sm:$0xff] %v3704_v40  ;;  %v3708_v35 = vpop.permute.xlu1 %2702  ;;  %v3011_v53 = vpack.i.bf16 %v455_v55, %v454_v10  ;;  %v486_v51 = vld [vmem:[#allocation2 + $0x122] sm:$0xff]  ;;  %v487_v63 = vld [vmem:[#allocation2 + $0x12a] sm:$0xff]  ;;  %v3736_v55 = vpack.i.bf16 %v331_v42, %v330_v57  ;;  %v2544_v42 = vunpack.i.l.bf16 %v3563_v23  ;;  %v2620_v57 = vunpack.i.h.bf16 %v3618_v2 }
  0xe6   : > { %v3710_v33 = vpop.permute.xlu0 %2707  ;;  %v2699_v23 = vunpack.i.l.bf16 %v3693_v22  ;;  %v3757_v2 = vpack.i.bf16 %v3671_v50, %v3669_v52  ;;  %v2705_v59 = vunpack.i.h.bf16 %v3708_v35  ;;  %v2704_v25 = vunpack.i.l.bf16 %v3708_v35 }
  0xe7   : > { %2992 = vrot.lane.b32.xlu1 %v3454_v60, %s3206_s5  ;;  %v1619_v22 = vsel %vm183_vm0, %v3461_v8, %v2544_v42  ;;  %v1620_v52 = vsel %vm183_vm0, %v3463_v9, %v2545_v0 }
  0xe8   : > { %2997 = vrot.lane.b32.xlu0 %v2971_v62, %s3201_s21  ;;  %v3726_v62 = vpack.i.bf16 %v487_v63, %v486_v51  ;;  %v2540_v63 = vunpack.i.h.bf16 %v3555_v29  ;;  %v2539_v51 = vunpack.i.l.bf16 %v3555_v29  ;;  %v2625_v29 = vunpack.i.h.bf16 %v3625_v3 }
  0xe9   : > { %v3715_v43 = vpop.permute.xlu1 %2712 }
  0xea   : > { %v3717_v41 = vpop.permute.xlu0 %2717  ;;  %v1618_v3 = vsel %vm183_vm0, %v305_v58, %v2540_v63 }
  0xeb   : > { %3002 = vrot.lane.b32.xlu1 %v3001_v7, %s3201_s21 }
  0xec   : > { %3007 = vrot.lane.b32.xlu0 %v2981_v56, %s3202_s24  ;;  %v551_v56 = vld [vmem:[#allocation2 + $0x139] sm:$0xff] }
  0xed   : > { %v3721_v40 = vpop.permute.xlu1 %2722 }
  0xee   : > { %v3723_v38 = vpop.permute.xlu0 %2727 }
  0xef   : > { %3012 = vrot.lane.b32.xlu1 %v3011_v53, %s3202_s24 }
  0xf0   : > { %3017 = vrot.lane.b32.xlu0 %v3454_v60, %s3203_s27  ;;  %v458_v60 = vld [vmem:[#allocation2 + $0x151] sm:$0xff] }
  0xf1   : > { %v3730_v61 = vpop.permute.xlu1 %2732  ;;  %v3759_v26 = vpack.i.bf16 %v459_v24, %v458_v60  ;;  %v1651_v24 = vsel %vm1649_vm3, %v1618_v3, %v2620_v57 }
  0xf2   : > { %v3732_v10 = vpop.permute.xlu0 %2737  ;;  %v2735_v35 = vunpack.i.h.bf16 %v3730_v61 }
  0xf3   : > { %3022 = vrot.lane.b32.xlu1 %v3726_v62, %s3203_s27  ;;  %v2740_v9 = vunpack.i.h.bf16 %v3732_v10  ;;  %v2739_v0 = vunpack.i.l.bf16 %v3732_v10 }
  0xf4   : > { %3027 = vrot.lane.b32.xlu0 %v3001_v7, %s3204_s30  ;;  %v3747_v7 = vpack.i.bf16 %v552_v49, %v551_v56  ;;  %v1617_v49 = vsel %vm183_vm0, %v304_v54, %v2539_v51  ;;  %v1652_v54 = vsel %vm1649_vm3, %v1619_v22, %v2624_v17  ;;  %v1653_v56 = vsel %vm1649_vm3, %v1620_v52, %v2625_v29 }
  0xf5   : > { %v2743_v46 = vpop.permute.xlu1 %2742  ;;  %v1650_v50 = vsel %vm1649_vm3, %v1617_v49, %v2619_v1  ;;  %v1684_v51 = vsel %vm1682_vm4, %v1651_v24, %v2700_v32  ;;  %v1685_v1 = vsel %vm1682_vm4, %v1652_v54, %v2704_v25  ;;  %v1686_v17 = vsel %vm1682_vm4, %v1653_v56, %v2705_v59 }
  0xf6   : > { %v2748_v36 = vpop.permute.xlu0 %2747  ;;  %v1683_v8 = vsel %vm1682_vm4, %v1650_v50, %v2699_v23  ;;  %v2745_v60 = vunpack.i.h.bf16 %v2743_v46  ;;  %v2744_v42 = vunpack.i.l.bf16 %v2743_v46  ;;  %v1717_v3 = vsel %vm1715_vm5, %v1684_v51, %v2735_v35 }
  0xf7   : > { %3032 = vrot.lane.b32.xlu1 %v3736_v55, %s3204_s30  ;;  %v2749_v57 = vunpack.i.l.bf16 %v2748_v36  ;;  %v1718_v59 = vsel %vm1715_vm5, %v1685_v1, %v2739_v0  ;;  %v1719_v46 = vsel %vm1715_vm5, %v1686_v17, %v2740_v9 }
  0xf8   : > { %3037 = vrot.lane.b32.xlu0 %v3011_v53, %s3205_s4  ;;  %v2734_v53 = vunpack.i.l.bf16 %v3730_v61  ;;  %v2750_v61 = vunpack.i.h.bf16 %v2748_v36 }
  0xf9   : > { %v2753_v58 = vpop.permute.xlu1 %2752  ;;  %v1751_v54 = vsel %vm1748_vm6, %v1718_v59, %v2749_v57 }
  0xfa   : > { %v2758_v63 = vpop.permute.xlu0 %2757  ;;  %v2755_v32 = vunpack.i.h.bf16 %v2753_v58  ;;  %v2754_v29 = vunpack.i.l.bf16 %v2753_v58  ;;  %v1716_v10 = vsel %vm1715_vm5, %v1683_v8, %v2734_v53  ;;  %v1752_v56 = vsel %vm1748_vm6, %v1719_v46, %v2750_v61 }
  0xfb   : > { %3042 = vrot.lane.b32.xlu1 %v3747_v7, %s3205_s4  ;;  %v2760_v49 = vunpack.i.h.bf16 %v2758_v63  ;;  %v2759_v22 = vunpack.i.l.bf16 %v2758_v63  ;;  %v1749_v36 = vsel %vm1748_vm6, %v1716_v10, %v2744_v42  ;;  %v491_v10 = vld [vmem:[#allocation2 + $0x15a] sm:$0xff] }
  0xfc   : > { %3047 = vrot.lane.b32.xlu0 %v3726_v62, %s3206_s5  ;;  %v1750_v62 = vsel %vm1748_vm6, %v1717_v3, %v2745_v60  ;;  %v1782_v35 = vsel %vm1781_vm7, %v1749_v36, %v2754_v29  ;;  %v587_v36 = vld [vmem:[#allocation2 + $0x16a] sm:$0xff] }
  0xfd   : > { %v2763_v23 = vpop.permute.xlu1 %2762  ;;  %v1783_v53 = vsel %vm1781_vm7, %v1750_v62, %v2755_v32  ;;  %v1784_v8 = vsel %vm1781_vm7, %v1751_v54, %v2759_v22  ;;  %v1785_v51 = vsel %vm1781_vm7, %v1752_v56, %v2760_v49  ;;  %v2550_v62 = vunpack.i.h.bf16 %v3561_v37  ;;  %v430_v54 = vld [vmem:[#allocation2 + $0x180] sm:$0xff]  ;;  %v431_v56 = vld [vmem:[#allocation2 + $0x188] sm:$0xff] }
  0xfe   : > { %v2768_v25 = vpop.permute.xlu0 %2767  ;;  %v2765_v52 = vunpack.i.h.bf16 %v2763_v23  ;;  %v2764_v24 = vunpack.i.l.bf16 %v2763_v23  ;;  %v490_v23 = vld [vmem:[#allocation2 + $0x152] sm:$0xff] }
  0xff   : > { %3052 = vrot.lane.b32.xlu1 %v3749_v48, %s3206_s5  ;;  %v2770_v50 = vunpack.i.h.bf16 %v2768_v25  ;;  %v2769_v58 = vunpack.i.l.bf16 %v2768_v25 }
 0x100   : > { %3057 = vrot.lane.b32.xlu0 %v3736_v55, %s3201_s21  ;;  %v1815_v55 = vsel %vm1814_vm8, %v1782_v35, %v2764_v24  ;;  %v1816_v42 = vsel %vm1814_vm8, %v1783_v53, %v2765_v52  ;;  %v555_v52 = vld [vmem:[#allocation2 + $0x169] sm:$0xff]  ;;  %v556_v24 = vld [vmem:[#allocation2 + $0x171] sm:$0xff]  ;;  %v2555_v35 = vunpack.i.h.bf16 %v3569_v39  ;;  %v2554_v53 = vunpack.i.l.bf16 %v3569_v39 }
 0x101   : > { %v2773_v63 = vpop.permute.xlu1 %2772  ;;  %v1817_v61 = vsel %vm1814_vm8, %v1784_v8, %v2769_v58  ;;  %v1818_v57 = vsel %vm1814_vm8, %v1785_v51, %v2770_v50  ;;  %v2549_v50 = vunpack.i.l.bf16 %v3561_v37  ;;  %v588_v58 = vld [vmem:[#allocation2 + $0x172] sm:$0xff]  ;;  %v2629_v8 = vunpack.i.l.bf16 %v3627_v4 }
 0x102   : > { %v2775_v9 = vunpack.i.h.bf16 %v2773_v63  ;;  %v2774_v0 = vunpack.i.l.bf16 %v2773_v63  ;;  %v2778_v1 = vpop.permute.xlu0 %2777  ;;  %v2630_v63 = vunpack.i.h.bf16 %v3627_v4  ;;  %v2634_v37 = vunpack.i.l.bf16 %v3632_v44 }
 0x103   : > { %v2780_v17 = vunpack.i.h.bf16 %v2778_v1  ;;  %v2779_v60 = vunpack.i.l.bf16 %v2778_v1  ;;  %3062 = vrot.lane.b32.xlu1 %v3757_v2, %s3201_s21  ;;  %v3838_v1 = vpack.i.bf16 %v556_v24, %v555_v52  ;;  %v2709_v39 = vunpack.i.l.bf16 %v3710_v33 }
 0x104   : > { %3067 = vrot.lane.b32.xlu0 %v3747_v7, %s3202_s24  ;;  %v1848_v32 = vsel %vm1847_vm9, %v1815_v55, %v2774_v0  ;;  %v1849_v29 = vsel %vm1847_vm9, %v1816_v42, %v2775_v9  ;;  %v3821_v7 = vpack.i.bf16 %v491_v10, %v490_v23  ;;  %v2635_v9 = vunpack.i.h.bf16 %v3632_v44 }
 0x105   : > { %v1850_v3 = vsel %vm1847_vm9, %v1817_v61, %v2779_v60  ;;  %v1851_v49 = vsel %vm1847_vm9, %v1818_v57, %v2780_v17  ;;  %v3814_v22 = vpop.permute.xlu1 %2782  ;;  %v1880_v25 = vpack.c.bf16 %v1849_v29, %v1848_v32  ;;  %v2710_v17 = vunpack.i.h.bf16 %v3710_v33 }
 0x106   : > { %v1881_v59 = vpack.c.bf16 %v1851_v49, %v1850_v3  ;;  %v3816_v46 = vpop.permute.xlu0 %2787  ;;  %v3844_v4 = vpack.i.bf16 %v588_v58, %v587_v36  ;;  %v3846_v60 = vpack.i.bf16 %v431_v56, %v430_v54  ;;  %v1621_v44 = vsel %vm183_vm0, %v3469_v12, %v2549_v50 }
 0x107   : > { %3072 = vrot.lane.b32.xlu1 %v3759_v26, %s3202_s24  ;;  %2479 = vmatprep.mubr.msk.bf16.mxu0 %vm1916_vm10, %v1880_v25  ;;  %v2714_v55 = vunpack.i.l.bf16 %v3715_v43  ;;  %v1624_v33 = vsel %vm183_vm0, %v3475_v15, %v2555_v35  ;;  %v1623_v42 = vsel %vm183_vm0, %v3473_v14, %v2554_v53  ;;  %v1654_v12 = vsel %vm1649_vm3, %v1621_v44, %v2629_v8 }
 0x108   : > { %3077 = vrot.lane.b32.xlu0 %v3749_v48, %s3203_s27  ;;  %2480 = vmatmul.mubr.msk.bf16.vlgmr.msra.gmra.mrb[0].mxu0 %vm1916_vm10, %v1881_v59  ;;  %v3836_v48 = vpack.i.bf16 %v3684_v34, %v3682_v31  ;;  %v1622_v31 = vsel %vm183_vm0, %v3471_v13, %v2550_v62  ;;  %v2715_v34 = vunpack.i.h.bf16 %v3715_v43  ;;  %v1657_v13 = vsel %vm1649_vm3, %v1624_v33, %v2635_v9 }
 0x109   : > { %v2793_v51 = vpop.permute.xlu1 %2792  ;;  %v1655_v61 = vsel %vm1649_vm3, %v1622_v31, %v2630_v63  ;;  %v1656_v32 = vsel %vm1649_vm3, %v1623_v42, %v2634_v37  ;;  %v2785_v43 = vunpack.i.h.bf16 %v3814_v22  ;;  %v2784_v29 = vunpack.i.l.bf16 %v3814_v22 }
 0x10a   : > { %v2798_v0 = vpop.permute.xlu0 %2797  ;;  %v1687_v23 = vsel %vm1682_vm4, %v1654_v12, %v2709_v39  ;;  %v1688_v15 = vsel %vm1682_vm4, %v1655_v61, %v2710_v17  ;;  %v2790_v14 = vunpack.i.h.bf16 %v3816_v46  ;;  %v2789_v10 = vunpack.i.l.bf16 %v3816_v46 }
 0x10b   : > { %3082 = vrot.lane.b32.xlu1 %v3821_v7, %s3203_s27  ;;  %v1689_v3 = vsel %vm1682_vm4, %v1656_v32, %v2714_v55  ;;  %v1690_v49 = vsel %vm1682_vm4, %v1657_v13, %v2715_v34  ;;  %v2795_v25 = vunpack.i.h.bf16 %v2793_v51  ;;  %v2794_v59 = vunpack.i.l.bf16 %v2793_v51 }
 0x10c   : > { %3087 = vrot.lane.b32.xlu0 %v3757_v2, %s3204_s30  ;;  %v2800_v22 = vunpack.i.h.bf16 %v2798_v0  ;;  %v2799_v52 = vunpack.i.l.bf16 %v2798_v0  ;;  %v1720_v50 = vsel %vm1715_vm5, %v1687_v23, %v2784_v29  ;;  %v1721_v46 = vsel %vm1715_vm5, %v1688_v15, %v2785_v43  ;;  %v462_v23 = vld [vmem:[#allocation2 + $0x181] sm:$0xff]  ;;  %v463_v15 = vld [vmem:[#allocation2 + $0x189] sm:$0xff] }
 0x10d   : > { %v2803_v57 = vpop.permute.xlu1 %2802  ;;  %v1723_v35 = vsel %vm1715_vm5, %v1690_v49, %v2790_v14  ;;  %v1722_v53 = vsel %vm1715_vm5, %v1689_v3, %v2789_v10  ;;  %v1754_v51 = vsel %vm1748_vm6, %v1721_v46, %v2795_v25  ;;  %v3920_v46 = vld [vmem:[#allocation2 + $0x199] sm:$0xff] }
 0x10e   : > { %v2808_v2 = vpop.permute.xlu0 %2807  ;;  %v2805_v24 = vunpack.i.h.bf16 %v2803_v57  ;;  %v2804_v36 = vunpack.i.l.bf16 %v2803_v57  ;;  %v1755_v0 = vsel %vm1748_vm6, %v1722_v53, %v2799_v52  ;;  %v1756_v17 = vsel %vm1748_vm6, %v1723_v35, %v2800_v22  ;;  %v494_v22 = vld [vmem:[#allocation2 + $0x182] sm:$0xff] }
 0x10f   : > { %3092 = vrot.lane.b32.xlu1 %v3836_v48, %s3204_s30  ;;  %v2810_v58 = vunpack.i.h.bf16 %v2808_v2  ;;  %v2809_v54 = vunpack.i.l.bf16 %v2808_v2  ;;  %v2560_v52 = vunpack.i.h.bf16 %v3571_v28  ;;  %v2640_v35 = vunpack.i.h.bf16 %v3634_v5 }
 0x110   : > { %3097 = vrot.lane.b32.xlu0 %v3759_v26, %s3205_s4  ;;  %v1753_v26 = vsel %vm1748_vm6, %v1720_v50, %v2794_v59  ;;  %v1787_v44 = vsel %vm1781_vm7, %v1754_v51, %v2805_v24  ;;  %v495_v24 = vld [vmem:[#allocation2 + $0x18a] sm:$0xff]  ;;  %v2559_v50 = vunpack.i.l.bf16 %v3571_v28  ;;  %v2639_v53 = vunpack.i.l.bf16 %v3634_v5  ;;  %v3930_v28 = vld [vmem:[#allocation2 + $0x1a2] sm:$0xff] }
 0x111   : > { %v2813_v62 = vpop.permute.xlu1 %2812  ;;  %v1786_v39 = vsel %vm1781_vm7, %v1753_v26, %v2804_v36  ;;  %v1788_v34 = vsel %vm1781_vm7, %v1755_v0, %v2809_v54  ;;  %v1789_v55 = vsel %vm1781_vm7, %v1756_v17, %v2810_v58  ;;  %v3914_v36 = vld [vmem:[#allocation2 + $0x198] sm:$0xff]  ;;  %v3922_v58 = vld [vmem:[#allocation2 + $0x1a1] sm:$0xff]  ;;  %v2565_v54 = vunpack.i.h.bf16 %v3577_v30 }
 0x112   : > { %v2818_v56 = vpop.permute.xlu0 %2817  ;;  %v2815_v63 = vunpack.i.h.bf16 %v2813_v62  ;;  %v2814_v8 = vunpack.i.l.bf16 %v2813_v62  ;;  %v528_v62 = vld [vmem:[#allocation2 + $0x1a0] sm:$0xff]  ;;  %v2644_v26 = vunpack.i.l.bf16 %v3640_v6  ;;  %v2720_v0 = vunpack.i.h.bf16 %v3717_v41 }
 0x113   : > { %3102 = vrot.lane.b32.xlu1 %v3838_v1, %s3205_s4  ;;  %v2820_v9 = vunpack.i.h.bf16 %v2818_v56  ;;  %v2819_v37 = vunpack.i.l.bf16 %v2818_v56  ;;  %v2564_v56 = vunpack.i.l.bf16 %v3577_v30  ;;  %v1626_v30 = vsel %vm183_vm0, %v3485_v19, %v2560_v52 }
 0x114   : > { %3107 = vrot.lane.b32.xlu0 %v3821_v7, %s3206_s5  ;;  %v1819_v12 = vsel %vm1814_vm8, %v1786_v39, %v2814_v8  ;;  %v1820_v7 = vsel %vm1814_vm8, %v1787_v44, %v2815_v63  ;;  %v3928_v8 = vld [vmem:[#allocation2 + $0x19a] sm:$0xff]  ;;  %v2719_v5 = vunpack.i.l.bf16 %v3717_v41  ;;  %v3161_v17 = vpack.i.bf16 %v3922_v58, %v3920_v46 }
 0x115   : > { %v2823_v31 = vpop.permute.xlu1 %2822  ;;  %v1821_v32 = vsel %vm1814_vm8, %v1788_v34, %v2819_v37  ;;  %v1822_v43 = vsel %vm1814_vm8, %v1789_v55, %v2820_v9  ;;  %v3934_v9 = vpack.i.bf16 %v495_v24, %v494_v22  ;;  %v3151_v37 = vpack.i.bf16 %v528_v62, %v3914_v36 }
 0x116   : > { %v2825_v33 = vunpack.i.h.bf16 %v2823_v31  ;;  %v2824_v42 = vunpack.i.l.bf16 %v2823_v31  ;;  %v2828_v61 = vpop.permute.xlu0 %2827  ;;  %v2725_v39 = vunpack.i.h.bf16 %v3721_v40  ;;  %v2724_v44 = vunpack.i.l.bf16 %v3721_v40 }
 0x117   : > { %v2830_v57 = vunpack.i.h.bf16 %v2828_v61  ;;  %v2829_v13 = vunpack.i.l.bf16 %v2828_v61  ;;  %3112 = vrot.lane.b32.xlu1 %v3844_v4, %s3206_s5  ;;  %v3171_v19 = vpack.i.bf16 %v3930_v28, %v3928_v8  ;;  %v1628_v41 = vsel %vm183_vm0, %v3489_v21, %v2565_v54 }
 0x118   : > { %v1852_v29 = vsel %vm1847_vm9, %v1819_v12, %v2824_v42  ;;  %v1853_v2 = vsel %vm1847_vm9, %v1820_v7, %v2825_v33  ;;  %3117 = vrot.lane.b32.xlu0 %v3836_v48, %s3201_s21  ;;  %v3912_v48 = vpack.i.bf16 %v463_v15, %v462_v23  ;;  %v1627_v31 = vsel %vm183_vm0, %v3487_v20, %v2564_v56 }
 0x119   : > { %v1882_v14 = vpack.c.bf16 %v1853_v2, %v1852_v29  ;;  %v1854_v10 = vsel %vm1847_vm9, %v1821_v32, %v2829_v13  ;;  %v1855_v3 = vsel %vm1847_vm9, %v1822_v43, %v2830_v57  ;;  %v3904_v49 = vpop.permute.xlu1 %2832  ;;  %v1660_v40 = vsel %vm1649_vm3, %v1627_v31, %v2644_v26 }
 0x11a   : > { %v1883_v25 = vpack.c.bf16 %v1855_v3, %v1854_v10  ;;  %v3906_v59 = vpop.permute.xlu0 %2837  ;;  %v2834_v42 = vunpack.i.l.bf16 %v3904_v49  ;;  %v1693_v57 = vsel %vm1682_vm4, %v1660_v40, %v2724_v44  ;;  %v2655_v8 = vunpack.i.h.bf16 %v3647_v16 }
 0x11b   : > { %3122 = vrot.lane.b32.xlu1 %v3846_v60, %s3201_s21  ;;  %2483 = vmatprep.mubr.msk.bf16.mxu0 %vm1916_vm10, %v1882_v14  ;;  %v2840_v20 = vunpack.i.h.bf16 %v3906_v59  ;;  %v2839_v7 = vunpack.i.l.bf16 %v3906_v59  ;;  %v2654_v28 = vunpack.i.l.bf16 %v3647_v16  ;;  %v3179_v16 = vld [vmem:[#allocation2 + $0xa8] sm:$0xff] }
 0x11c   : > { %3127 = vrot.lane.b32.xlu0 %v3838_v1, %s3202_s24  ;;  %2484 = vmatmul.mubr.msk.bf16.gmra.mrb[4].mxu0 %vm1916_vm10, %v1883_v25  ;;  %v2645_v1 = vunpack.i.h.bf16 %v3640_v6  ;;  %v1625_v6 = vsel %vm183_vm0, %v3483_v18, %v2559_v50  ;;  %v1659_v18 = vsel %vm1649_vm3, %v1626_v30, %v2640_v35 }
 0x11d   : > { %v2843_v63 = vpop.permute.xlu1 %2842  ;;  %v1658_v34 = vsel %vm1649_vm3, %v1625_v6, %v2639_v53  ;;  %v1692_v21 = vsel %vm1682_vm4, %v1659_v18, %v2720_v0  ;;  %v1726_v52 = vsel %vm1715_vm5, %v1693_v57, %v2839_v7 }
 0x11e   : > { %v2848_v51 = vpop.permute.xlu0 %2847  ;;  %v1661_v33 = vsel %vm1649_vm3, %v1628_v41, %v2645_v1  ;;  %v1691_v12 = vsel %vm1682_vm4, %v1658_v34, %v2719_v5  ;;  %v2845_v32 = vunpack.i.h.bf16 %v2843_v63  ;;  %v2844_v43 = vunpack.i.l.bf16 %v2843_v63 }
 0x11f   : > { %3132 = vrot.lane.b32.xlu1 %v3912_v48, %s3202_s24  ;;  %v1694_v13 = vsel %vm1682_vm4, %v1661_v33, %v2725_v39  ;;  %v2850_v29 = vunpack.i.h.bf16 %v2848_v51  ;;  %v2849_v2 = vunpack.i.l.bf16 %v2848_v51  ;;  %v1724_v10 = vsel %vm1715_vm5, %v1691_v12, %v2834_v42 }
 0x120   : > { %3137 = vrot.lane.b32.xlu0 %v3844_v4, %s3203_s27  ;;  %v2835_v4 = vunpack.i.h.bf16 %v3904_v49  ;;  %v1727_v22 = vsel %vm1715_vm5, %v1694_v13, %v2840_v20  ;;  %v2575_v42 = vunpack.i.h.bf16 %v3583_v45  ;;  %v2574_v12 = vunpack.i.l.bf16 %v3583_v45 }
 0x121   : > { %v2853_v55 = vpop.permute.xlu1 %2852  ;;  %v1759_v58 = vsel %vm1748_vm6, %v1726_v52, %v2849_v2  ;;  %v1760_v54 = vsel %vm1748_vm6, %v1727_v22, %v2850_v29  ;;  %v2649_v20 = vunpack.i.l.bf16 %v3642_v11 }
 0x122   : > { %v2858_v61 = vpop.permute.xlu0 %2857  ;;  %v2855_v23 = vunpack.i.h.bf16 %v2853_v55  ;;  %v2854_v15 = vunpack.i.l.bf16 %v2853_v55  ;;  %v1725_v3 = vsel %vm1715_vm5, %v1692_v21, %v2835_v4  ;;  %v2569_v4 = vunpack.i.l.bf16 %v3579_v47 }
 0x123   : > { %3142 = vrot.lane.b32.xlu1 %v3934_v9, %s3203_s27  ;;  %v2860_v49 = vunpack.i.h.bf16 %v2858_v61  ;;  %v2859_v25 = vunpack.i.l.bf16 %v2858_v61  ;;  %v1758_v62 = vsel %vm1748_vm6, %v1725_v3, %v2845_v32  ;;  %v2650_v21 = vunpack.i.h.bf16 %v3642_v11  ;;  %v4403_v32 = vld [vmem:[#allocation4_spill] sm:$0xff] }
 0x124   : > { %3147 = vrot.lane.b32.xlu0 %v3846_v60, %s3204_s30  ;;  %v1757_v60 = vsel %vm1748_vm6, %v1724_v10, %v2844_v43  ;;  %v1791_v35 = vsel %vm1781_vm7, %v1758_v62, %v2855_v23  ;;  %v1632_v45 = vsel %vm183_vm0, %v4403_v32, %v2575_v42  ;;  %v2730_v43 = vunpack.i.h.bf16 %v3723_v38 }
 0x125   : > { %v2863_v14 = vpop.permute.xlu1 %2862  ;;  %v1790_v56 = vsel %vm1781_vm7, %v1757_v60, %v2854_v15  ;;  %v1792_v63 = vsel %vm1781_vm7, %v1759_v58, %v2859_v25  ;;  %v1793_v1 = vsel %vm1781_vm7, %v1760_v54, %v2860_v49  ;;  %v1665_v3 = vsel %vm1649_vm3, %v1632_v45, %v2655_v8 }
 0x126   : > { %v2868_v59 = vpop.permute.xlu0 %2867  ;;  %v2865_v24 = vunpack.i.h.bf16 %v2863_v14  ;;  %v2864_v36 = vunpack.i.l.bf16 %v2863_v14  ;;  %v1631_v14 = vsel %vm183_vm0, %v3179_v16, %v2574_v12 }
 0x127   : > { %3152 = vrot.lane.b32.xlu1 %v3151_v37, %s3204_s30  ;;  %v2870_v50 = vunpack.i.h.bf16 %v2868_v59  ;;  %v2869_v46 = vunpack.i.l.bf16 %v2868_v59  ;;  %v1664_v49 = vsel %vm1649_vm3, %v1631_v14, %v2654_v28 }
 0x128   : > { %3157 = vrot.lane.b32.xlu0 %v3912_v48, %s3205_s4  ;;  %v1823_v30 = vsel %vm1814_vm8, %v1790_v56, %v2864_v36  ;;  %v1824_v48 = vsel %vm1814_vm8, %v1791_v35, %v2865_v24 }
 0x129   : > { %v2873_v53 = vpop.permute.xlu1 %2872  ;;  %v1825_v6 = vsel %vm1814_vm8, %v1792_v63, %v2869_v46  ;;  %v1826_v39 = vsel %vm1814_vm8, %v1793_v1, %v2870_v50 }
 0x12a   : > { %v2875_v26 = vunpack.i.h.bf16 %v2873_v53  ;;  %v2874_v51 = vunpack.i.l.bf16 %v2873_v53  ;;  %v2878_v37 = vpop.permute.xlu0 %2877 }
 0x12b   : > { %v2880_v0 = vunpack.i.h.bf16 %v2878_v37  ;;  %v2879_v5 = vunpack.i.l.bf16 %v2878_v37  ;;  %3162 = vrot.lane.b32.xlu1 %v3161_v17, %s3205_s4 }
 0x12c   : > { %v1856_v44 = vsel %vm1847_vm9, %v1823_v30, %v2874_v51  ;;  %v1857_v41 = vsel %vm1847_vm9, %v1824_v48, %v2875_v26  ;;  %3167 = vrot.lane.b32.xlu0 %v3934_v9, %s3206_s5  ;;  %v2570_v9 = vunpack.i.h.bf16 %v3579_v47  ;;  %v4402_v47 = vld [vmem:[#allocation3_spill] sm:$0xff] }
 0x12d   : > { %v1884_v31 = vpack.c.bf16 %v1857_v41, %v1856_v44  ;;  %v1858_v34 = vsel %vm1847_vm9, %v1825_v6, %v2879_v5  ;;  %v1859_v18 = vsel %vm1847_vm9, %v1826_v39, %v2880_v0  ;;  %v2883_v55 = vpop.permute.xlu1 %2882  ;;  %v1629_v13 = vsel %vm183_vm0, %v4402_v47, %v2569_v4 }
 0x12e   : > { %v1885_v33 = vpack.c.bf16 %v1859_v18, %v1858_v34  ;;  %v2888_v40 = vpop.permute.xlu0 %2887  ;;  %v1630_v57 = vsel %vm183_vm0, %v3499_v27, %v2570_v9  ;;  %v2885_v11 = vunpack.i.h.bf16 %v2883_v55  ;;  %v2884_v2 = vunpack.i.l.bf16 %v2883_v55 }
 0x12f   : > { %3172 = vrot.lane.b32.xlu1 %v3171_v19, %s3206_s5  ;;  %2487 = vmatprep.mubr.msk.bf16.mxu0 %vm1916_vm10, %v1884_v31  ;;  %v2729_v19 = vunpack.i.l.bf16 %v3723_v38  ;;  %v2890_v23 = vunpack.i.h.bf16 %v2888_v40  ;;  %v2889_v15 = vunpack.i.l.bf16 %v2888_v40  ;;  %v1662_v10 = vsel %vm1649_vm3, %v1629_v13, %v2649_v20 }
 0x130   : > { %2488 = vmatmul.mubr.msk.bf16.gmra.mrb[8].mxu0 %vm1916_vm10, %v1885_v33  ;;  %v1663_v27 = vsel %vm1649_vm3, %v1630_v57, %v2650_v21  ;;  %v1697_v50 = vsel %vm1682_vm4, %v1664_v49, %v2884_v2  ;;  %v1698_v46 = vsel %vm1682_vm4, %v1665_v3, %v2885_v11  ;;  %v4407_v49 = vld [vmem:[#allocation14_spill] sm:$0xff] }
 0x131   : > { %v2893_v17 = vpop.permute.xlu1 %2892  ;;  %v1695_v25 = vsel %vm1682_vm4, %v1662_v10, %v2729_v19  ;;  %v1696_v52 = vsel %vm1682_vm4, %v1663_v27, %v2730_v43  ;;  %v4406_v10 = vld [vmem:[#allocation13_spill] sm:$0xff] }
 0x132   : > { %v2898_v61 = vpop.permute.xlu0 %2897  ;;  %v2894_v24 = vunpack.i.l.bf16 %v2893_v17  ;;  %v1728_v58 = vsel %vm1715_vm5, %v1695_v25, %v2889_v15  ;;  %v1729_v54 = vsel %vm1715_vm5, %v1696_v52, %v2890_v23  ;;  %v2895_v56 = vunpack.i.h.bf16 %v2893_v17  ;;  %v4405_v23 = vld [vmem:[#allocation6_spill] sm:$0xff] }
 0x133   : > { %v2900_v59 = vunpack.i.h.bf16 %v2898_v61  ;;  %v2899_v38 = vunpack.i.l.bf16 %v2898_v61  ;;  %v2585_v15 = vunpack.i.h.bf16 %v4405_v23  ;;  %v2584_v14 = vunpack.i.l.bf16 %v4405_v23  ;;  %v3180_v52 = vld [vmem:[#allocation2 + $0xc8] sm:$0xff] }
 0x134   : > { %v1730_v48 = vsel %vm1715_vm5, %v1697_v50, %v2894_v24  ;;  %v1731_v18 = vsel %vm1715_vm5, %v1698_v46, %v2895_v56  ;;  %v2660_v27 = vunpack.i.h.bf16 %v4406_v10  ;;  %v2659_v3 = vunpack.i.l.bf16 %v4406_v10 }
 0x135   : > { %v2903_v7 = vpop.permute.xlu1 %2902  ;;  %v1761_v1 = vsel %vm1748_vm6, %v1728_v58, %v2899_v38  ;;  %v1762_v26 = vsel %vm1748_vm6, %v1729_v54, %v2900_v59  ;;  %v2665_v25 = vunpack.i.h.bf16 %v4407_v49  ;;  %v2664_v59 = vunpack.i.l.bf16 %v4407_v49 }
 0x136   : > { %v2908_v29 = vpop.permute.xlu0 %2907  ;;  %v2904_v35 = vunpack.i.l.bf16 %v2903_v7  ;;  %v2905_v51 = vunpack.i.h.bf16 %v2903_v7 }
 0x137   : > { %v2910_v36 = vunpack.i.h.bf16 %v2908_v29  ;;  %v2909_v60 = vunpack.i.l.bf16 %v2908_v29  ;;  %v4404_v29 = vld [vmem:[#allocation5_spill] sm:$0xff] }
 0x138   : > { %v1763_v55 = vsel %vm1748_vm6, %v1730_v48, %v2904_v35  ;;  %v1764_v17 = vsel %vm1748_vm6, %v1731_v18, %v2905_v51  ;;  %v2580_v11 = vunpack.i.h.bf16 %v4404_v29  ;;  %v2579_v2 = vunpack.i.l.bf16 %v4404_v29 }
 0x139   : > { %v2913_v22 = vpop.permute.xlu1 %2912  ;;  %v1794_v0 = vsel %vm1781_vm7, %v1761_v1, %v2909_v60  ;;  %v1795_v5 = vsel %vm1781_vm7, %v1762_v26, %v2910_v36  ;;  %v3181_v36 = vld [vmem:[#allocation2 + $0xc0] sm:$0xff] }
 0x13a   : > { %v2918_v62 = vpop.permute.xlu0 %2917  ;;  %v2914_v37 = vunpack.i.l.bf16 %v2913_v22  ;;  %v2915_v6 = vunpack.i.h.bf16 %v2913_v22  ;;  %v1634_v24 = vsel %vm183_vm0, %v3180_v52, %v2580_v11  ;;  %v1633_v60 = vsel %vm183_vm0, %v3181_v36, %v2579_v2 }
 0x13b   : > { %v2920_v53 = vunpack.i.h.bf16 %v2918_v62  ;;  %v2919_v63 = vunpack.i.l.bf16 %v2918_v62  ;;  %v4408_v62 = vld [vmem:[#allocation12_spill] sm:$0xff]  ;;  %v1666_v26 = vsel %vm1649_vm3, %v1633_v60, %v2659_v3  ;;  %v1667_v51 = vsel %vm1649_vm3, %v1634_v24, %v2660_v27 }
 0x13c   : > { %v1796_v9 = vsel %vm1781_vm7, %v1763_v55, %v2914_v37  ;;  %v1797_v12 = vsel %vm1781_vm7, %v1764_v17, %v2915_v6  ;;  %v1636_v50 = vsel %vm183_vm0, %v4408_v62, %v2585_v15 }
 0x13d   : > { %v2923_v30 = vpop.permute.xlu1 %2922  ;;  %v1827_v33 = vsel %vm1814_vm8, %v1794_v0, %v2919_v63  ;;  %v1828_v40 = vsel %vm1814_vm8, %v1795_v5, %v2920_v53  ;;  %v4409_v63 = vld [vmem:[#allocation11_spill] sm:$0xff]  ;;  %v1669_v37 = vsel %vm1649_vm3, %v1636_v50, %v2665_v25 }
 0x13e   : > { %v2928_v39 = vpop.permute.xlu0 %2927  ;;  %v2925_v44 = vunpack.i.h.bf16 %v2923_v30  ;;  %v2924_v41 = vunpack.i.l.bf16 %v2923_v30  ;;  %v1635_v1 = vsel %vm183_vm0, %v4409_v63, %v2584_v14 }
 0x13f   : > { %v2930_v31 = vunpack.i.h.bf16 %v2928_v39  ;;  %v2929_v34 = vunpack.i.l.bf16 %v2928_v39  ;;  %v1668_v30 = vsel %vm1649_vm3, %v1635_v1, %v2664_v59 }
 0x140   : > { %v1829_v19 = vsel %vm1814_vm8, %v1796_v9, %v2924_v41  ;;  %v1830_v7 = vsel %vm1814_vm8, %v1797_v12, %v2925_v44 }
 0x141   : > { %v1860_v4 = vsel %vm1847_vm9, %v1827_v33, %v2929_v34  ;;  %v1861_v42 = vsel %vm1847_vm9, %v1828_v40, %v2930_v31  ;;  %v2933_v61 = vpop.permute.xlu1 %2932 }
 0x142   : > { %v1886_v21 = vpack.c.bf16 %v1861_v42, %v1860_v4  ;;  %v2935_v20 = vunpack.i.h.bf16 %v2933_v61  ;;  %v2934_v8 = vunpack.i.l.bf16 %v2933_v61  ;;  %v2938_v28 = vpop.permute.xlu0 %2937 }
 0x143   : > { %v2939_v38 = vunpack.i.l.bf16 %v2938_v28  ;;  %v2940_v46 = vunpack.i.h.bf16 %v2938_v28 }
 0x144   : > { %v1862_v57 = vsel %vm1847_vm9, %v1829_v19, %v2934_v8  ;;  %v1863_v47 = vsel %vm1847_vm9, %v1830_v7, %v2935_v20  ;;  %2491 = vmatprep.mubr.msk.bf16.mxu0 %vm1916_vm10, %v1886_v21 }
 0x145   : > { %v1887_v13 = vpack.c.bf16 %v1863_v47, %v1862_v57  ;;  %v2943_v32 = vpop.permute.xlu1 %2942  ;;  %v1699_v48 = vsel %vm1682_vm4, %v1666_v26, %v2939_v38  ;;  %v1700_v39 = vsel %vm1682_vm4, %v1667_v51, %v2940_v46  ;;  %v4412_v26 = vld [vmem:[#allocation15_spill] sm:$0xff] }
 0x146   : > { %v2948_v45 = vpop.permute.xlu0 %2947  ;;  %v2945_v54 = vunpack.i.h.bf16 %v2943_v32  ;;  %v2944_v56 = vunpack.i.l.bf16 %v2943_v32  ;;  %v2670_v51 = vunpack.i.h.bf16 %v4412_v26 }
 0x147   : > { %2492 = vmatmul.mubr.msk.bf16.gmra.mrb[12].mxu0 %vm1916_vm10, %v1887_v13  ;;  %v2950_v35 = vunpack.i.h.bf16 %v2948_v45  ;;  %v2949_v53 = vunpack.i.l.bf16 %v2948_v45 }
 0x148   : > { %v1701_v18 = vsel %vm1682_vm4, %v1668_v30, %v2944_v56  ;;  %v1702_v55 = vsel %vm1682_vm4, %v1669_v37, %v2945_v54  ;;  %v2669_v37 = vunpack.i.l.bf16 %v4412_v26  ;;  %v4413_v30 = vld [vmem:[#allocation16_spill] sm:$0xff] }
 0x149   : > { %v2953_v43 = vpop.permute.xlu1 %2952  ;;  %v1732_v33 = vsel %vm1715_vm5, %v1699_v48, %v2949_v53  ;;  %v1733_v40 = vsel %vm1715_vm5, %v1700_v39, %v2950_v35  ;;  %v4411_v35 = vld [vmem:[#allocation8_spill] sm:$0xff]  ;;  %v2675_v48 = vunpack.i.h.bf16 %v4413_v30 }
 0x14a   : > { %v2958_v16 = vpop.permute.xlu0 %2957  ;;  %v2954_v44 = vunpack.i.l.bf16 %v2953_v43  ;;  %v2955_v17 = vunpack.i.h.bf16 %v2953_v43  ;;  %v2595_v53 = vunpack.i.h.bf16 %v4411_v35  ;;  %v2594_v1 = vunpack.i.l.bf16 %v4411_v35  ;;  %v3182_v39 = vld [vmem:[#allocation2 + $0xf8] sm:$0xff] }
 0x14b   : > { %v2960_v0 = vunpack.i.h.bf16 %v2958_v16  ;;  %v2959_v5 = vunpack.i.l.bf16 %v2958_v16 }
 0x14c   : > { %v1734_v28 = vsel %vm1715_vm5, %v1701_v18, %v2954_v44  ;;  %v1735_v29 = vsel %vm1715_vm5, %v1702_v55, %v2955_v17 }
 0x14d   : > { %v2963_v22 = vpop.permute.xlu1 %2962  ;;  %v1765_v61 = vsel %vm1748_vm6, %v1732_v33, %v2959_v5  ;;  %v1766_v12 = vsel %vm1748_vm6, %v1733_v40, %v2960_v0  ;;  %v2674_v0 = vunpack.i.l.bf16 %v4413_v30 }
 0x14e   : > { %v2968_v58 = vpop.permute.xlu0 %2967  ;;  %v2964_v9 = vunpack.i.l.bf16 %v2963_v22  ;;  %v2965_v21 = vunpack.i.h.bf16 %v2963_v22 }
 0x14f   : > { %v2970_v41 = vunpack.i.h.bf16 %v2968_v58  ;;  %v2969_v31 = vunpack.i.l.bf16 %v2968_v58  ;;  %v4410_v58 = vld [vmem:[#allocation7_spill] sm:$0xff] }
 0x150   : > { %v1767_v11 = vsel %vm1748_vm6, %v1734_v28, %v2964_v9  ;;  %v1768_v15 = vsel %vm1748_vm6, %v1735_v29, %v2965_v21  ;;  %v2590_v54 = vunpack.i.h.bf16 %v4410_v58  ;;  %v2589_v56 = vunpack.i.l.bf16 %v4410_v58 }
 0x151   : > { %v2973_v6 = vpop.permute.xlu1 %2972  ;;  %v1798_v19 = vsel %vm1781_vm7, %v1765_v61, %v2969_v31  ;;  %v1799_v7 = vsel %vm1781_vm7, %v1766_v12, %v2970_v41  ;;  %v3183_v41 = vld [vmem:[#allocation2 + $0xf0] sm:$0xff] }
 0x152   : > { %v2978_v34 = vpop.permute.xlu0 %2977  ;;  %v2974_v20 = vunpack.i.l.bf16 %v2973_v6  ;;  %v2975_v57 = vunpack.i.h.bf16 %v2973_v6  ;;  %v1638_v44 = vsel %vm183_vm0, %v3182_v39, %v2590_v54  ;;  %v1637_v31 = vsel %vm183_vm0, %v3183_v41, %v2589_v56 }
 0x153   : > { %v2980_v4 = vunpack.i.h.bf16 %v2978_v34  ;;  %v2979_v42 = vunpack.i.l.bf16 %v2978_v34  ;;  %v3184_v34 = vld [vmem:[#allocation2 + $0x110] sm:$0xff]  ;;  %v1670_v12 = vsel %vm1649_vm3, %v1637_v31, %v2669_v37  ;;  %v1671_v21 = vsel %vm1649_vm3, %v1638_v44, %v2670_v51 }
 0x154   : > { %v1800_v16 = vsel %vm1781_vm7, %v1767_v11, %v2974_v20  ;;  %v1801_v3 = vsel %vm1781_vm7, %v1768_v15, %v2975_v57  ;;  %v1640_v18 = vsel %vm183_vm0, %v3184_v34, %v2595_v53 }
 0x155   : > { %v2983_v8 = vpop.permute.xlu1 %2982  ;;  %v1831_v2 = vsel %vm1814_vm8, %v1798_v19, %v2979_v42  ;;  %v1832_v23 = vsel %vm1814_vm8, %v1799_v7, %v2980_v4  ;;  %v3185_v42 = vld [vmem:[#allocation2 + $0x108] sm:$0xff]  ;;  %v1673_v20 = vsel %vm1649_vm3, %v1640_v18, %v2675_v48 }
 0x156   : > { %v2988_v47 = vpop.permute.xlu0 %2987  ;;  %v2985_v13 = vunpack.i.h.bf16 %v2983_v8  ;;  %v2984_v32 = vunpack.i.l.bf16 %v2983_v8  ;;  %v1639_v61 = vsel %vm183_vm0, %v3185_v42, %v2594_v1 }
 0x157   : > { %v2990_v45 = vunpack.i.h.bf16 %v2988_v47  ;;  %v2989_v43 = vunpack.i.l.bf16 %v2988_v47  ;;  %v1672_v8 = vsel %vm1649_vm3, %v1639_v61, %v2674_v0 }
 0x158   : > { %v1833_v22 = vsel %vm1814_vm8, %v1800_v16, %v2984_v32  ;;  %v1834_v52 = vsel %vm1814_vm8, %v1801_v3, %v2985_v13 }
 0x159   : > { %v2993_v14 = vpop.permute.xlu1 %2992  ;;  %v1864_v10 = vsel %vm1847_vm9, %v1831_v2, %v2989_v43  ;;  %v1865_v27 = vsel %vm1847_vm9, %v1832_v23, %v2990_v45 }
 0x15a   : > { %v2995_v49 = vunpack.i.h.bf16 %v2993_v14  ;;  %v2994_v25 = vunpack.i.l.bf16 %v2993_v14  ;;  %v2998_v59 = vpop.permute.xlu0 %2997  ;;  %v1888_v38 = vpack.c.bf16 %v1865_v27, %v1864_v10 }
 0x15b   : > { %v2999_v5 = vunpack.i.l.bf16 %v2998_v59  ;;  %v3000_v55 = vunpack.i.h.bf16 %v2998_v59 }
 0x15c   : > { %v1866_v24 = vsel %vm1847_vm9, %v1833_v22, %v2994_v25  ;;  %v1867_v36 = vsel %vm1847_vm9, %v1834_v52, %v2995_v49  ;;  %2495 = vmatprep.mubr.msk.bf16.mxu1 %vm1916_vm10, %v1888_v38 }
 0x15d   : > { %v1889_v60 = vpack.c.bf16 %v1867_v36, %v1866_v24  ;;  %v3003_v62 = vpop.permute.xlu1 %3002  ;;  %v1703_v28 = vsel %vm1682_vm4, %v1670_v12, %v2999_v5  ;;  %v1704_v47 = vsel %vm1682_vm4, %v1671_v21, %v3000_v55  ;;  %v4416_v12 = vld [vmem:[#allocation17_spill] sm:$0xff] }
 0x15e   : > { %v3008_v50 = vpop.permute.xlu0 %3007  ;;  %v3005_v40 = vunpack.i.h.bf16 %v3003_v62  ;;  %v3004_v17 = vunpack.i.l.bf16 %v3003_v62  ;;  %v2680_v21 = vunpack.i.h.bf16 %v4416_v12 }
 0x15f   : > { %2496 = vmatmul.mubr.msk.bf16.vlgmr.msra.gmra.mrb[0].mxu1 %vm1916_vm10, %v1889_v60  ;;  %v3010_v9 = vunpack.i.h.bf16 %v3008_v50  ;;  %v3009_v4 = vunpack.i.l.bf16 %v3008_v50 }
 0x160   : > { %v1705_v29 = vsel %vm1682_vm4, %v1672_v8, %v3004_v17  ;;  %v1706_v11 = vsel %vm1682_vm4, %v1673_v20, %v3005_v40  ;;  %v2679_v20 = vunpack.i.l.bf16 %v4416_v12  ;;  %v4417_v8 = vld [vmem:[#allocation18_spill] sm:$0xff] }
 0x161   : > { %v4096_v46 = vpop.permute.xlu1 %3012  ;;  %v1736_v2 = vsel %vm1715_vm5, %v1703_v28, %v3009_v4  ;;  %v1737_v23 = vsel %vm1715_vm5, %v1704_v47, %v3010_v9  ;;  %v4415_v9 = vld [vmem:[#allocation10_spill] sm:$0xff]  ;;  %v2685_v28 = vunpack.i.h.bf16 %v4417_v8 }
 0x162   : > { %v3018_v63 = vpop.permute.xlu0 %3017  ;;  %v3014_v13 = vunpack.i.l.bf16 %v4096_v46  ;;  %v3015_v15 = vunpack.i.h.bf16 %v4096_v46  ;;  %v2605_v4 = vunpack.i.h.bf16 %v4415_v9  ;;  %v2604_v61 = vunpack.i.l.bf16 %v4415_v9  ;;  %v3186_v47 = vld [vmem:[#allocation2 + $0x128] sm:$0xff] }
 0x163   : > { %v3020_v19 = vunpack.i.h.bf16 %v3018_v63  ;;  %v3019_v7 = vunpack.i.l.bf16 %v3018_v63 }
 0x164   : > { %v1738_v38 = vsel %vm1715_vm5, %v1705_v29, %v3014_v13  ;;  %v1739_v58 = vsel %vm1715_vm5, %v1706_v11, %v3015_v15 }
 0x165   : > { %v3023_v6 = vpop.permute.xlu1 %3022  ;;  %v1769_v27 = vsel %vm1748_vm6, %v1736_v2, %v3019_v7  ;;  %v1770_v3 = vsel %vm1748_vm6, %v1737_v23, %v3020_v19  ;;  %v2684_v19 = vunpack.i.l.bf16 %v4417_v8 }
 0x166   : > { %v3028_v33 = vpop.permute.xlu0 %3027  ;;  %v3024_v16 = vunpack.i.l.bf16 %v3023_v6  ;;  %v3025_v49 = vunpack.i.h.bf16 %v3023_v6 }
 0x167   : > { %v3030_v32 = vunpack.i.h.bf16 %v3028_v33  ;;  %v3029_v45 = vunpack.i.l.bf16 %v3028_v33  ;;  %v4414_v33 = vld [vmem:[#allocation9_spill] sm:$0xff] }
 0x168   : > { %v1771_v54 = vsel %vm1748_vm6, %v1738_v38, %v3024_v16  ;;  %v1772_v53 = vsel %vm1748_vm6, %v1739_v58, %v3025_v49  ;;  %v2600_v40 = vunpack.i.h.bf16 %v4414_v33  ;;  %v2599_v17 = vunpack.i.l.bf16 %v4414_v33 }
 0x169   : > { %v3033_v57 = vpop.permute.xlu1 %3032  ;;  %v1802_v22 = vsel %vm1781_vm7, %v1769_v27, %v3029_v45  ;;  %v1803_v52 = vsel %vm1781_vm7, %v1770_v3, %v3030_v32  ;;  %v3187_v32 = vld [vmem:[#allocation2 + $0x120] sm:$0xff] }
 0x16a   : > { %v3038_v43 = vpop.permute.xlu0 %3037  ;;  %v3034_v25 = vunpack.i.l.bf16 %v3033_v57  ;;  %v3035_v24 = vunpack.i.h.bf16 %v3033_v57  ;;  %v1642_v13 = vsel %vm183_vm0, %v3186_v47, %v2600_v40  ;;  %v1641_v45 = vsel %vm183_vm0, %v3187_v32, %v2599_v17 }
 0x16b   : > { %v3040_v14 = vunpack.i.h.bf16 %v3038_v43  ;;  %v3039_v10 = vunpack.i.l.bf16 %v3038_v43  ;;  %v3188_v43 = vld [vmem:[#allocation2 + $0x140] sm:$0xff]  ;;  %v1674_v3 = vsel %vm1649_vm3, %v1641_v45, %v2679_v20  ;;  %v1675_v49 = vsel %vm1649_vm3, %v1642_v13, %v2680_v21 }
 0x16c   : > { %v1804_v63 = vsel %vm1781_vm7, %v1771_v54, %v3034_v25  ;;  %v1805_v37 = vsel %vm1781_vm7, %v1772_v53, %v3035_v24  ;;  %v1644_v29 = vsel %vm183_vm0, %v3188_v43, %v2605_v4 }
 0x16d   : > { %v3043_v59 = vpop.permute.xlu1 %3042  ;;  %v1835_v56 = vsel %vm1814_vm8, %v1802_v22, %v3039_v10  ;;  %v1836_v35 = vsel %vm1814_vm8, %v1803_v52, %v3040_v14  ;;  %v3189_v10 = vld [vmem:[#allocation2 + $0x138] sm:$0xff]  ;;  %v1677_v25 = vsel %vm1649_vm3, %v1644_v29, %v2685_v28 }
 0x16e   : > { %v3048_v36 = vpop.permute.xlu0 %3047  ;;  %v3045_v60 = vunpack.i.h.bf16 %v3043_v59  ;;  %v3044_v62 = vunpack.i.l.bf16 %v3043_v59  ;;  %v1643_v27 = vsel %vm183_vm0, %v3189_v10, %v2604_v61 }
 0x16f   : > { %v3050_v50 = vunpack.i.h.bf16 %v3048_v36  ;;  %v3049_v46 = vunpack.i.l.bf16 %v3048_v36  ;;  %v1676_v59 = vsel %vm1649_vm3, %v1643_v27, %v2684_v19 }
 0x170   : > { %v1837_v6 = vsel %vm1814_vm8, %v1804_v63, %v3044_v62  ;;  %v1838_v39 = vsel %vm1814_vm8, %v1805_v37, %v3045_v60 }
 0x171   : > { %v1868_v1 = vsel %vm1847_vm9, %v1835_v56, %v3049_v46  ;;  %v1869_v26 = vsel %vm1847_vm9, %v1836_v35, %v3050_v50  ;;  %v3053_v51 = vpop.permute.xlu1 %3052 }
 0x172   : > { %v1890_v30 = vpack.c.bf16 %v1869_v26, %v1868_v1  ;;  %v3055_v48 = vunpack.i.h.bf16 %v3053_v51  ;;  %v3054_v0 = vunpack.i.l.bf16 %v3053_v51  ;;  %v3058_v5 = vpop.permute.xlu0 %3057 }
 0x173   : > { %v3059_v7 = vunpack.i.l.bf16 %v3058_v5  ;;  %v3060_v11 = vunpack.i.h.bf16 %v3058_v5 }
 0x174   : > { %v1870_v44 = vsel %vm1847_vm9, %v1837_v6, %v3054_v0  ;;  %v1871_v41 = vsel %vm1847_vm9, %v1838_v39, %v3055_v48  ;;  %2499 = vmatprep.mubr.msk.bf16.mxu1 %vm1916_vm10, %v1890_v30 }
 0x175   : > { %v1891_v31 = vpack.c.bf16 %v1871_v41, %v1870_v44  ;;  %v3063_v34 = vpop.permute.xlu1 %3062  ;;  %v1707_v38 = vsel %vm1682_vm4, %v1674_v3, %v3059_v7  ;;  %v1708_v36 = vsel %vm1682_vm4, %v1675_v49, %v3060_v11 }
 0x176   : > { %v3068_v18 = vpop.permute.xlu0 %3067  ;;  %v3065_v23 = vunpack.i.h.bf16 %v3063_v34  ;;  %v3064_v15 = vunpack.i.l.bf16 %v3063_v34 }
 0x177   : > { %2500 = vmatmul.mubr.msk.bf16.gmra.mrb[4].mxu1 %vm1916_vm10, %v1891_v31  ;;  %v3070_v16 = vunpack.i.h.bf16 %v3068_v18  ;;  %v3069_v14 = vunpack.i.l.bf16 %v3068_v18 }
 0x178   : > { %v1709_v58 = vsel %vm1682_vm4, %v1676_v59, %v3064_v15  ;;  %v1710_v54 = vsel %vm1682_vm4, %v1677_v25, %v3065_v23  ;;  %v4418_v25 = vld [vmem:[#allocation19_spill] sm:$0xff] }
 0x179   : > { %v4142_v55 = vpop.permute.xlu1 %3072  ;;  %v1740_v56 = vsel %vm1715_vm5, %v1707_v38, %v3069_v14  ;;  %v1741_v35 = vsel %vm1715_vm5, %v1708_v36, %v3070_v16 }
 0x17a   : > { %v3078_v42 = vpop.permute.xlu0 %3077  ;;  %v3074_v60 = vunpack.i.l.bf16 %v4142_v55  ;;  %v3075_v53 = vunpack.i.h.bf16 %v4142_v55 }
 0x17b   : > { %v3080_v22 = vunpack.i.h.bf16 %v3078_v42  ;;  %v3079_v52 = vunpack.i.l.bf16 %v3078_v42 }
 0x17c   : > { %v1742_v5 = vsel %vm1715_vm5, %v1709_v58, %v3074_v60  ;;  %v1743_v33 = vsel %vm1715_vm5, %v1710_v54, %v3075_v53  ;;  %v4420_v58 = vld [vmem:[#allocation22_spill] sm:$0xff] }
 0x17d   : > { %v3083_v57 = vpop.permute.xlu1 %3082  ;;  %v1773_v51 = vsel %vm1748_vm6, %v1740_v56, %v3079_v52  ;;  %v1774_v37 = vsel %vm1748_vm6, %v1741_v35, %v3080_v22  ;;  %v4421_v56 = vld [vmem:[#allocation21_spill] sm:$0xff] }
 0x17e   : > { %v3088_v2 = vpop.permute.xlu0 %3087  ;;  %v3084_v63 = vunpack.i.l.bf16 %v3083_v57  ;;  %v3085_v30 = vunpack.i.h.bf16 %v3083_v57 }
 0x17f   : > { %v3090_v62 = vunpack.i.h.bf16 %v3088_v2  ;;  %v3089_v50 = vunpack.i.l.bf16 %v3088_v2 }
 0x180   : > { %v1775_v40 = vsel %vm1748_vm6, %v1742_v5, %v3084_v63  ;;  %v1776_v4 = vsel %vm1748_vm6, %v1743_v33, %v3085_v30 }
 0x181   : > { %v3093_v24 = vpop.permute.xlu1 %3092  ;;  %v1806_v6 = vsel %vm1781_vm7, %v1773_v51, %v3089_v50  ;;  %v1807_v39 = vsel %vm1781_vm7, %v1774_v37, %v3090_v62 }
 0x182   : > { %v3098_v46 = vpop.permute.xlu0 %3097  ;;  %v3094_v48 = vunpack.i.l.bf16 %v3093_v24  ;;  %v3095_v44 = vunpack.i.h.bf16 %v3093_v24  ;;  %v4419_v24 = vld [vmem:[#allocation20_spill] sm:$0xff] }
 0x183   : > { %v3100_v1 = vunpack.i.h.bf16 %v3098_v46  ;;  %v3099_v26 = vunpack.i.l.bf16 %v3098_v46 }
 0x184   : > { %v1808_v42 = vsel %vm1781_vm7, %v1775_v40, %v3094_v48  ;;  %v1809_v20 = vsel %vm1781_vm7, %v1776_v4, %v3095_v44 }
 0x185   : > { %v3103_v0 = vpop.permute.xlu1 %3102  ;;  %v1839_v17 = vsel %vm1814_vm8, %v1806_v6, %v3099_v26  ;;  %v1840_v9 = vsel %vm1814_vm8, %v1807_v39, %v3100_v1 }
 0x186   : > { %v3108_v41 = vpop.permute.xlu0 %3107  ;;  %v3105_v31 = vunpack.i.h.bf16 %v3103_v0  ;;  %v3104_v34 = vunpack.i.l.bf16 %v3103_v0 }
 0x187   : > { %v3110_v18 = vunpack.i.h.bf16 %v3108_v41  ;;  %v3109_v55 = vunpack.i.l.bf16 %v3108_v41 }
 0x188   : > { %v1841_v57 = vsel %vm1814_vm8, %v1808_v42, %v3104_v34  ;;  %v1842_v47 = vsel %vm1814_vm8, %v1809_v20, %v3105_v31 }
 0x189   : > { %v1872_v61 = vsel %vm1847_vm9, %v1839_v17, %v3109_v55  ;;  %v1873_v12 = vsel %vm1847_vm9, %v1840_v9, %v3110_v18  ;;  %v3113_v21 = vpop.permute.xlu1 %3112 }
 0x18a   : > { %v1892_v8 = vpack.c.bf16 %v1873_v12, %v1872_v61  ;;  %v3115_v28 = vunpack.i.h.bf16 %v3113_v21  ;;  %v3114_v19 = vunpack.i.l.bf16 %v3113_v21  ;;  %v3118_v7 = vpop.permute.xlu0 %3117 }
 0x18b   : > { %v3119_v23 = vunpack.i.l.bf16 %v3118_v7  ;;  %v3120_v16 = vunpack.i.h.bf16 %v3118_v7 }
 0x18c   : > { %v1874_v13 = vsel %vm1847_vm9, %v1841_v57, %v3114_v19  ;;  %v1875_v32 = vsel %vm1847_vm9, %v1842_v47, %v3115_v28  ;;  %2503 = vmatprep.mubr.msk.bf16.mxu1 %vm1916_vm10, %v1892_v8 }
 0x18d   : > { %v1893_v45 = vpack.c.bf16 %v1875_v32, %v1874_v13  ;;  %v3123_v43 = vpop.permute.xlu1 %3122  ;;  %v1711_v59 = vsel %vm1682_vm4, %v4418_v25, %v3119_v23  ;;  %v1712_v36 = vsel %vm1682_vm4, %v4419_v24, %v3120_v16 }
 0x18e   : > { %v3128_v29 = vpop.permute.xlu0 %3127  ;;  %v3125_v10 = vunpack.i.h.bf16 %v3123_v43  ;;  %v3124_v27 = vunpack.i.l.bf16 %v3123_v43 }
 0x18f   : > { %2504 = vmatmul.mubr.msk.bf16.gmra.mrb[8].mxu1 %vm1916_vm10, %v1893_v45  ;;  %v3130_v3 = vunpack.i.h.bf16 %v3128_v29  ;;  %v3129_v49 = vunpack.i.l.bf16 %v3128_v29 }
 0x190   : > { %v1713_v54 = vsel %vm1682_vm4, %v4420_v58, %v3124_v27  ;;  %v1714_v35 = vsel %vm1682_vm4, %v4421_v56, %v3125_v10 }
 0x191   : > { %v3133_v11 = vpop.permute.xlu1 %3132  ;;  %v1744_v53 = vsel %vm1715_vm5, %v1711_v59, %v3129_v49  ;;  %v1745_v63 = vsel %vm1715_vm5, %v1712_v36, %v3130_v3 }
 0x192   : > { %v3138_v2 = vpop.permute.xlu0 %3137  ;;  %v3134_v60 = vunpack.i.l.bf16 %v3133_v11  ;;  %v3135_v1 = vunpack.i.h.bf16 %v3133_v11 }
 0x193   : > { %v3140_v38 = vunpack.i.h.bf16 %v3138_v2  ;;  %v3139_v22 = vunpack.i.l.bf16 %v3138_v2 }
 0x194   : > { %v1746_v39 = vsel %vm1715_vm5, %v1713_v54, %v3134_v60  ;;  %v1747_v17 = vsel %vm1715_vm5, %v1714_v35, %v3135_v1 }
 0x195   : > { %v3143_v15 = vpop.permute.xlu1 %3142  ;;  %v1777_v30 = vsel %vm1748_vm6, %v1744_v53, %v3139_v22  ;;  %v1778_v48 = vsel %vm1748_vm6, %v1745_v63, %v3140_v38 }
 0x196   : > { %v3148_v14 = vpop.permute.xlu0 %3147  ;;  %v3144_v26 = vunpack.i.l.bf16 %v3143_v15  ;;  %v3145_v0 = vunpack.i.h.bf16 %v3143_v15 }
 0x197   : > { %v3150_v62 = vunpack.i.h.bf16 %v3148_v14  ;;  %v3149_v50 = vunpack.i.l.bf16 %v3148_v14 }
 0x198   : > { %v1779_v9 = vsel %vm1748_vm6, %v1746_v39, %v3144_v26  ;;  %v1780_v61 = vsel %vm1748_vm6, %v1747_v17, %v3145_v0 }
 0x199   : > { %v3153_v52 = vpop.permute.xlu1 %3152  ;;  %v1810_v44 = vsel %vm1781_vm7, %v1777_v30, %v3149_v50  ;;  %v1811_v41 = vsel %vm1781_vm7, %v1778_v48, %v3150_v62 }
 0x19a   : > { %v3158_v46 = vpop.permute.xlu0 %3157  ;;  %v3154_v5 = vunpack.i.l.bf16 %v3153_v52  ;;  %v3155_v31 = vunpack.i.h.bf16 %v3153_v52 }
 0x19b   : > { %v3160_v51 = vunpack.i.h.bf16 %v3158_v46  ;;  %v3159_v37 = vunpack.i.l.bf16 %v3158_v46 }
 0x19c   : > { %v1812_v12 = vsel %vm1781_vm7, %v1779_v9, %v3154_v5  ;;  %v1813_v28 = vsel %vm1781_vm7, %v1780_v61, %v3155_v31 }
 0x19d   : > { %v3163_v6 = vpop.permute.xlu1 %3162  ;;  %v1843_v4 = vsel %vm1814_vm8, %v1810_v44, %v3159_v37  ;;  %v1844_v42 = vsel %vm1814_vm8, %v1811_v41, %v3160_v51 }
 0x19e   : > { %v3168_v34 = vpop.permute.xlu0 %3167  ;;  %v3165_v18 = vunpack.i.h.bf16 %v3163_v6  ;;  %v3164_v55 = vunpack.i.l.bf16 %v3163_v6 }
 0x19f   : > { %v3170_v33 = vunpack.i.h.bf16 %v3168_v34  ;;  %v3169_v40 = vunpack.i.l.bf16 %v3168_v34 }
 0x1a0   : > { %v1845_v47 = vsel %vm1814_vm8, %v1812_v12, %v3164_v55  ;;  %v1846_v13 = vsel %vm1814_vm8, %v1813_v28, %v3165_v18 }
 0x1a1   : > { %v1876_v21 = vsel %vm1847_vm9, %v1843_v4, %v3169_v40  ;;  %v1877_v20 = vsel %vm1847_vm9, %v1844_v42, %v3170_v33  ;;  %v3173_v8 = vpop.permute.xlu1 %3172 }
 0x1a2   : > { %v1894_v19 = vpack.c.bf16 %v1877_v20, %v1876_v21  ;;  %v3175_v7 = vunpack.i.h.bf16 %v3173_v8  ;;  %v3174_v57 = vunpack.i.l.bf16 %v3173_v8 }
 0x1a4   : > { %v1878_v32 = vsel %vm1847_vm9, %v1845_v47, %v3174_v57  ;;  %v1879_v45 = vsel %vm1847_vm9, %v1846_v13, %v3175_v7  ;;  %2507 = vmatprep.mubr.msk.bf16.mxu1 %vm1916_vm10, %v1894_v19 }
 0x1a5   : > { %v1895_v43 = vpack.c.bf16 %v1879_v45, %v1878_v32 }
 0x1a7   : > { %2508 = vmatmul.mubr.msk.bf16.gmra.mrb[12].mxu1 %vm1916_vm10, %v1895_v43 }
 0x1db   : > { %v2481_v29 = vpop.f32.mrb[0].mxu0 }
 0x1dc   : > { %2132 = vst.msk [vmem:[%s4223_s8 + $0x10] sm:$0xff] %vm183_vm0, %v2481_v29  ;;  %v2003_v11 = vpop.f32.mrb[1].mxu0  ;;  %v2233_v16 = vmul.f32 %v2481_v29, %v2481_v29  ;;  %v2165_v49 = vsel %vm183_vm0, %v2481_v29, 0.0 }
 0x1dd   : > { %2130 = vst.msk [vmem:[%s4223_s8] sm:$0xff] %vm183_vm0, %v2003_v11  ;;  %v2231_v2 = vmul.f32 %v2003_v11, %v2003_v11  ;;  %v2482_v23 = vpop.f32.mrb[2].mxu0  ;;  %v2162_v14 = vsel %vm183_vm0, %v2003_v11, 0.0 }
 0x1de   : > { %2133 = vst.msk [vmem:[%s4223_s8 + $0x18] sm:$0xff] %vm183_vm0, %v2482_v23  ;;  %v2006_v15 = vpop.f32.mrb[3].mxu0  ;;  %v2234_v59 = vmul.f32 %v2482_v23, %v2482_v23  ;;  %v2266_v24 = vsel %vm183_vm0, %v2233_v16, 0.0  ;;  %v2167_v36 = vsel %vm183_vm0, %v2482_v23, 0.0 }
 0x1df   : > { %2131 = vst.msk [vmem:[%s4223_s8 + $0x8] sm:$0xff] %vm183_vm0, %v2006_v15  ;;  %v2163_v10 = vsel %vm183_vm0, %v2006_v15, 0.0  ;;  %v2232_v27 = vmul.f32 %v2006_v15, %v2006_v15  ;;  %v2263_v25 = vsel %vm183_vm0, %v2231_v2, 0.0 }
 0x1e0   : > { %v2164_v3 = vadd.f32 %v2163_v10, %v2162_v14  ;;  %v2268_v50 = vsel %vm183_vm0, %v2234_v59, 0.0 }
 0x1e1   : > { %v2264_v38 = vsel %vm183_vm0, %v2232_v27, 0.0 }
 0x1e2   : > { %v2166_v22 = vadd.f32 %v2165_v49, %v2164_v3  ;;  %v2265_v52 = vadd.f32 %v2264_v38, %v2263_v25 }
 0x1e4   : > { %v2267_v60 = vadd.f32 %v2266_v24, %v2265_v52  ;;  %v2168_v62 = vadd.f32 %v2167_v36, %v2166_v22 }
 0x1e6   : > { %v2269_v46 = vadd.f32 %v2268_v50, %v2267_v60 }
 0x1ef   : > { %v2485_v58 = vpop.f32.mrb[4].mxu0 }
 0x1f0   : > { %2136 = vst.msk [vmem:[%s4223_s8 + $0x30] sm:$0xff] %vm183_vm0, %v2485_v58  ;;  %v2019_v54 = vpop.f32.mrb[5].mxu0  ;;  %v2237_v26 = vmul.f32 %v2485_v58, %v2485_v58  ;;  %v2173_v5 = vsel %vm183_vm0, %v2485_v58, 0.0 }
 0x1f1   : > { %2134 = vst.msk [vmem:[%s4223_s8 + $0x20] sm:$0xff] %vm183_vm0, %v2019_v54  ;;  %v2169_v56 = vsel %vm183_vm0, %v2019_v54, 0.0  ;;  %v2235_v35 = vmul.f32 %v2019_v54, %v2019_v54  ;;  %v2486_v53 = vpop.f32.mrb[6].mxu0 }
 0x1f2   : > { %v2170_v63 = vadd.f32 %v2169_v56, %v2168_v62  ;;  %2137 = vst.msk [vmem:[%s4223_s8 + $0x38] sm:$0xff] %vm183_vm0, %v2486_v53  ;;  %v2022_v1 = vpop.f32.mrb[7].mxu0  ;;  %v2238_v6 = vmul.f32 %v2486_v53, %v2486_v53  ;;  %v2274_v31 = vsel %vm183_vm0, %v2237_v26, 0.0  ;;  %v2175_v34 = vsel %vm183_vm0, %v2486_v53, 0.0 }
 0x1f3   : > { %v2270_v51 = vsel %vm183_vm0, %v2235_v35, 0.0  ;;  %2135 = vst.msk [vmem:[%s4223_s8 + $0x28] sm:$0xff] %vm183_vm0, %v2022_v1  ;;  %v2171_v37 = vsel %vm183_vm0, %v2022_v1, 0.0  ;;  %v2236_v30 = vmul.f32 %v2022_v1, %v2022_v1 }
 0x1f4   : > { %v2271_v48 = vadd.f32 %v2270_v51, %v2269_v46  ;;  %v2172_v0 = vadd.f32 %v2171_v37, %v2170_v63  ;;  %v2276_v33 = vsel %vm183_vm0, %v2238_v6, 0.0 }
 0x1f5   : > { %v2272_v39 = vsel %vm183_vm0, %v2236_v30, 0.0 }
 0x1f6   : > { %v2174_v44 = vadd.f32 %v2173_v5, %v2172_v0  ;;  %v2273_v41 = vadd.f32 %v2272_v39, %v2271_v48 }
 0x1f8   : > { %v2275_v18 = vadd.f32 %v2274_v31, %v2273_v41  ;;  %v2176_v55 = vadd.f32 %v2175_v34, %v2174_v44 }
 0x1fa   : > { %v2277_v40 = vadd.f32 %v2276_v33, %v2275_v18 }
 0x203   : > { %v2489_v17 = vpop.f32.mrb[8].mxu0 }
 0x204   : > { %2140 = vst.msk [vmem:[%s4223_s8 + $0x50] sm:$0xff] %vm183_vm0, %v2489_v17  ;;  %v2035_v9 = vpop.f32.mrb[9].mxu0  ;;  %v2241_v20 = vmul.f32 %v2489_v17, %v2489_v17  ;;  %v2181_v47 = vsel %vm183_vm0, %v2489_v17, 0.0 }
 0x205   : > { %2138 = vst.msk [vmem:[%s4223_s8 + $0x40] sm:$0xff] %vm183_vm0, %v2035_v9  ;;  %v2177_v4 = vsel %vm183_vm0, %v2035_v9, 0.0  ;;  %v2239_v42 = vmul.f32 %v2035_v9, %v2035_v9  ;;  %v2490_v61 = vpop.f32.mrb[10].mxu0 }
 0x206   : > { %v2178_v12 = vadd.f32 %v2177_v4, %v2176_v55  ;;  %2141 = vst.msk [vmem:[%s4223_s8 + $0x58] sm:$0xff] %vm183_vm0, %v2490_v61  ;;  %v2038_v21 = vpop.f32.mrb[11].mxu0  ;;  %v2242_v13 = vmul.f32 %v2490_v61, %v2490_v61  ;;  %v2282_v29 = vsel %vm183_vm0, %v2241_v20, 0.0  ;;  %v2183_v11 = vsel %vm183_vm0, %v2490_v61, 0.0 }
 0x207   : > { %v2278_v8 = vsel %vm183_vm0, %v2239_v42, 0.0  ;;  %2139 = vst.msk [vmem:[%s4223_s8 + $0x48] sm:$0xff] %vm183_vm0, %v2038_v21  ;;  %v2179_v28 = vsel %vm183_vm0, %v2038_v21, 0.0  ;;  %v2240_v19 = vmul.f32 %v2038_v21, %v2038_v21 }
 0x208   : > { %v2279_v7 = vadd.f32 %v2278_v8, %v2277_v40  ;;  %v2180_v57 = vadd.f32 %v2179_v28, %v2178_v12  ;;  %v2284_v15 = vsel %vm183_vm0, %v2242_v13, 0.0 }
 0x209   : > { %v2280_v32 = vsel %vm183_vm0, %v2240_v19, 0.0 }
 0x20a   : > { %v2182_v45 = vadd.f32 %v2181_v47, %v2180_v57  ;;  %v2281_v43 = vadd.f32 %v2280_v32, %v2279_v7 }
 0x20c   : > { %v2283_v2 = vadd.f32 %v2282_v29, %v2281_v43  ;;  %v2184_v23 = vadd.f32 %v2183_v11, %v2182_v45 }
 0x20e   : > { %v2285_v16 = vadd.f32 %v2284_v15, %v2283_v2 }
 0x21a   : > { %v2493_v14 = vpop.f32.mrb[12].mxu0 }
 0x21b   : > { %2144 = vst.msk [vmem:[%s4223_s8 + $0x70] sm:$0xff] %vm183_vm0, %v2493_v14  ;;  %v2051_v10 = vpop.f32.mrb[13].mxu0  ;;  %v2245_v38 = vmul.f32 %v2493_v14, %v2493_v14  ;;  %v2189_v62 = vsel %vm183_vm0, %v2493_v14, 0.0 }
 0x21c   : > { %2142 = vst.msk [vmem:[%s4223_s8 + $0x60] sm:$0xff] %vm183_vm0, %v2051_v10  ;;  %v2185_v27 = vsel %vm183_vm0, %v2051_v10, 0.0  ;;  %v2243_v3 = vmul.f32 %v2051_v10, %v2051_v10  ;;  %v2494_v49 = vpop.f32.mrb[14].mxu0 }
 0x21d   : > { %v2186_v25 = vadd.f32 %v2185_v27, %v2184_v23  ;;  %2145 = vst.msk [vmem:[%s4223_s8 + $0x78] sm:$0xff] %vm183_vm0, %v2494_v49  ;;  %v2054_v59 = vpop.f32.mrb[15].mxu0  ;;  %v2246_v50 = vmul.f32 %v2494_v49, %v2494_v49  ;;  %v2290_v56 = vsel %vm183_vm0, %v2245_v38, 0.0  ;;  %v2191_v35 = vsel %vm183_vm0, %v2494_v49, 0.0 }
 0x21e   : > { %v2286_v22 = vsel %vm183_vm0, %v2243_v3, 0.0  ;;  %2143 = vst.msk [vmem:[%s4223_s8 + $0x68] sm:$0xff] %vm183_vm0, %v2054_v59  ;;  %v2187_v52 = vsel %vm183_vm0, %v2054_v59, 0.0  ;;  %v2244_v24 = vmul.f32 %v2054_v59, %v2054_v59 }
 0x21f   : > { %v2287_v36 = vadd.f32 %v2286_v22, %v2285_v16  ;;  %v2188_v60 = vadd.f32 %v2187_v52, %v2186_v25  ;;  %v2292_v1 = vsel %vm183_vm0, %v2246_v50, 0.0 }
 0x220   : > { %v2288_v46 = vsel %vm183_vm0, %v2244_v24, 0.0 }
 0x221   : > { %v2190_v58 = vadd.f32 %v2189_v62, %v2188_v60  ;;  %v2289_v54 = vadd.f32 %v2288_v46, %v2287_v36 }
 0x223   : > { %v2291_v53 = vadd.f32 %v2290_v56, %v2289_v54  ;;  %v2192_v63 = vadd.f32 %v2191_v35, %v2190_v58 }
 0x225   : > { %v2293_v26 = vadd.f32 %v2292_v1, %v2291_v53 }
 0x232   : > { %v2497_v51 = vpop.f32.mrb[0].mxu1 }
 0x233   : > { %2148 = vst.msk [vmem:[%s4223_s8 + $0x90] sm:$0xff] %vm183_vm0, %v2497_v51  ;;  %v2067_v37 = vpop.f32.mrb[1].mxu1  ;;  %v2249_v39 = vmul.f32 %v2497_v51, %v2497_v51  ;;  %v2197_v55 = vsel %vm183_vm0, %v2497_v51, 0.0 }
 0x234   : > { %2146 = vst.msk [vmem:[%s4223_s8 + $0x80] sm:$0xff] %vm183_vm0, %v2067_v37  ;;  %v2193_v30 = vsel %vm183_vm0, %v2067_v37, 0.0  ;;  %v2247_v48 = vmul.f32 %v2067_v37, %v2067_v37  ;;  %v2498_v0 = vpop.f32.mrb[2].mxu1 }
 0x235   : > { %v2194_v5 = vadd.f32 %v2193_v30, %v2192_v63  ;;  %2149 = vst.msk [vmem:[%s4223_s8 + $0x98] sm:$0xff] %vm183_vm0, %v2498_v0  ;;  %v2070_v6 = vpop.f32.mrb[3].mxu1  ;;  %v2250_v33 = vmul.f32 %v2498_v0, %v2498_v0  ;;  %v2298_v4 = vsel %vm183_vm0, %v2249_v39, 0.0  ;;  %v2199_v42 = vsel %vm183_vm0, %v2498_v0, 0.0 }
 0x236   : > { %v2294_v44 = vsel %vm183_vm0, %v2247_v48, 0.0  ;;  %2147 = vst.msk [vmem:[%s4223_s8 + $0x88] sm:$0xff] %vm183_vm0, %v2070_v6  ;;  %v2195_v41 = vsel %vm183_vm0, %v2070_v6, 0.0  ;;  %v2248_v31 = vmul.f32 %v2070_v6, %v2070_v6 }
 0x237   : > { %v2295_v34 = vadd.f32 %v2294_v44, %v2293_v26  ;;  %v2196_v18 = vadd.f32 %v2195_v41, %v2194_v5  ;;  %v2300_v21 = vsel %vm183_vm0, %v2250_v33, 0.0 }
 0x238   : > { %v2296_v40 = vsel %vm183_vm0, %v2248_v31, 0.0 }
 0x239   : > { %v2198_v17 = vadd.f32 %v2197_v55, %v2196_v18  ;;  %v2297_v9 = vadd.f32 %v2296_v40, %v2295_v34 }
 0x23b   : > { %v2299_v61 = vadd.f32 %v2298_v4, %v2297_v9  ;;  %v2200_v12 = vadd.f32 %v2199_v42, %v2198_v17 }
 0x23d   : > { %v2301_v20 = vadd.f32 %v2300_v21, %v2299_v61 }
 0x24a   : > { %v2501_v8 = vpop.f32.mrb[4].mxu1 }
 0x24b   : > { %2152 = vst.msk [vmem:[%s4223_s8 + $0xb0] sm:$0xff] %vm183_vm0, %v2501_v8  ;;  %v2083_v28 = vpop.f32.mrb[5].mxu1  ;;  %v2253_v32 = vmul.f32 %v2501_v8, %v2501_v8  ;;  %v2205_v23 = vsel %vm183_vm0, %v2501_v8, 0.0 }
 0x24c   : > { %2150 = vst.msk [vmem:[%s4223_s8 + $0xa0] sm:$0xff] %vm183_vm0, %v2083_v28  ;;  %v2201_v19 = vsel %vm183_vm0, %v2083_v28, 0.0  ;;  %v2251_v7 = vmul.f32 %v2083_v28, %v2083_v28  ;;  %v2502_v57 = vpop.f32.mrb[6].mxu1 }
 0x24d   : > { %v2202_v47 = vadd.f32 %v2201_v19, %v2200_v12  ;;  %2153 = vst.msk [vmem:[%s4223_s8 + $0xb8] sm:$0xff] %vm183_vm0, %v2502_v57  ;;  %v2086_v13 = vpop.f32.mrb[7].mxu1  ;;  %v2254_v15 = vmul.f32 %v2502_v57, %v2502_v57  ;;  %v2306_v27 = vsel %vm183_vm0, %v2253_v32, 0.0  ;;  %v2207_v3 = vsel %vm183_vm0, %v2502_v57, 0.0 }
 0x24e   : > { %v2302_v45 = vsel %vm183_vm0, %v2251_v7, 0.0  ;;  %2151 = vst.msk [vmem:[%s4223_s8 + $0xa8] sm:$0xff] %vm183_vm0, %v2086_v13  ;;  %v2203_v43 = vsel %vm183_vm0, %v2086_v13, 0.0  ;;  %v2252_v29 = vmul.f32 %v2086_v13, %v2086_v13 }
 0x24f   : > { %v2303_v11 = vadd.f32 %v2302_v45, %v2301_v20  ;;  %v2204_v2 = vadd.f32 %v2203_v43, %v2202_v47  ;;  %v2308_v59 = vsel %vm183_vm0, %v2254_v15, 0.0 }
 0x250   : > { %v2304_v16 = vsel %vm183_vm0, %v2252_v29, 0.0 }
 0x251   : > { %v2206_v14 = vadd.f32 %v2205_v23, %v2204_v2  ;;  %v2305_v10 = vadd.f32 %v2304_v16, %v2303_v11 }
 0x253   : > { %v2307_v49 = vadd.f32 %v2306_v27, %v2305_v10  ;;  %v2208_v25 = vadd.f32 %v2207_v3, %v2206_v14 }
 0x255   : > { %v2309_v38 = vadd.f32 %v2308_v59, %v2307_v49 }
 0x262   : > { %v2505_v22 = vpop.f32.mrb[8].mxu1 }
 0x263   : > { %2156 = vst.msk [vmem:[%s4223_s8 + $0xd0] sm:$0xff] %vm183_vm0, %v2505_v22  ;;  %v2099_v52 = vpop.f32.mrb[9].mxu1  ;;  %v2257_v46 = vmul.f32 %v2505_v22, %v2505_v22  ;;  %v2213_v63 = vsel %vm183_vm0, %v2505_v22, 0.0 }
 0x264   : > { %2154 = vst.msk [vmem:[%s4223_s8 + $0xc0] sm:$0xff] %vm183_vm0, %v2099_v52  ;;  %v2209_v24 = vsel %vm183_vm0, %v2099_v52, 0.0  ;;  %v2255_v36 = vmul.f32 %v2099_v52, %v2099_v52  ;;  %v2506_v60 = vpop.f32.mrb[10].mxu1 }
 0x265   : > { %v2210_v62 = vadd.f32 %v2209_v24, %v2208_v25  ;;  %2157 = vst.msk [vmem:[%s4223_s8 + $0xd8] sm:$0xff] %vm183_vm0, %v2506_v60  ;;  %v2102_v50 = vpop.f32.mrb[11].mxu1  ;;  %v2258_v1 = vmul.f32 %v2506_v60, %v2506_v60  ;;  %v2314_v30 = vsel %vm183_vm0, %v2257_v46, 0.0  ;;  %v2215_v48 = vsel %vm183_vm0, %v2506_v60, 0.0 }
 0x266   : > { %v2310_v58 = vsel %vm183_vm0, %v2255_v36, 0.0  ;;  %2155 = vst.msk [vmem:[%s4223_s8 + $0xc8] sm:$0xff] %vm183_vm0, %v2102_v50  ;;  %v2211_v54 = vsel %vm183_vm0, %v2102_v50, 0.0  ;;  %v2256_v56 = vmul.f32 %v2102_v50, %v2102_v50 }
 0x267   : > { %v2311_v35 = vadd.f32 %v2310_v58, %v2309_v38  ;;  %v2212_v53 = vadd.f32 %v2211_v54, %v2210_v62  ;;  %v2316_v6 = vsel %vm183_vm0, %v2258_v1, 0.0 }
 0x268   : > { %v2312_v26 = vsel %vm183_vm0, %v2256_v56, 0.0 }
 0x269   : > { %v2214_v51 = vadd.f32 %v2213_v63, %v2212_v53  ;;  %v2313_v37 = vadd.f32 %v2312_v26, %v2311_v35 }
 0x26b   : > { %v2315_v0 = vadd.f32 %v2314_v30, %v2313_v37  ;;  %v2216_v5 = vadd.f32 %v2215_v48, %v2214_v51 }
 0x26d   : > { %v2317_v39 = vadd.f32 %v2316_v6, %v2315_v0 }
 0x27a   : > { %v2509_v44 = vpop.f32.mrb[12].mxu1 }
 0x27b   : > { %2160 = vst.msk [vmem:[%s4223_s8 + $0xf0] sm:$0xff] %vm183_vm0, %v2509_v44  ;;  %v2115_v41 = vpop.f32.mrb[13].mxu1  ;;  %v2261_v40 = vmul.f32 %v2509_v44, %v2509_v44  ;;  %v2221_v12 = vsel %vm183_vm0, %v2509_v44, 0.0 }
 0x27c   : > { %2158 = vst.msk [vmem:[%s4223_s8 + $0xe0] sm:$0xff] %vm183_vm0, %v2115_v41  ;;  %v2217_v31 = vsel %vm183_vm0, %v2115_v41, 0.0  ;;  %v2259_v34 = vmul.f32 %v2115_v41, %v2115_v41  ;;  %v2510_v18 = vpop.f32.mrb[14].mxu1 }
 0x27d   : > { %v2218_v55 = vadd.f32 %v2217_v31, %v2216_v5  ;;  %2161 = vst.msk [vmem:[%s4223_s8 + $0xf8] sm:$0xff] %vm183_vm0, %v2510_v18  ;;  %v2118_v33 = vpop.f32.mrb[15].mxu1  ;;  %v2262_v21 = vmul.f32 %v2510_v18, %v2510_v18  ;;  %v2322_v19 = vsel %vm183_vm0, %v2261_v40, 0.0  ;;  %v2223_v7 = vsel %vm183_vm0, %v2510_v18, 0.0 }
 0x27e   : > { %v2318_v17 = vsel %vm183_vm0, %v2259_v34, 0.0  ;;  %2159 = vst.msk [vmem:[%s4223_s8 + $0xe8] sm:$0xff] %vm183_vm0, %v2118_v33  ;;  %v2219_v9 = vsel %vm183_vm0, %v2118_v33, 0.0  ;;  %v2260_v4 = vmul.f32 %v2118_v33, %v2118_v33 }
 0x27f   : > { %v2319_v42 = vadd.f32 %v2318_v17, %v2317_v39  ;;  %v2220_v61 = vadd.f32 %v2219_v9, %v2218_v55  ;;  %v2324_v13 = vsel %vm183_vm0, %v2262_v21, 0.0 }
 0x280   : > { %v2320_v20 = vsel %vm183_vm0, %v2260_v4, 0.0 }
 0x281   : > { %v2222_v8 = vadd.f32 %v2221_v12, %v2220_v61  ;;  %v2321_v28 = vadd.f32 %v2320_v20, %v2319_v42 }
 0x283   : > { %v2224_v57 = vadd.f32 %v2223_v7, %v2222_v8  ;;  %v2323_v47 = vadd.f32 %v2322_v19, %v2321_v28 }
 0x285   : > { %v2225_v32 = vrot.slane %v2224_v57, 4  ;;  %v2325_v45 = vadd.f32 %v2324_v13, %v2323_v47 }
 0x287   : > { %v2226_v43 = vadd.f32 %v2225_v32, %v2224_v57  ;;  %v2326_v29 = vrot.slane %v2325_v45, 4 }
 0x289   : > { %v2227_v11 = vrot.slane %v2226_v43, 2  ;;  %v2327_v2 = vadd.f32 %v2326_v29, %v2325_v45 }
 0x28b   : > { %v2228_v23 = vadd.f32 %v2227_v11, %v2226_v43  ;;  %v2328_v15 = vrot.slane %v2327_v2, 2 }
 0x28d   : > { %v2229_v16 = vrot.slane %v2228_v23, 1  ;;  %v2329_v14 = vadd.f32 %v2328_v15, %v2327_v2 }
 0x28f   : > { %v2330_v10 = vrot.slane %v2329_v14, 1  ;;  %v2230_v27 = vadd.f32 %v2229_v16, %v2228_v23 }
 0x291   : > { %v2331_v3 = vadd.f32 %v2330_v10, %v2329_v14 }
 0x293   : > { %v2333_v49 = vsel %vm2332_vm11, %v2230_v27, %v2331_v3 }
 0x294   : > { %2334 = vst.msk [vmem:[%s181_s14] sm:$0x3] %vm186_vm1, %v2333_v49 }
 0x295 PF: > { %s14_s12 = sadd.s32 1, %s3196_s12  }
 0x296   : > { %p11_p4 = scmp.ge.s32.totalorder %s14_s12, 4  }
 0x298   :  { %13 = sbr.rel (!%p11_p4) target bundleno = 1 (0x1), region = 72 }

</bundles_post_ra>
